<compile_context>
chip_gen: v6e
topology: v6e:2x2x1
jax: 0.10.0
libtpu: 0.0.40
codegen_flags: <defaults>
</compile_context>

<pallas_src>
import functools

import numpy as np
import jax
import jax.numpy as jnp
from jax import lax
from jax.experimental import pallas as pl
from jax.experimental.pallas import tpu as pltpu

# MXU operand dtype for the conv matmuls (accumulation is always f32).
COMPUTE_DTYPE = jnp.bfloat16


def _round_up(x, m):
    return ((x + m - 1) // m) * m


# ----------------------------------------------------------------------------
# Host-side packing (cheap XLA glue, fused into the surrounding jit)
# ----------------------------------------------------------------------------
def _im2col_stride2_k4(x_nhwc, Ho, Wo):
    """Patches for a k=4, s=2, p=1 conv: [N,H,W,C] -> [N,Ho,Wo,16*C].
    Channel order is (kh, kw, c), matching w.reshape(16*C, Cout)."""
    xp = jnp.pad(x_nhwc, ((0, 0), (1, 1), (1, 1), (0, 0)))
    cols = []
    for kh in range(4):
        for kw in range(4):
            cols.append(xp[:, kh:kh + 2 * Ho - 1:2, kw:kw + 2 * Wo - 1:2, :])
    return jnp.concatenate(cols, axis=-1)


def _pack_weight(w_hwio, cin_pad, cout_pad):
    """[4,4,Cin,Cout] HWIO conv weight -> [4 (2x2 block pos), 4*cin_pad, cout_pad],
    matching the space-to-depth channel order (rh, rw, ci) used by the kernel."""
    _, _, Cin, Cout = w_hwio.shape
    w6 = w_hwio.reshape(2, 2, 2, 2, Cin, Cout)           # (bh, rh, bw, rw, Ci, Co)
    w6 = jnp.transpose(w6, (0, 2, 1, 3, 4, 5))           # (bh, bw, rh, rw, Ci, Co)
    w6 = jnp.pad(w6, ((0, 0),) * 4 + ((0, cin_pad - Cin), (0, cout_pad - Cout)))
    return w6.reshape(4, 4 * cin_pad, cout_pad)


# ----------------------------------------------------------------------------
# Fused encoder kernel (NB batch elements per grid step)
# ----------------------------------------------------------------------------
def _make_encoder_kernel(NB, hw_out, couts, row_cap=2048):
    """hw_out: ((Ho,Wo) per layer); couts: stored output channels per layer."""
    (Ho1, Wo1), (Ho2, Wo2), (Ho3, Wo3), (Ho4, Wo4) = hw_out
    c1, c2, c3, c4 = couts

    def pick_rg(Ho, Wo, need_even):
        # Largest (even, for layers that feed an s2d scatter) divisor of Ho
        # such that the matmul M = NB*rg*Wo stays within row_cap.
        cands = [d for d in range(1, Ho + 1)
                 if Ho % d == 0 and (not need_even or d % 2 == 0)]
        fit = [d for d in cands if NB * d * Wo <= row_cap]
        return max(fit) if fit else min(cands)

    rg1 = pick_rg(Ho1, Wo1, True)
    rg2 = pick_rg(Ho2, Wo2, True)
    rg3 = pick_rg(Ho3, Wo3, True)
    rg4 = pick_rg(Ho4, Wo4, False)

    def kernel(x1_ref, w1_ref, b1_ref, w2_ref, b2_ref, w3_ref, b3_ref,
               w4_ref, b4_ref, out_ref, xs2_ref, xs3_ref, xs4_ref):

        # ---- zero ONLY the never-written zero-padding ring of each s2d
        # scratch (cheap O(boundary) stores every step; the interior is fully
        # overwritten each grid step, so this is megacore-safe).
        for xs in (xs2_ref, xs3_ref, xs4_ref):
            _, hb, wb, cc = xs.shape
            xs[:, 0:1, :, :] = jnp.zeros((NB, 1, wb, cc), xs.dtype)
            xs[:, hb - 1:hb, :, :] = jnp.zeros((NB, 1, wb, cc), xs.dtype)
            xs[:, :, 0:1, :] = jnp.zeros((NB, hb, 1, cc), xs.dtype)
            xs[:, :, wb - 1:wb, :] = jnp.zeros((NB, hb, 1, cc), xs.dtype)

        def run_layer(lhs_fn, rhs_fn, n_kb, b_ref, Ho, Wo, rg, store_fn):
            bias = b_ref[...]                      # [1, Cout] f32 (hoisted)
            cout = bias.shape[-1]
            for g in range(Ho // rg):              # small static group count
                r0 = g * rg
                m = NB * rg * Wo
                acc = jnp.zeros((m, cout), jnp.float32)
                for kb in range(n_kb):
                    lhs = lhs_fn(r0, rg, kb)       # [NB, rg, Wo, K] bf16
                    acc = acc + jnp.dot(lhs.reshape(m, lhs.shape[-1]),
                                        rhs_fn(kb),
                                        preferred_element_type=jnp.float32)
                store_fn(r0, rg, jnp.maximum(acc + bias, 0.0))

        def make_scatter(xs_next, Wo, cout):
            # Scatter one row-group of ReLU output into the next layer's
            # space-to-depth buffer: value reshape + static slices only
            # (no MXU selection matmuls).
            Wh = Wo // 2

            def store(r0, rg, out2d):
                rh = rg // 2
                hb0 = r0 // 2
                o6 = out2d.astype(xs_next.dtype).reshape(NB, rh, 2, Wh, 2, cout)
                for rp in range(2):                # output-row parity
                    for cp in range(2):            # output-col parity
                        sub = lax.slice(o6, (0, 0, rp, 0, cp, 0),
                                        (NB, rh, rp + 1, Wh, cp + 1, cout))
                        sub = sub.reshape(NB, rh, Wh, cout)
                        blk = (1 - rp) * 2 + (1 - cp)   # s2d channel block
                        xs_next[:, hb0 + rp:hb0 + rp + rh,
                                cp:cp + Wh,
                                blk * cout:(blk + 1) * cout] = sub

            return store

        def final_store(r0, rg, out2d):
            out_ref[:, r0:r0 + rg, :, :] = (
                out2d.reshape(NB, rg, Wo4, c4).astype(out_ref.dtype))

        def s2d_lhs(xs, Wo):
            def fn(r0, rg, kb):
                bh, bw = kb // 2, kb % 2
                return xs[:, r0 + bh:r0 + bh + rg, bw:bw + Wo, :]
            return fn

        # ---- layer 1: im2col lhs, single K=128 matmul per row group --------
        run_layer(lambda r0, rg, kb: x1_ref[:, r0:r0 + rg, :, :],
                  lambda kb: w1_ref[...], 1, b1_ref, Ho1, Wo1, rg1,
                  make_scatter(xs2_ref, Wo1, c1))
        # ---- layers 2-4: s2d lhs, 4 accumulating matmuls per row group -----
        run_layer(s2d_lhs(xs2_ref, Wo2), lambda kb: w2_ref[kb], 4, b2_ref,
                  Ho2, Wo2, rg2, make_scatter(xs3_ref, Wo2, c2))
        run_layer(s2d_lhs(xs3_ref, Wo3), lambda kb: w3_ref[kb], 4, b3_ref,
                  Ho3, Wo3, rg3, make_scatter(xs4_ref, Wo3, c3))
        run_layer(s2d_lhs(xs4_ref, Wo4), lambda kb: w4_ref[kb], 4, b4_ref,
                  Ho4, Wo4, rg4, final_store)

    return kernel


# ----------------------------------------------------------------------------
# Public forward (NCHW in / NCHW out, matching Encoder.forward)
# ----------------------------------------------------------------------------
def encoder_forward(params, x_nchw):
    N, Cin, H, W = x_nchw.shape
    assert H % 16 == 0 and W % 16 == 0, "need 4 stride-2 halvings"

    couts_real = [int(w.shape[-1]) for (w, _) in params]    # [64,128,256,latent]
    latent = couts_real[3]
    c4p = _round_up(latent, 128)                             # lane-dense HBM out
    couts = (couts_real[0], couts_real[1], couts_real[2], c4p)

    hw = tuple((H >> k, W >> k) for k in range(1, 5))        # per-layer out H, W
    (Ho1, Wo1), _, _, (Ho4, Wo4) = (hw[0], hw[1], hw[2], hw[3])

    # Batching policy: fold enough images per grid step to feed the MXU's M
    # dimension (~256 rows for layer 1), but keep >=2 grid steps when the
    # batch allows so v7x's two TensorCores both get work.
    m_per_image = Ho1 * Wo1
    NB = min(N, max(1, -(-256 // m_per_image)), 8)
    if N >= 2 and N // NB < 2:
        NB = max(1, N // 2)
    G = -(-N // NB)
    Npad = G * NB

    # ---- host-side packing (cheap glue) ------------------------------------
    x_nhwc = jnp.transpose(x_nchw, (0, 2, 3, 1))
    x1 = _im2col_stride2_k4(x_nhwc, Ho1, Wo1)                # [N,Ho1,Wo1,16*Cin]
    K1 = 16 * Cin
    K1p = _round_up(K1, 128)
    x1 = jnp.pad(x1, ((0, Npad - N), (0, 0), (0, 0), (0, K1p - K1)))
    x1 = x1.astype(COMPUTE_DTYPE)

    w1, b1 = params[0]
    packed = [jnp.pad(w1.reshape(K1, couts[0]), ((0, K1p - K1), (0, 0)))
              .astype(COMPUTE_DTYPE),
              b1.reshape(1, couts[0]).astype(jnp.float32)]
    for li in range(1, 4):
        w, b = params[li]
        cin = int(w.shape[2])
        packed.append(_pack_weight(w, cin, couts[li]).astype(COMPUTE_DTYPE))
        packed.append(jnp.pad(b, (0, couts[li] - int(b.shape[0])))
                      .reshape(1, couts[li]).astype(jnp.float32))

    def const_spec(a):
        nd = a.ndim
        return pl.BlockSpec(a.shape, lambda g, _nd=nd: (0,) * _nd)

    in_specs = ([pl.BlockSpec((NB, Ho1, Wo1, K1p), lambda g: (g, 0, 0, 0))]
                + [const_spec(a) for a in packed])
    out_specs = pl.BlockSpec((NB, Ho4, Wo4, c4p), lambda g: (g, 0, 0, 0))

    s2d_shapes = [(NB, hw[0][0] // 2 + 1, hw[0][1] // 2 + 1, 4 * couts[0]),
                  (NB, hw[1][0] // 2 + 1, hw[1][1] // 2 + 1, 4 * couts[1]),
                  (NB, hw[2][0] // 2 + 1, hw[2][1] // 2 + 1, 4 * couts[2])]
    scratch = [pltpu.VMEM(s, COMPUTE_DTYPE) for s in s2d_shapes]

    # VMEM limit from actual buffer sizes, clamped to the chip's capacity.
    csz = np.dtype(COMPUTE_DTYPE).itemsize
    est = (2 * int(np.prod((NB, Ho1, Wo1, K1p))) * csz            # x1, dbl-buf
           + 2 * int(np.prod((NB, Ho4, Wo4, c4p))) * 4            # out, dbl-buf
           + 2 * sum(int(np.prod(a.shape)) * a.dtype.itemsize for a in packed)
           + sum(int(np.prod(s)) * csz for s in s2d_shapes))
    try:
        cap = int(pltpu.get_tpu_info().vmem_capacity_bytes)
    except Exception:
        cap = 64 * 1024 * 1024
    vmem_limit = int(min(max(2 * est + (8 << 20), 32 << 20), int(0.85 * cap)))

    out = pl.pallas_call(
        _make_encoder_kernel(NB, hw, couts),
        out_shape=jax.ShapeDtypeStruct((Npad, Ho4, Wo4, c4p), jnp.float32),
        grid=(G,),
        in_specs=in_specs,
        out_specs=out_specs,
        scratch_shapes=scratch,
        compiler_params=pltpu.CompilerParams(
            dimension_semantics=("parallel",),
            vmem_limit_bytes=vmem_limit),
    )(x1, *packed)

    out = out[:N, :, :, :latent]                    # drop batch / Cout padding
    return jnp.transpose(out, (0, 3, 1, 2))         # NHWC -> NCHW


# ----------------------------------------------------------------------------
# Deterministic parameter init (matches nn.Conv2d default init distribution)
# ----------------------------------------------------------------------------
def init_encoder_params(key, in_channels=3, latent_dim=128):
    channels = [in_channels, 64, 128, 256, latent_dim]
    params = []
    for i in range(4):
        cin, cout = channels[i], channels[i + 1]
        key, kw, kb = jax.random.split(key, 3)
        fan_in = 4 * 4 * cin
        scale = 1.0 / jnp.sqrt(jnp.float32(fan_in))
        w = jax.random.uniform(kw, (4, 4, cin, cout), jnp.float32,
                               minval=-scale, maxval=scale)   # HWIO
        b = jax.random.uniform(kb, (cout,), jnp.float32,
                               minval=-scale, maxval=scale)
        params.append((w, b))
    return params


def _reference_forward(params, x_nchw):
    """Pure-XLA fp32 reference of the same Encoder forward."""
    x = x_nchw
    for (w, b) in params:
        x = lax.conv_general_dilated(
            x, w, window_strides=(2, 2), padding=((1, 1), (1, 1)),
            dimension_numbers=("NCHW", "HWIO", "NCHW"),
            precision=lax.Precision.HIGHEST)
        x = jnp.maximum(x + b.reshape(1, -1, 1, 1), 0.0)
    return x


if __name__ == "__main__":
    key = jax.random.PRNGKey(0)
    key, kx = jax.random.split(key)

    # Small shapes consistent with the module: batch=2, in_channels=3, 16x16.
    x = jax.random.normal(kx, (2, 3, 16, 16), jnp.float32)
    params = init_encoder_params(key, in_channels=3, latent_dim=128)

    fwd = jax.jit(functools.partial(encoder_forward, params))
    out = jax.block_until_ready(fwd(x))

    assert out.shape == (2, 128, 1, 1), out.shape
    assert out.dtype == jnp.float32
    assert bool(jnp.all(out >= 0.0))  # ReLU output

    # Cross-check against a pure-XLA fp32 reference (loose tol: bf16 operands).
    ref = jax.block_until_ready(
        jax.jit(functools.partial(_reference_forward, params))(x))
    np.testing.assert_allclose(np.asarray(out), np.asarray(ref),
                               rtol=0.1, atol=0.05)

    print("KERNEL_OK")
</pallas_src>

<mosaic_0001>
module attributes {stable_mosaic.version = 11 : i64} {
  func.func @kernel(%arg0: i32, %arg1: memref<1x8x8x128xbf16, #tpu.memory_space<vmem>>, %arg2: memref<128x64xbf16, #tpu.memory_space<vmem>>, %arg3: memref<1x64xf32, #tpu.memory_space<vmem>>, %arg4: memref<4x256x128xbf16, #tpu.memory_space<vmem>>, %arg5: memref<1x128xf32, #tpu.memory_space<vmem>>, %arg6: memref<4x512x256xbf16, #tpu.memory_space<vmem>>, %arg7: memref<1x256xf32, #tpu.memory_space<vmem>>, %arg8: memref<4x1024x128xbf16, #tpu.memory_space<vmem>>, %arg9: memref<1x128xf32, #tpu.memory_space<vmem>>, %arg10: memref<1x1x1x128xf32, #tpu.memory_space<vmem>>, %arg11: memref<1x5x5x256xbf16, #tpu.memory_space<vmem>>, %arg12: memref<1x3x3x512xbf16, #tpu.memory_space<vmem>>, %arg13: memref<1x2x2x1024xbf16, #tpu.memory_space<vmem>>) attributes {dimension_semantics = [#tpu.dimension_semantics<parallel>], iteration_bounds = array<i64: 2>, scalar_prefetch = 0 : i64, scratch_operands = 3 : i64, tpu.core_type = #tpu.core_type<tc>, window_params = [{transform_indices = @transform_0, window_bounds = array<i64: 1, 8, 8, 128>}, {pipeline_mode = #tpu.pipeline_mode<synchronous>, transform_indices = @transform_1, window_bounds = array<i64: 128, 64>}, {pipeline_mode = #tpu.pipeline_mode<synchronous>, transform_indices = @transform_2, window_bounds = array<i64: 1, 64>}, {pipeline_mode = #tpu.pipeline_mode<synchronous>, transform_indices = @transform_3, window_bounds = array<i64: 4, 256, 128>}, {pipeline_mode = #tpu.pipeline_mode<synchronous>, transform_indices = @transform_4, window_bounds = array<i64: 1, 128>}, {pipeline_mode = #tpu.pipeline_mode<synchronous>, transform_indices = @transform_5, window_bounds = array<i64: 4, 512, 256>}, {pipeline_mode = #tpu.pipeline_mode<synchronous>, transform_indices = @transform_6, window_bounds = array<i64: 1, 256>}, {pipeline_mode = #tpu.pipeline_mode<synchronous>, transform_indices = @transform_7, window_bounds = array<i64: 4, 1024, 128>}, {pipeline_mode = #tpu.pipeline_mode<synchronous>, transform_indices = @transform_8, window_bounds = array<i64: 1, 128>}, {transform_indices = @transform_9, window_bounds = array<i64: 1, 1, 1, 128>}]} {
    %cst = arith.constant 0.000000e+00 : bf16
    %0 = vector.broadcast %cst : bf16 to vector<1x1x5x256xbf16>
    %c0 = arith.constant 0 : index
    %c0_0 = arith.constant 0 : index
    %c0_1 = arith.constant 0 : index
    %c0_2 = arith.constant 0 : index
    %1 = vector.load %arg11[%c0, %c0_0, %c0_1, %c0_2] : memref<1x5x5x256xbf16, #tpu.memory_space<vmem>>, vector<1x1x5x256xbf16>
    tpu.vector_store %arg11[%c0, %c0_0, %c0_1, %c0_2], %0 {strides = array<i32>} : memref<1x5x5x256xbf16, #tpu.memory_space<vmem>>, vector<1x1x5x256xbf16>,
    %cst_3 = arith.constant 0.000000e+00 : bf16
    %2 = vector.broadcast %cst_3 : bf16 to vector<1x1x5x256xbf16>
    %c0_4 = arith.constant 0 : index
    %c4 = arith.constant 4 : index
    %c0_5 = arith.constant 0 : index
    %c0_6 = arith.constant 0 : index
    %3 = vector.load %arg11[%c0_4, %c4, %c0_5, %c0_6] : memref<1x5x5x256xbf16, #tpu.memory_space<vmem>>, vector<1x1x5x256xbf16>
    tpu.vector_store %arg11[%c0_4, %c4, %c0_5, %c0_6], %2 {strides = array<i32>} : memref<1x5x5x256xbf16, #tpu.memory_space<vmem>>, vector<1x1x5x256xbf16>,
    %cst_7 = arith.constant 0.000000e+00 : bf16
    %4 = vector.broadcast %cst_7 : bf16 to vector<1x5x1x256xbf16>
    %c0_8 = arith.constant 0 : index
    %c0_9 = arith.constant 0 : index
    %c0_10 = arith.constant 0 : index
    %c0_11 = arith.constant 0 : index
    %5 = vector.load %arg11[%c0_8, %c0_9, %c0_10, %c0_11] : memref<1x5x5x256xbf16, #tpu.memory_space<vmem>>, vector<1x5x1x256xbf16>
    tpu.vector_store %arg11[%c0_8, %c0_9, %c0_10, %c0_11], %4 {strides = array<i32>} : memref<1x5x5x256xbf16, #tpu.memory_space<vmem>>, vector<1x5x1x256xbf16>,
    %cst_12 = arith.constant 0.000000e+00 : bf16
    %6 = vector.broadcast %cst_12 : bf16 to vector<1x5x1x256xbf16>
    %c0_13 = arith.constant 0 : index
    %c0_14 = arith.constant 0 : index
    %c4_15 = arith.constant 4 : index
    %c0_16 = arith.constant 0 : index
    %7 = vector.load %arg11[%c0_13, %c0_14, %c4_15, %c0_16] : memref<1x5x5x256xbf16, #tpu.memory_space<vmem>>, vector<1x5x1x256xbf16>
    tpu.vector_store %arg11[%c0_13, %c0_14, %c4_15, %c0_16], %6 {strides = array<i32>} : memref<1x5x5x256xbf16, #tpu.memory_space<vmem>>, vector<1x5x1x256xbf16>,
    %cst_17 = arith.constant 0.000000e+00 : bf16
    %8 = vector.broadcast %cst_17 : bf16 to vector<1x1x3x512xbf16>
    %c0_18 = arith.constant 0 : index
    %c0_19 = arith.constant 0 : index
    %c0_20 = arith.constant 0 : index
    %c0_21 = arith.constant 0 : index
    %9 = vector.load %arg12[%c0_18, %c0_19, %c0_20, %c0_21] : memref<1x3x3x512xbf16, #tpu.memory_space<vmem>>, vector<1x1x3x512xbf16>
    tpu.vector_store %arg12[%c0_18, %c0_19, %c0_20, %c0_21], %8 {strides = array<i32>} : memref<1x3x3x512xbf16, #tpu.memory_space<vmem>>, vector<1x1x3x512xbf16>,
    %cst_22 = arith.constant 0.000000e+00 : bf16
    %10 = vector.broadcast %cst_22 : bf16 to vector<1x1x3x512xbf16>
    %c0_23 = arith.constant 0 : index
    %c2 = arith.constant 2 : index
    %c0_24 = arith.constant 0 : index
    %c0_25 = arith.constant 0 : index
    %11 = vector.load %arg12[%c0_23, %c2, %c0_24, %c0_25] : memref<1x3x3x512xbf16, #tpu.memory_space<vmem>>, vector<1x1x3x512xbf16>
    tpu.vector_store %arg12[%c0_23, %c2, %c0_24, %c0_25], %10 {strides = array<i32>} : memref<1x3x3x512xbf16, #tpu.memory_space<vmem>>, vector<1x1x3x512xbf16>,
    %cst_26 = arith.constant 0.000000e+00 : bf16
    %12 = vector.broadcast %cst_26 : bf16 to vector<1x3x1x512xbf16>
    %c0_27 = arith.constant 0 : index
    %c0_28 = arith.constant 0 : index
    %c0_29 = arith.constant 0 : index
    %c0_30 = arith.constant 0 : index
    %13 = vector.load %arg12[%c0_27, %c0_28, %c0_29, %c0_30] : memref<1x3x3x512xbf16, #tpu.memory_space<vmem>>, vector<1x3x1x512xbf16>
    tpu.vector_store %arg12[%c0_27, %c0_28, %c0_29, %c0_30], %12 {strides = array<i32>} : memref<1x3x3x512xbf16, #tpu.memory_space<vmem>>, vector<1x3x1x512xbf16>,
    %cst_31 = arith.constant 0.000000e+00 : bf16
    %14 = vector.broadcast %cst_31 : bf16 to vector<1x3x1x512xbf16>
    %c0_32 = arith.constant 0 : index
    %c0_33 = arith.constant 0 : index
    %c2_34 = arith.constant 2 : index
    %c0_35 = arith.constant 0 : index
    %15 = vector.load %arg12[%c0_32, %c0_33, %c2_34, %c0_35] : memref<1x3x3x512xbf16, #tpu.memory_space<vmem>>, vector<1x3x1x512xbf16>
    tpu.vector_store %arg12[%c0_32, %c0_33, %c2_34, %c0_35], %14 {strides = array<i32>} : memref<1x3x3x512xbf16, #tpu.memory_space<vmem>>, vector<1x3x1x512xbf16>,
    %cst_36 = arith.constant 0.000000e+00 : bf16
    %16 = vector.broadcast %cst_36 : bf16 to vector<1x1x2x1024xbf16>
    %c0_37 = arith.constant 0 : index
    %c0_38 = arith.constant 0 : index
    %c0_39 = arith.constant 0 : index
    %c0_40 = arith.constant 0 : index
    %17 = vector.load %arg13[%c0_37, %c0_38, %c0_39, %c0_40] : memref<1x2x2x1024xbf16, #tpu.memory_space<vmem>>, vector<1x1x2x1024xbf16>
    tpu.vector_store %arg13[%c0_37, %c0_38, %c0_39, %c0_40], %16 {strides = array<i32>} : memref<1x2x2x1024xbf16, #tpu.memory_space<vmem>>, vector<1x1x2x1024xbf16>,
    %cst_41 = arith.constant 0.000000e+00 : bf16
    %18 = vector.broadcast %cst_41 : bf16 to vector<1x1x2x1024xbf16>
    %c0_42 = arith.constant 0 : index
    %c1 = arith.constant 1 : index
    %c0_43 = arith.constant 0 : index
    %c0_44 = arith.constant 0 : index
    %19 = vector.load %arg13[%c0_42, %c1, %c0_43, %c0_44] : memref<1x2x2x1024xbf16, #tpu.memory_space<vmem>>, vector<1x1x2x1024xbf16>
    tpu.vector_store %arg13[%c0_42, %c1, %c0_43, %c0_44], %18 {strides = array<i32>} : memref<1x2x2x1024xbf16, #tpu.memory_space<vmem>>, vector<1x1x2x1024xbf16>,
    %cst_45 = arith.constant 0.000000e+00 : bf16
    %20 = vector.broadcast %cst_45 : bf16 to vector<1x2x1x1024xbf16>
    %c0_46 = arith.constant 0 : index
    %c0_47 = arith.constant 0 : index
    %c0_48 = arith.constant 0 : index
    %c0_49 = arith.constant 0 : index
    %21 = vector.load %arg13[%c0_46, %c0_47, %c0_48, %c0_49] : memref<1x2x2x1024xbf16, #tpu.memory_space<vmem>>, vector<1x2x1x1024xbf16>
    tpu.vector_store %arg13[%c0_46, %c0_47, %c0_48, %c0_49], %20 {strides = array<i32>} : memref<1x2x2x1024xbf16, #tpu.memory_space<vmem>>, vector<1x2x1x1024xbf16>,
    %cst_50 = arith.constant 0.000000e+00 : bf16
    %22 = vector.broadcast %cst_50 : bf16 to vector<1x2x1x1024xbf16>
    %c0_51 = arith.constant 0 : index
    %c0_52 = arith.constant 0 : index
    %c1_53 = arith.constant 1 : index
    %c0_54 = arith.constant 0 : index
    %23 = vector.load %arg13[%c0_51, %c0_52, %c1_53, %c0_54] : memref<1x2x2x1024xbf16, #tpu.memory_space<vmem>>, vector<1x2x1x1024xbf16>
    tpu.vector_store %arg13[%c0_51, %c0_52, %c1_53, %c0_54], %22 {strides = array<i32>} : memref<1x2x2x1024xbf16, #tpu.memory_space<vmem>>, vector<1x2x1x1024xbf16>,
    %c0_55 = arith.constant 0 : index
    %c0_56 = arith.constant 0 : index
    %24 = vector.load %arg3[%c0_55, %c0_56] : memref<1x64xf32, #tpu.memory_space<vmem>>, vector<1x64xf32>
    %cst_57 = arith.constant 0.000000e+00 : f32
    %25 = vector.broadcast %cst_57 : f32 to vector<64x64xf32>
    %c0_58 = arith.constant 0 : index
    %c0_59 = arith.constant 0 : index
    %c0_60 = arith.constant 0 : index
    %c0_61 = arith.constant 0 : index
    %26 = vector.load %arg1[%c0_58, %c0_59, %c0_60, %c0_61] : memref<1x8x8x128xbf16, #tpu.memory_space<vmem>>, vector<1x8x8x128xbf16>
    %27 = vector.shape_cast %26 : vector<1x8x8x128xbf16> to vector<64x128xbf16>
    %c0_62 = arith.constant 0 : index
    %c0_63 = arith.constant 0 : index
    %28 = vector.load %arg2[%c0_62, %c0_63] : memref<128x64xbf16, #tpu.memory_space<vmem>>, vector<128x64xbf16>
    %cst_64 = arith.constant dense<0.000000e+00> : vector<64x64xf32>
    %29 = tpu.matmul %27, %28, %cst_64 {dimension_numbers = #tpu.dot_dimension_numbers<[1], [0], [0], [1], [0, 0, 1, 1], [], []>} : vector<64x128xbf16>, vector<128x64xbf16>, vector<64x64xf32> -> vector<64x64xf32>
    %30 = arith.addf %25, %29 : vector<64x64xf32>
    %31 = vector.broadcast %24 : vector<1x64xf32> to vector<64x64xf32>
    %32 = arith.addf %30, %31 : vector<64x64xf32>
    %cst_65 = arith.constant 0.000000e+00 : f32
    %33 = vector.broadcast %cst_65 : f32 to vector<64x64xf32>
    %34 = arith.maximumf %32, %33 : vector<64x64xf32>
    %35 = arith.truncf %34 : vector<64x64xf32> to vector<64x64xbf16>
    %36 = vector.shape_cast %35 : vector<64x64xbf16> to vector<1x4x2x4x2x64xbf16>
    %37 = vector.extract_strided_slice %36 {offsets = [0, 0, 0, 0, 0, 0], sizes = [1, 4, 1, 4, 1, 64], strides = [1, 1, 1, 1, 1, 1]} : vector<1x4x2x4x2x64xbf16> to vector<1x4x1x4x1x64xbf16>
    %38 = vector.shape_cast %37 : vector<1x4x1x4x1x64xbf16> to vector<1x4x4x64xbf16>
    %c0_66 = arith.constant 0 : index
    %c0_67 = arith.constant 0 : index
    %c0_68 = arith.constant 0 : index
    %c192 = arith.constant 192 : index
    %39 = vector.load %arg11[%c0_66, %c0_67, %c0_68, %c192] : memref<1x5x5x256xbf16, #tpu.memory_space<vmem>>, vector<1x4x4x64xbf16>
    tpu.vector_store %arg11[%c0_66, %c0_67, %c0_68, %c192], %38 {strides = array<i32>} : memref<1x5x5x256xbf16, #tpu.memory_space<vmem>>, vector<1x4x4x64xbf16>,
    %40 = vector.extract_strided_slice %36 {offsets = [0, 0, 0, 0, 1, 0], sizes = [1, 4, 1, 4, 1, 64], strides = [1, 1, 1, 1, 1, 1]} : vector<1x4x2x4x2x64xbf16> to vector<1x4x1x4x1x64xbf16>
    %41 = vector.shape_cast %40 : vector<1x4x1x4x1x64xbf16> to vector<1x4x4x64xbf16>
    %c0_69 = arith.constant 0 : index
    %c0_70 = arith.constant 0 : index
    %c1_71 = arith.constant 1 : index
    %c128 = arith.constant 128 : index
    %42 = vector.load %arg11[%c0_69, %c0_70, %c1_71, %c128] : memref<1x5x5x256xbf16, #tpu.memory_space<vmem>>, vector<1x4x4x64xbf16>
    tpu.vector_store %arg11[%c0_69, %c0_70, %c1_71, %c128], %41 {strides = array<i32>} : memref<1x5x5x256xbf16, #tpu.memory_space<vmem>>, vector<1x4x4x64xbf16>,
    %43 = vector.extract_strided_slice %36 {offsets = [0, 0, 1, 0, 0, 0], sizes = [1, 4, 1, 4, 1, 64], strides = [1, 1, 1, 1, 1, 1]} : vector<1x4x2x4x2x64xbf16> to vector<1x4x1x4x1x64xbf16>
    %44 = vector.shape_cast %43 : vector<1x4x1x4x1x64xbf16> to vector<1x4x4x64xbf16>
    %c0_72 = arith.constant 0 : index
    %c1_73 = arith.constant 1 : index
    %c0_74 = arith.constant 0 : index
    %c64 = arith.constant 64 : index
    %45 = vector.load %arg11[%c0_72, %c1_73, %c0_74, %c64] : memref<1x5x5x256xbf16, #tpu.memory_space<vmem>>, vector<1x4x4x64xbf16>
    tpu.vector_store %arg11[%c0_72, %c1_73, %c0_74, %c64], %44 {strides = array<i32>} : memref<1x5x5x256xbf16, #tpu.memory_space<vmem>>, vector<1x4x4x64xbf16>,
    %46 = vector.extract_strided_slice %36 {offsets = [0, 0, 1, 0, 1, 0], sizes = [1, 4, 1, 4, 1, 64], strides = [1, 1, 1, 1, 1, 1]} : vector<1x4x2x4x2x64xbf16> to vector<1x4x1x4x1x64xbf16>
    %47 = vector.shape_cast %46 : vector<1x4x1x4x1x64xbf16> to vector<1x4x4x64xbf16>
    %c0_75 = arith.constant 0 : index
    %c1_76 = arith.constant 1 : index
    %c1_77 = arith.constant 1 : index
    %c0_78 = arith.constant 0 : index
    %48 = vector.load %arg11[%c0_75, %c1_76, %c1_77, %c0_78] : memref<1x5x5x256xbf16, #tpu.memory_space<vmem>>, vector<1x4x4x64xbf16>
    tpu.vector_store %arg11[%c0_75, %c1_76, %c1_77, %c0_78], %47 {strides = array<i32>} : memref<1x5x5x256xbf16, #tpu.memory_space<vmem>>, vector<1x4x4x64xbf16>,
    %c0_79 = arith.constant 0 : index
    %c0_80 = arith.constant 0 : index
    %49 = vector.load %arg5[%c0_79, %c0_80] : memref<1x128xf32, #tpu.memory_space<vmem>>, vector<1x128xf32>
    %cst_81 = arith.constant 0.000000e+00 : f32
    %50 = vector.broadcast %cst_81 : f32 to vector<16x128xf32>
    %c0_82 = arith.constant 0 : index
    %c0_83 = arith.constant 0 : index
    %c0_84 = arith.constant 0 : index
    %c0_85 = arith.constant 0 : index
    %51 = vector.load %arg11[%c0_82, %c0_83, %c0_84, %c0_85] : memref<1x5x5x256xbf16, #tpu.memory_space<vmem>>, vector<1x4x4x256xbf16>
    %52 = vector.shape_cast %51 : vector<1x4x4x256xbf16> to vector<16x256xbf16>
    %c0_86 = arith.constant 0 : index
    %c0_87 = arith.constant 0 : index
    %c0_88 = arith.constant 0 : index
    %53 = vector.load %arg4[%c0_86, %c0_87, %c0_88] : memref<4x256x128xbf16, #tpu.memory_space<vmem>>, vector<1x256x128xbf16>
    %54 = vector.shape_cast %53 : vector<1x256x128xbf16> to vector<256x128xbf16>
    %cst_89 = arith.constant dense<0.000000e+00> : vector<16x128xf32>
    %55 = tpu.matmul %52, %54, %cst_89 {dimension_numbers = #tpu.dot_dimension_numbers<[1], [0], [0], [1], [0, 0, 1, 1], [], []>} : vector<16x256xbf16>, vector<256x128xbf16>, vector<16x128xf32> -> vector<16x128xf32>
    %56 = arith.addf %50, %55 : vector<16x128xf32>
    %c0_90 = arith.constant 0 : index
    %c0_91 = arith.constant 0 : index
    %c1_92 = arith.constant 1 : index
    %c0_93 = arith.constant 0 : index
    %57 = vector.load %arg11[%c0_90, %c0_91, %c1_92, %c0_93] : memref<1x5x5x256xbf16, #tpu.memory_space<vmem>>, vector<1x4x4x256xbf16>
    %58 = vector.shape_cast %57 : vector<1x4x4x256xbf16> to vector<16x256xbf16>
    %c1_94 = arith.constant 1 : index
    %c0_95 = arith.constant 0 : index
    %c0_96 = arith.constant 0 : index
    %59 = vector.load %arg4[%c1_94, %c0_95, %c0_96] : memref<4x256x128xbf16, #tpu.memory_space<vmem>>, vector<1x256x128xbf16>
    %60 = vector.shape_cast %59 : vector<1x256x128xbf16> to vector<256x128xbf16>
    %cst_97 = arith.constant dense<0.000000e+00> : vector<16x128xf32>
    %61 = tpu.matmul %58, %60, %cst_97 {dimension_numbers = #tpu.dot_dimension_numbers<[1], [0], [0], [1], [0, 0, 1, 1], [], []>} : vector<16x256xbf16>, vector<256x128xbf16>, vector<16x128xf32> -> vector<16x128xf32>
    %62 = arith.addf %56, %61 : vector<16x128xf32>
    %c0_98 = arith.constant 0 : index
    %c1_99 = arith.constant 1 : index
    %c0_100 = arith.constant 0 : index
    %c0_101 = arith.constant 0 : index
    %63 = vector.load %arg11[%c0_98, %c1_99, %c0_100, %c0_101] : memref<1x5x5x256xbf16, #tpu.memory_space<vmem>>, vector<1x4x4x256xbf16>
    %64 = vector.shape_cast %63 : vector<1x4x4x256xbf16> to vector<16x256xbf16>
    %c2_102 = arith.constant 2 : index
    %c0_103 = arith.constant 0 : index
    %c0_104 = arith.constant 0 : index
    %65 = vector.load %arg4[%c2_102, %c0_103, %c0_104] : memref<4x256x128xbf16, #tpu.memory_space<vmem>>, vector<1x256x128xbf16>
    %66 = vector.shape_cast %65 : vector<1x256x128xbf16> to vector<256x128xbf16>
    %cst_105 = arith.constant dense<0.000000e+00> : vector<16x128xf32>
    %67 = tpu.matmul %64, %66, %cst_105 {dimension_numbers = #tpu.dot_dimension_numbers<[1], [0], [0], [1], [0, 0, 1, 1], [], []>} : vector<16x256xbf16>, vector<256x128xbf16>, vector<16x128xf32> -> vector<16x128xf32>
    %68 = arith.addf %62, %67 : vector<16x128xf32>
    %c0_106 = arith.constant 0 : index
    %c1_107 = arith.constant 1 : index
    %c1_108 = arith.constant 1 : index
    %c0_109 = arith.constant 0 : index
    %69 = vector.load %arg11[%c0_106, %c1_107, %c1_108, %c0_109] : memref<1x5x5x256xbf16, #tpu.memory_space<vmem>>, vector<1x4x4x256xbf16>
    %70 = vector.shape_cast %69 : vector<1x4x4x256xbf16> to vector<16x256xbf16>
    %c3 = arith.constant 3 : index
    %c0_110 = arith.constant 0 : index
    %c0_111 = arith.constant 0 : index
    %71 = vector.load %arg4[%c3, %c0_110, %c0_111] : memref<4x256x128xbf16, #tpu.memory_space<vmem>>, vector<1x256x128xbf16>
    %72 = vector.shape_cast %71 : vector<1x256x128xbf16> to vector<256x128xbf16>
    %cst_112 = arith.constant dense<0.000000e+00> : vector<16x128xf32>
    %73 = tpu.matmul %70, %72, %cst_112 {dimension_numbers = #tpu.dot_dimension_numbers<[1], [0], [0], [1], [0, 0, 1, 1], [], []>} : vector<16x256xbf16>, vector<256x128xbf16>, vector<16x128xf32> -> vector<16x128xf32>
    %74 = arith.addf %68, %73 : vector<16x128xf32>
    %75 = vector.broadcast %49 : vector<1x128xf32> to vector<16x128xf32>
    %76 = arith.addf %74, %75 : vector<16x128xf32>
    %cst_113 = arith.constant 0.000000e+00 : f32
    %77 = vector.broadcast %cst_113 : f32 to vector<16x128xf32>
    %78 = arith.maximumf %76, %77 : vector<16x128xf32>
    %79 = arith.truncf %78 : vector<16x128xf32> to vector<16x128xbf16>
    %80 = vector.shape_cast %79 : vector<16x128xbf16> to vector<1x2x2x2x2x128xbf16>
    %81 = vector.extract_strided_slice %80 {offsets = [0, 0, 0, 0, 0, 0], sizes = [1, 2, 1, 2, 1, 128], strides = [1, 1, 1, 1, 1, 1]} : vector<1x2x2x2x2x128xbf16> to vector<1x2x1x2x1x128xbf16>
    %82 = vector.shape_cast %81 : vector<1x2x1x2x1x128xbf16> to vector<1x2x2x128xbf16>
    %c0_114 = arith.constant 0 : index
    %c0_115 = arith.constant 0 : index
    %c0_116 = arith.constant 0 : index
    %c384 = arith.constant 384 : index
    %83 = vector.load %arg12[%c0_114, %c0_115, %c0_116, %c384] : memref<1x3x3x512xbf16, #tpu.memory_space<vmem>>, vector<1x2x2x128xbf16>
    tpu.vector_store %arg12[%c0_114, %c0_115, %c0_116, %c384], %82 {strides = array<i32>} : memref<1x3x3x512xbf16, #tpu.memory_space<vmem>>, vector<1x2x2x128xbf16>,
    %84 = vector.extract_strided_slice %80 {offsets = [0, 0, 0, 0, 1, 0], sizes = [1, 2, 1, 2, 1, 128], strides = [1, 1, 1, 1, 1, 1]} : vector<1x2x2x2x2x128xbf16> to vector<1x2x1x2x1x128xbf16>
    %85 = vector.shape_cast %84 : vector<1x2x1x2x1x128xbf16> to vector<1x2x2x128xbf16>
    %c0_117 = arith.constant 0 : index
    %c0_118 = arith.constant 0 : index
    %c1_119 = arith.constant 1 : index
    %c256 = arith.constant 256 : index
    %86 = vector.load %arg12[%c0_117, %c0_118, %c1_119, %c256] : memref<1x3x3x512xbf16, #tpu.memory_space<vmem>>, vector<1x2x2x128xbf16>
    tpu.vector_store %arg12[%c0_117, %c0_118, %c1_119, %c256], %85 {strides = array<i32>} : memref<1x3x3x512xbf16, #tpu.memory_space<vmem>>, vector<1x2x2x128xbf16>,
    %87 = vector.extract_strided_slice %80 {offsets = [0, 0, 1, 0, 0, 0], sizes = [1, 2, 1, 2, 1, 128], strides = [1, 1, 1, 1, 1, 1]} : vector<1x2x2x2x2x128xbf16> to vector<1x2x1x2x1x128xbf16>
    %88 = vector.shape_cast %87 : vector<1x2x1x2x1x128xbf16> to vector<1x2x2x128xbf16>
    %c0_120 = arith.constant 0 : index
    %c1_121 = arith.constant 1 : index
    %c0_122 = arith.constant 0 : index
    %c128_123 = arith.constant 128 : index
    %89 = vector.load %arg12[%c0_120, %c1_121, %c0_122, %c128_123] : memref<1x3x3x512xbf16, #tpu.memory_space<vmem>>, vector<1x2x2x128xbf16>
    tpu.vector_store %arg12[%c0_120, %c1_121, %c0_122, %c128_123], %88 {strides = array<i32>} : memref<1x3x3x512xbf16, #tpu.memory_space<vmem>>, vector<1x2x2x128xbf16>,
    %90 = vector.extract_strided_slice %80 {offsets = [0, 0, 1, 0, 1, 0], sizes = [1, 2, 1, 2, 1, 128], strides = [1, 1, 1, 1, 1, 1]} : vector<1x2x2x2x2x128xbf16> to vector<1x2x1x2x1x128xbf16>
    %91 = vector.shape_cast %90 : vector<1x2x1x2x1x128xbf16> to vector<1x2x2x128xbf16>
    %c0_124 = arith.constant 0 : index
    %c1_125 = arith.constant 1 : index
    %c1_126 = arith.constant 1 : index
    %c0_127 = arith.constant 0 : index
    %92 = vector.load %arg12[%c0_124, %c1_125, %c1_126, %c0_127] : memref<1x3x3x512xbf16, #tpu.memory_space<vmem>>, vector<1x2x2x128xbf16>
    tpu.vector_store %arg12[%c0_124, %c1_125, %c1_126, %c0_127], %91 {strides = array<i32>} : memref<1x3x3x512xbf16, #tpu.memory_space<vmem>>, vector<1x2x2x128xbf16>,
    %c0_128 = arith.constant 0 : index
    %c0_129 = arith.constant 0 : index
    %93 = vector.load %arg7[%c0_128, %c0_129] : memref<1x256xf32, #tpu.memory_space<vmem>>, vector<1x256xf32>
    %cst_130 = arith.constant 0.000000e+00 : f32
    %94 = vector.broadcast %cst_130 : f32 to vector<4x256xf32>
    %c0_131 = arith.constant 0 : index
    %c0_132 = arith.constant 0 : index
    %c0_133 = arith.constant 0 : index
    %c0_134 = arith.constant 0 : index
    %95 = vector.load %arg12[%c0_131, %c0_132, %c0_133, %c0_134] : memref<1x3x3x512xbf16, #tpu.memory_space<vmem>>, vector<1x2x2x512xbf16>
    %96 = vector.shape_cast %95 : vector<1x2x2x512xbf16> to vector<4x512xbf16>
    %c0_135 = arith.constant 0 : index
    %c0_136 = arith.constant 0 : index
    %c0_137 = arith.constant 0 : index
    %97 = vector.load %arg6[%c0_135, %c0_136, %c0_137] : memref<4x512x256xbf16, #tpu.memory_space<vmem>>, vector<1x512x256xbf16>
    %98 = vector.shape_cast %97 : vector<1x512x256xbf16> to vector<512x256xbf16>
    %cst_138 = arith.constant dense<0.000000e+00> : vector<4x256xf32>
    %99 = tpu.matmul %96, %98, %cst_138 {dimension_numbers = #tpu.dot_dimension_numbers<[1], [0], [0], [1], [0, 0, 1, 1], [], []>} : vector<4x512xbf16>, vector<512x256xbf16>, vector<4x256xf32> -> vector<4x256xf32>
    %100 = arith.addf %94, %99 : vector<4x256xf32>
    %c0_139 = arith.constant 0 : index
    %c0_140 = arith.constant 0 : index
    %c1_141 = arith.constant 1 : index
    %c0_142 = arith.constant 0 : index
    %101 = vector.load %arg12[%c0_139, %c0_140, %c1_141, %c0_142] : memref<1x3x3x512xbf16, #tpu.memory_space<vmem>>, vector<1x2x2x512xbf16>
    %102 = vector.shape_cast %101 : vector<1x2x2x512xbf16> to vector<4x512xbf16>
    %c1_143 = arith.constant 1 : index
    %c0_144 = arith.constant 0 : index
    %c0_145 = arith.constant 0 : index
    %103 = vector.load %arg6[%c1_143, %c0_144, %c0_145] : memref<4x512x256xbf16, #tpu.memory_space<vmem>>, vector<1x512x256xbf16>
    %104 = vector.shape_cast %103 : vector<1x512x256xbf16> to vector<512x256xbf16>
    %cst_146 = arith.constant dense<0.000000e+00> : vector<4x256xf32>
    %105 = tpu.matmul %102, %104, %cst_146 {dimension_numbers = #tpu.dot_dimension_numbers<[1], [0], [0], [1], [0, 0, 1, 1], [], []>} : vector<4x512xbf16>, vector<512x256xbf16>, vector<4x256xf32> -> vector<4x256xf32>
    %106 = arith.addf %100, %105 : vector<4x256xf32>
    %c0_147 = arith.constant 0 : index
    %c1_148 = arith.constant 1 : index
    %c0_149 = arith.constant 0 : index
    %c0_150 = arith.constant 0 : index
    %107 = vector.load %arg12[%c0_147, %c1_148, %c0_149, %c0_150] : memref<1x3x3x512xbf16, #tpu.memory_space<vmem>>, vector<1x2x2x512xbf16>
    %108 = vector.shape_cast %107 : vector<1x2x2x512xbf16> to vector<4x512xbf16>
    %c2_151 = arith.constant 2 : index
    %c0_152 = arith.constant 0 : index
    %c0_153 = arith.constant 0 : index
    %109 = vector.load %arg6[%c2_151, %c0_152, %c0_153] : memref<4x512x256xbf16, #tpu.memory_space<vmem>>, vector<1x512x256xbf16>
    %110 = vector.shape_cast %109 : vector<1x512x256xbf16> to vector<512x256xbf16>
    %cst_154 = arith.constant dense<0.000000e+00> : vector<4x256xf32>
    %111 = tpu.matmul %108, %110, %cst_154 {dimension_numbers = #tpu.dot_dimension_numbers<[1], [0], [0], [1], [0, 0, 1, 1], [], []>} : vector<4x512xbf16>, vector<512x256xbf16>, vector<4x256xf32> -> vector<4x256xf32>
    %112 = arith.addf %106, %111 : vector<4x256xf32>
    %c0_155 = arith.constant 0 : index
    %c1_156 = arith.constant 1 : index
    %c1_157 = arith.constant 1 : index
    %c0_158 = arith.constant 0 : index
    %113 = vector.load %arg12[%c0_155, %c1_156, %c1_157, %c0_158] : memref<1x3x3x512xbf16, #tpu.memory_space<vmem>>, vector<1x2x2x512xbf16>
    %114 = vector.shape_cast %113 : vector<1x2x2x512xbf16> to vector<4x512xbf16>
    %c3_159 = arith.constant 3 : index
    %c0_160 = arith.constant 0 : index
    %c0_161 = arith.constant 0 : index
    %115 = vector.load %arg6[%c3_159, %c0_160, %c0_161] : memref<4x512x256xbf16, #tpu.memory_space<vmem>>, vector<1x512x256xbf16>
    %116 = vector.shape_cast %115 : vector<1x512x256xbf16> to vector<512x256xbf16>
    %cst_162 = arith.constant dense<0.000000e+00> : vector<4x256xf32>
    %117 = tpu.matmul %114, %116, %cst_162 {dimension_numbers = #tpu.dot_dimension_numbers<[1], [0], [0], [1], [0, 0, 1, 1], [], []>} : vector<4x512xbf16>, vector<512x256xbf16>, vector<4x256xf32> -> vector<4x256xf32>
    %118 = arith.addf %112, %117 : vector<4x256xf32>
    %119 = vector.broadcast %93 : vector<1x256xf32> to vector<4x256xf32>
    %120 = arith.addf %118, %119 : vector<4x256xf32>
    %cst_163 = arith.constant 0.000000e+00 : f32
    %121 = vector.broadcast %cst_163 : f32 to vector<4x256xf32>
    %122 = arith.maximumf %120, %121 : vector<4x256xf32>
    %123 = arith.truncf %122 : vector<4x256xf32> to vector<4x256xbf16>
    %124 = vector.shape_cast %123 : vector<4x256xbf16> to vector<1x1x2x1x2x256xbf16>
    %125 = vector.extract_strided_slice %124 {offsets = [0, 0, 0, 0, 0, 0], sizes = [1, 1, 1, 1, 1, 256], strides = [1, 1, 1, 1, 1, 1]} : vector<1x1x2x1x2x256xbf16> to vector<1x1x1x1x1x256xbf16>
    %126 = vector.shape_cast %125 : vector<1x1x1x1x1x256xbf16> to vector<1x1x1x256xbf16>
    %c0_164 = arith.constant 0 : index
    %c0_165 = arith.constant 0 : index
    %c0_166 = arith.constant 0 : index
    %c768 = arith.constant 768 : index
    %127 = vector.load %arg13[%c0_164, %c0_165, %c0_166, %c768] : memref<1x2x2x1024xbf16, #tpu.memory_space<vmem>>, vector<1x1x1x256xbf16>
    tpu.vector_store %arg13[%c0_164, %c0_165, %c0_166, %c768], %126 {strides = array<i32>} : memref<1x2x2x1024xbf16, #tpu.memory_space<vmem>>, vector<1x1x1x256xbf16>,
    %128 = vector.extract_strided_slice %124 {offsets = [0, 0, 0, 0, 1, 0], sizes = [1, 1, 1, 1, 1, 256], strides = [1, 1, 1, 1, 1, 1]} : vector<1x1x2x1x2x256xbf16> to vector<1x1x1x1x1x256xbf16>
    %129 = vector.shape_cast %128 : vector<1x1x1x1x1x256xbf16> to vector<1x1x1x256xbf16>
    %c0_167 = arith.constant 0 : index
    %c0_168 = arith.constant 0 : index
    %c1_169 = arith.constant 1 : index
    %c512 = arith.constant 512 : index
    %130 = vector.load %arg13[%c0_167, %c0_168, %c1_169, %c512] : memref<1x2x2x1024xbf16, #tpu.memory_space<vmem>>, vector<1x1x1x256xbf16>
    tpu.vector_store %arg13[%c0_167, %c0_168, %c1_169, %c512], %129 {strides = array<i32>} : memref<1x2x2x1024xbf16, #tpu.memory_space<vmem>>, vector<1x1x1x256xbf16>,
    %131 = vector.extract_strided_slice %124 {offsets = [0, 0, 1, 0, 0, 0], sizes = [1, 1, 1, 1, 1, 256], strides = [1, 1, 1, 1, 1, 1]} : vector<1x1x2x1x2x256xbf16> to vector<1x1x1x1x1x256xbf16>
    %132 = vector.shape_cast %131 : vector<1x1x1x1x1x256xbf16> to vector<1x1x1x256xbf16>
    %c0_170 = arith.constant 0 : index
    %c1_171 = arith.constant 1 : index
    %c0_172 = arith.constant 0 : index
    %c256_173 = arith.constant 256 : index
    %133 = vector.load %arg13[%c0_170, %c1_171, %c0_172, %c256_173] : memref<1x2x2x1024xbf16, #tpu.memory_space<vmem>>, vector<1x1x1x256xbf16>
    tpu.vector_store %arg13[%c0_170, %c1_171, %c0_172, %c256_173], %132 {strides = array<i32>} : memref<1x2x2x1024xbf16, #tpu.memory_space<vmem>>, vector<1x1x1x256xbf16>,
    %134 = vector.extract_strided_slice %124 {offsets = [0, 0, 1, 0, 1, 0], sizes = [1, 1, 1, 1, 1, 256], strides = [1, 1, 1, 1, 1, 1]} : vector<1x1x2x1x2x256xbf16> to vector<1x1x1x1x1x256xbf16>
    %135 = vector.shape_cast %134 : vector<1x1x1x1x1x256xbf16> to vector<1x1x1x256xbf16>
    %c0_174 = arith.constant 0 : index
    %c1_175 = arith.constant 1 : index
    %c1_176 = arith.constant 1 : index
    %c0_177 = arith.constant 0 : index
    %136 = vector.load %arg13[%c0_174, %c1_175, %c1_176, %c0_177] : memref<1x2x2x1024xbf16, #tpu.memory_space<vmem>>, vector<1x1x1x256xbf16>
    tpu.vector_store %arg13[%c0_174, %c1_175, %c1_176, %c0_177], %135 {strides = array<i32>} : memref<1x2x2x1024xbf16, #tpu.memory_space<vmem>>, vector<1x1x1x256xbf16>,
    %c0_178 = arith.constant 0 : index
    %c0_179 = arith.constant 0 : index
    %137 = vector.load %arg9[%c0_178, %c0_179] : memref<1x128xf32, #tpu.memory_space<vmem>>, vector<1x128xf32>
    %cst_180 = arith.constant 0.000000e+00 : f32
    %138 = vector.broadcast %cst_180 : f32 to vector<1x128xf32>
    %c0_181 = arith.constant 0 : index
    %c0_182 = arith.constant 0 : index
    %c0_183 = arith.constant 0 : index
    %c0_184 = arith.constant 0 : index
    %139 = vector.load %arg13[%c0_181, %c0_182, %c0_183, %c0_184] : memref<1x2x2x1024xbf16, #tpu.memory_space<vmem>>, vector<1x1x1x1024xbf16>
    %140 = vector.shape_cast %139 : vector<1x1x1x1024xbf16> to vector<1x1024xbf16>
    %c0_185 = arith.constant 0 : index
    %c0_186 = arith.constant 0 : index
    %c0_187 = arith.constant 0 : index
    %141 = vector.load %arg8[%c0_185, %c0_186, %c0_187] : memref<4x1024x128xbf16, #tpu.memory_space<vmem>>, vector<1x1024x128xbf16>
    %142 = vector.shape_cast %141 : vector<1x1024x128xbf16> to vector<1024x128xbf16>
    %cst_188 = arith.constant dense<0.000000e+00> : vector<1x128xf32>
    %143 = tpu.matmul %140, %142, %cst_188 {dimension_numbers = #tpu.dot_dimension_numbers<[1], [0], [0], [1], [0, 0, 1, 1], [], []>} : vector<1x1024xbf16>, vector<1024x128xbf16>, vector<1x128xf32> -> vector<1x128xf32>
    %144 = arith.addf %138, %143 : vector<1x128xf32>
    %c0_189 = arith.constant 0 : index
    %c0_190 = arith.constant 0 : index
    %c1_191 = arith.constant 1 : index
    %c0_192 = arith.constant 0 : index
    %145 = vector.load %arg13[%c0_189, %c0_190, %c1_191, %c0_192] : memref<1x2x2x1024xbf16, #tpu.memory_space<vmem>>, vector<1x1x1x1024xbf16>
    %146 = vector.shape_cast %145 : vector<1x1x1x1024xbf16> to vector<1x1024xbf16>
    %c1_193 = arith.constant 1 : index
    %c0_194 = arith.constant 0 : index
    %c0_195 = arith.constant 0 : index
    %147 = vector.load %arg8[%c1_193, %c0_194, %c0_195] : memref<4x1024x128xbf16, #tpu.memory_space<vmem>>, vector<1x1024x128xbf16>
    %148 = vector.shape_cast %147 : vector<1x1024x128xbf16> to vector<1024x128xbf16>
    %cst_196 = arith.constant dense<0.000000e+00> : vector<1x128xf32>
    %149 = tpu.matmul %146, %148, %cst_196 {dimension_numbers = #tpu.dot_dimension_numbers<[1], [0], [0], [1], [0, 0, 1, 1], [], []>} : vector<1x1024xbf16>, vector<1024x128xbf16>, vector<1x128xf32> -> vector<1x128xf32>
    %150 = arith.addf %144, %149 : vector<1x128xf32>
    %c0_197 = arith.constant 0 : index
    %c1_198 = arith.constant 1 : index
    %c0_199 = arith.constant 0 : index
    %c0_200 = arith.constant 0 : index
    %151 = vector.load %arg13[%c0_197, %c1_198, %c0_199, %c0_200] : memref<1x2x2x1024xbf16, #tpu.memory_space<vmem>>, vector<1x1x1x1024xbf16>
    %152 = vector.shape_cast %151 : vector<1x1x1x1024xbf16> to vector<1x1024xbf16>
    %c2_201 = arith.constant 2 : index
    %c0_202 = arith.constant 0 : index
    %c0_203 = arith.constant 0 : index
    %153 = vector.load %arg8[%c2_201, %c0_202, %c0_203] : memref<4x1024x128xbf16, #tpu.memory_space<vmem>>, vector<1x1024x128xbf16>
    %154 = vector.shape_cast %153 : vector<1x1024x128xbf16> to vector<1024x128xbf16>
    %cst_204 = arith.constant dense<0.000000e+00> : vector<1x128xf32>
    %155 = tpu.matmul %152, %154, %cst_204 {dimension_numbers = #tpu.dot_dimension_numbers<[1], [0], [0], [1], [0, 0, 1, 1], [], []>} : vector<1x1024xbf16>, vector<1024x128xbf16>, vector<1x128xf32> -> vector<1x128xf32>
    %156 = arith.addf %150, %155 : vector<1x128xf32>
    %c0_205 = arith.constant 0 : index
    %c1_206 = arith.constant 1 : index
    %c1_207 = arith.constant 1 : index
    %c0_208 = arith.constant 0 : index
    %157 = vector.load %arg13[%c0_205, %c1_206, %c1_207, %c0_208] : memref<1x2x2x1024xbf16, #tpu.memory_space<vmem>>, vector<1x1x1x1024xbf16>
    %158 = vector.shape_cast %157 : vector<1x1x1x1024xbf16> to vector<1x1024xbf16>
    %c3_209 = arith.constant 3 : index
    %c0_210 = arith.constant 0 : index
    %c0_211 = arith.constant 0 : index
    %159 = vector.load %arg8[%c3_209, %c0_210, %c0_211] : memref<4x1024x128xbf16, #tpu.memory_space<vmem>>, vector<1x1024x128xbf16>
    %160 = vector.shape_cast %159 : vector<1x1024x128xbf16> to vector<1024x128xbf16>
    %cst_212 = arith.constant dense<0.000000e+00> : vector<1x128xf32>
    %161 = tpu.matmul %158, %160, %cst_212 {dimension_numbers = #tpu.dot_dimension_numbers<[1], [0], [0], [1], [0, 0, 1, 1], [], []>} : vector<1x1024xbf16>, vector<1024x128xbf16>, vector<1x128xf32> -> vector<1x128xf32>
    %162 = arith.addf %156, %161 : vector<1x128xf32>
    %163 = arith.addf %162, %137 : vector<1x128xf32>
    %cst_213 = arith.constant 0.000000e+00 : f32
    %164 = vector.broadcast %cst_213 : f32 to vector<1x128xf32>
    %165 = arith.maximumf %163, %164 : vector<1x128xf32>
    %166 = vector.shape_cast %165 : vector<1x128xf32> to vector<1x1x1x128xf32>
    %c0_214 = arith.constant 0 : index
    %c0_215 = arith.constant 0 : index
    %c0_216 = arith.constant 0 : index
    %c0_217 = arith.constant 0 : index
    %167 = vector.load %arg10[%c0_214, %c0_215, %c0_216, %c0_217] : memref<1x1x1x128xf32, #tpu.memory_space<vmem>>, vector<1x1x1x128xf32>
    tpu.vector_store %arg10[%c0_214, %c0_215, %c0_216, %c0_217], %166 {strides = array<i32>} : memref<1x1x1x128xf32, #tpu.memory_space<vmem>>, vector<1x1x1x128xf32>,
    return
  }
  func.func @transform_0(%arg0: i32) -> (i32, i32, i32, i32) {
    %c0_i32 = arith.constant 0 : i32
    %c0_i32_0 = arith.constant 0 : i32
    %c0_i32_1 = arith.constant 0 : i32
    %c0_i32_2 = arith.constant 0 : i32
    return %arg0, %c0_i32, %c0_i32_0, %c0_i32_1 : i32, i32, i32, i32
  }
  func.func @transform_1(%arg0: i32) -> (i32, i32) {
    %c0_i32 = arith.constant 0 : i32
    %c0_i32_0 = arith.constant 0 : i32
    %c0_i32_1 = arith.constant 0 : i32
    return %c0_i32, %c0_i32_0 : i32, i32
  }
  func.func @transform_2(%arg0: i32) -> (i32, i32) {
    %c0_i32 = arith.constant 0 : i32
    %c0_i32_0 = arith.constant 0 : i32
    %c0_i32_1 = arith.constant 0 : i32
    return %c0_i32, %c0_i32_0 : i32, i32
  }
  func.func @transform_3(%arg0: i32) -> (i32, i32, i32) {
    %c0_i32 = arith.constant 0 : i32
    %c0_i32_0 = arith.constant 0 : i32
    %c0_i32_1 = arith.constant 0 : i32
    %c0_i32_2 = arith.constant 0 : i32
    return %c0_i32, %c0_i32_0, %c0_i32_1 : i32, i32, i32
  }
  func.func @transform_4(%arg0: i32) -> (i32, i32) {
    %c0_i32 = arith.constant 0 : i32
    %c0_i32_0 = arith.constant 0 : i32
    %c0_i32_1 = arith.constant 0 : i32
    return %c0_i32, %c0_i32_0 : i32, i32
  }
  func.func @transform_5(%arg0: i32) -> (i32, i32, i32) {
    %c0_i32 = arith.constant 0 : i32
    %c0_i32_0 = arith.constant 0 : i32
    %c0_i32_1 = arith.constant 0 : i32
    %c0_i32_2 = arith.constant 0 : i32
    return %c0_i32, %c0_i32_0, %c0_i32_1 : i32, i32, i32
  }
  func.func @transform_6(%arg0: i32) -> (i32, i32) {
    %c0_i32 = arith.constant 0 : i32
    %c0_i32_0 = arith.constant 0 : i32
    %c0_i32_1 = arith.constant 0 : i32
    return %c0_i32, %c0_i32_0 : i32, i32
  }
  func.func @transform_7(%arg0: i32) -> (i32, i32, i32) {
    %c0_i32 = arith.constant 0 : i32
    %c0_i32_0 = arith.constant 0 : i32
    %c0_i32_1 = arith.constant 0 : i32
    %c0_i32_2 = arith.constant 0 : i32
    return %c0_i32, %c0_i32_0, %c0_i32_1 : i32, i32, i32
  }
  func.func @transform_8(%arg0: i32) -> (i32, i32) {
    %c0_i32 = arith.constant 0 : i32
    %c0_i32_0 = arith.constant 0 : i32
    %c0_i32_1 = arith.constant 0 : i32
    return %c0_i32, %c0_i32_0 : i32, i32
  }
  func.func @transform_9(%arg0: i32) -> (i32, i32, i32, i32) {
    %c0_i32 = arith.constant 0 : i32
    %c0_i32_0 = arith.constant 0 : i32
    %c0_i32_1 = arith.constant 0 : i32
    %c0_i32_2 = arith.constant 0 : i32
    return %arg0, %c0_i32, %c0_i32_0, %c0_i32_1 : i32, i32, i32, i32
  }
}

</mosaic_0001>

<bundles_post_ra>
// kernel: encoder_forward.1
= control target key start
LH: loop header
LB: loop body
LE: loop exit
PB: predicated region body
PF: predicated region fallthrough
CT: control target
= control target key end

     0   :  { %14 = vsyncpa [#allocation6], 0  ;;  %s13127_s0 = inlined_call_operand.vmem [shape: bf16[2,8,8,128], index: 0, kind: input, shape index: {}]   ;;  %s13128_s1 = inlined_call_operand.vmem [shape: bf16[128,64], index: 1, kind: input, shape index: {}]   ;;  %s13129_s2 = inlined_call_operand.vmem [shape: f32[1,64], index: 2, kind: input, shape index: {}]   ;;  %s13130_s3 = inlined_call_operand.hbm [shape: bf16[4,256,128], index: 3, kind: input, shape index: {}]   ;;  %s13131_s4 = inlined_call_operand.vmem [shape: f32[1,128], index: 4, kind: input, shape index: {}]   ;;  %s13132_s5 = inlined_call_operand.vmem [shape: bf16[4,512,256], index: 5, kind: input, shape index: {}]   ;;  %s13133_s6 = inlined_call_operand.vmem [shape: f32[1,256], index: 6, kind: input, shape index: {}]   ;;  %s13134_s7 = inlined_call_operand.vmem [shape: bf16[4,1024,128], index: 7, kind: input, shape index: {}]   ;;  %s13135_s8 = inlined_call_operand.vmem [shape: f32[1,128], index: 8, kind: input, shape index: {}]   ;;  %s13136_s9 = inlined_call_operand.hbm [shape: f32[2,1,1,128], index: 9, kind: output, shape index: {}]  }
   0x1   :  { %15 = vsyncpa [#allocation7], 0 }
   0x2   :  { %17 = vsyncpa [#allocation7 + $0x1], 0  ;;  %s10638_s30 = smov 0   ;;  %s10640_s10 = smov 0  }
   0x3   :  { %s10642_s11 = smov 0   ;;  %s10644_s12 = smov 0  }
   0x4 LB: > { %s10659_s13 = sadd.s32 4294967295, %s10577_s12   ;;  %s8020_s14 = sadd.s32 4294967294, %s10577_s12   ;;  %s10577_s12 = sphi %s10644_s12, %s13203_s12   ;;  %s10573_s11 = sphi %s10642_s11, %s13202_s11   ;;  %s10569_s10 = sphi %s10640_s10, %s13201_s10   ;;  %s10565_s30 = sphi %s10638_s30, %s13200_s30  }
   0x5   : > { %s10663_s15 = sadd.s32 1, %s10577_s12   ;;  %s224_s16 = sadd.s32 1, %s10573_s11 }
   0x6   : > { %s221_s17 = ssub.s32 %s10577_s12, %s10663_s15  ;;  %p234_p0 = scmp.ne.s32.totalorder %s10573_s11, %s10569_s10 }
   0x7   : > { %p222_p1 = scmp.eq.s32.totalorder %s221_s17, 0  ;;  %p235_p2 = scmp.eq.s32.totalorder %s10659_s13, 1 }
   0x8   : > { %p240_p3 = scmp.ne.s32.totalorder %s10569_s10, %s10565_s30  ;;  %p241_p4 = scmp.eq.s32.totalorder %s8020_s14, 1 }
   0x9   : > { %s10674_s18 = scalar_select %p222_p1, %s10573_s11, %s224_s16  }
   0xa   : > { %p10676_p5 = por %p235_p2, %p234_p0  ;;  %p10680_p6 = por %p241_p4, %p240_p3 }
   0xb   : > { %p8021_p7 = scmp.ge.s32.totalorder %s10577_s12, 1  ;;  %p248_p8 = scmp.lt.s32.totalorder %s10577_s12, 3 }
   0xc   : > { %s13145_s20 = scalar_select %p10680_p6, 1, 0 }
   0xd   : > { %p9726_p9 = scmp.eq.s32.totalorder %s10659_s13, 0  ;;  %p10687_p10 = pnand %p8021_p7, %p248_p8 }
   0xe   : > { %s10579_s22 = smov [#allocation5]  }
   0xf   : > { %s266_s23 = sshll.u32 %s10579_s22, 4  ;;  %p9718_p11 = pneg %p10687_p10  ;;  %s267_s23 = int_to_ptr.vmem [resolvable:$true] %s266_s23 }
  0x10   : > { %s10498_s24 = scalar_lea.vmem %s267_s23, 8192  ;;  %p10506_p3 = scmp.lt.s32.totalorder %s267_s23, %s267_s23 }
  0x11   : > { %p9719_p12 = pnand %p9726_p9, %p9718_p11  ;;  %p10499_p0 = scmp.ne.s32.totalorder %s267_s23, %s10498_s24 }
  0x12   : > { %p10507_p4 = scmp.lt.s32.totalorder %s10498_s24, %s10498_s24 }
  0x13   : > { %p10489_p13 = pneg %p9719_p12 }
  0x14   : > { %p10508_p6 = por %p10507_p4, %p10506_p3 }
  0x15   : > { %p10501_p1 = pnand %p10499_p0, %p10489_p13 }
  0x17   : > { %p10502_p2 = pneg %p10501_p1 }
  0x19   : > { %p10509_p7 = pnand %p10508_p6, %p10502_p2 }
  0x1b   : > { %10512 = shalt.err (!%p10509_p7)
}
  0x1c   : > { %s10580_s25 = smov 64   ;;  %s10581_s26 = smov 4  }
  0x1d   : > { %9721 = dma.hbm_to_vmem [thread:$0]  (!%p9719_p12), %s13130_s3, 8192, %s267_s23, [#allocation6], %s10580_s25, %s10580_s25, %s10581_s26  }
  0x1e   : > { %305 = sbr.rel (%p10687_p10) target bundleno = 1635 (0x663), region = 56 }
  0x23   : > { %10556 = dma.done.wait (%p9726_p9), [#allocation6], 8192  }
  0x24   : > { %10558 = vsyncadd (%p9726_p9), [#allocation6], 4294959104  ;;  %p340_p8 = scmp.lt.s32.totalorder %s10659_s13, 1  ;;  %v9769_v0 = vld [vmem:[%s13128_s1 + $0x38] sm:$0xff]   ;;  %v9770_v1 = vld [vmem:[%s13128_s1 + $0x30] sm:$0xff]   ;;  %v689_v15 = vlaneseq  ;;  %vm13139_vm0 = vcmask 1042434  }
  0x25   : > { %9688 = vmatprep.subr.bf16.mxu0 %v9769_v0  ;;  %v9771_v2 = vld [vmem:[%s13128_s1 + $0x28] sm:$0xff]   ;;  %v9772_v3 = vld [vmem:[%s13128_s1 + $0x20] sm:$0xff]   ;;  %v9773_v5 = vld [vmem:[%s13128_s1 + $0x18] sm:$0xff]   ;;  %v10582_v13 = vmov 1966171168   ;;  %vm13141_vm1 = vcmask 1041409  }
  0x26   : > { %s341_s29 = scalar_select %p340_p8, %s10659_s13, 1  ;;  %9689 = vmatpush3.bf16.msra.mxu0 %v9769_v0  ;;  %v9774_v6 = vld [vmem:[%s13128_s1 + $0x10] sm:$0xff]   ;;  %v9775_v7 = vld [vmem:[%s13128_s1 + $0x8] sm:$0xff]   ;;  %v9776_v8 = vld [vmem:[%s13128_s1] sm:$0xff]   ;;  %v687_v14 = vunpack.c.l.s4 %v10582_v13  ;;  %v10739_v20 = vshrl.u32 %v689_v15, 7  ;;  %vm13143_vm2 = vcmask 1043459  }
  0x27   : > { %9690 = vmatprep.subr.bf16.mxu0 %v9770_v1  ;;  %v10736_v12 = vld [vmem:[%s13129_s2] ss:$0 sm:$0xff]  ;;  %v10583_v22 = vmov 1935823168   ;;  %vm363_vm3 = vcmask 1044484   ;;  %vm13137_vm4 = vcmask 1040384  }
  0x28   : > { %s9235_s21 = sshll.u32 %s341_s29, 5  ;;  %v688_v19 = vunpack.c.0.s8 %v687_v14  ;;  %v882_v23 = vunpack.c.l.s4 %v10583_v22  ;;  %vm13138_vm5 = vsmask.f32 256  ;;  %vm364_vm6 = vsmask.f32 4352  ;;  %s338_s25 = sand.u32 1, %s10569_s10  }
  0x29   : > { %s344_s27 = scalar_lea.vmem %s13127_s0, %s9235_s21  ;;  %vm347_vm7 = vsmask.f32 2304  ;;  %vm384_vm8 = vcmask 1046534   ;;  %vm350_vm9 = vsmask.f32 6400  ;;  %vm10968_vm10 = vmand %vm13137_vm4, %vm13138_vm5  ;;  %vm413_vm5 = vcmask 1047558  }
  0x2a   : > { %9691 = vmatpush3.bf16.msra.mxu0 %v9770_v1  ;;  %v9777_v4 = vld [vmem:[%s344_s27] sm:$0xff]   ;;  %v9778_v9 = vld [vmem:[%s344_s27 + $0x8] sm:$0xff]   ;;  %v9779_v10 = vld [vmem:[%s344_s27 + $0x10] sm:$0xff]   ;;  %v10744_v29 = vsub.s32 %v688_v19, %v10739_v20  ;;  %v883_v31 = vunpack.c.0.s8 %v882_v23  ;;  %s339_s14 = scalar_lea.vmem [#allocation8], %s338_s25  ;;  %s7941_s21 = scalar_lea.sflag [#allocation7], %s338_s25 }
  0x2b   : > { %9692 = vmatprep.subr.bf16.mxu0 %v9771_v2  ;;  %9704 = vmatprep.mubr.bf16.mxu0 %v9777_v4  ;;  %v9780_v11 = vld [vmem:[%s344_s27 + $0x18] sm:$0xff]   ;;  %s10584_s27 = smov 64   ;;  %vm10991_vm11 = vmand %vm363_vm3, %vm364_vm6  ;;  %s7953_s29 = sshll.u32 %s339_s14, 4  ;;  %s7954_s29 = int_to_ptr.vmem [resolvable:$true] %s7953_s29 }
  0x2c   : > { %v10751_v43 = vsub.s32 %v883_v31, %v10739_v20  ;;  %vm11006_vm12 = vmand %vm13139_vm0, %vm347_vm7  ;;  %s10513_s23 = scalar_lea.vmem %s7954_s29, 16  ;;  %s10587_s24 = smov [#allocation8]  }
  0x2d   : > { %vm11024_vm13 = vmor %vm10991_vm11, %vm10968_vm10  ;;  %p10514_p6 = scmp.ne.s32.totalorder %s7954_s29, %s10513_s23  ;;  %s10517_s26 = sshll.u32 %s10587_s24, 4  ;;  %s10518_s26 = int_to_ptr.vmem [resolvable:$false] %s10517_s26 }
  0x2e   : > { %9693 = vmatpush3.bf16.msra.mxu0 %v9771_v2  ;;  %vm11032_vm14 = vmand %vm384_vm8, %vm350_vm9  ;;  %p10520_p11 = scmp.lt.s32.totalorder %s7954_s29, %s10518_s26 }
  0x2f   : > { %9694 = vmatprep.subr.bf16.mxu0 %v9772_v3  ;;  %vm424_vm15 = vmor %vm11006_vm12, %vm10968_vm10  ;;  %p10515_p9 = pnand %p10514_p6, %p10676_p5 }
  0x30   : > { %vm11061_vm6 = vmor %vm11032_vm14, %vm11006_vm12  ;;  %vm346_vm12 = vcmask 1042432  }
  0x31   : > { %vm11081_vm8 = vmor %vm10991_vm11, %vm424_vm15  ;;  %vm349_vm15 = vcmask 1046532   ;;  %p10516_p10 = pneg %p10515_p9 }
  0x32   : > { %9695 = vmatpush3.bf16.msra.mxu0 %v9772_v3  ;;  %vm11103_vm11 = vmor %vm11032_vm14, %vm11081_vm8 }
  0x33   : > { %9696 = vmatprep.subr.bf16.mxu0 %v9773_v5  ;;  %vm11124_vm14 = vmand %vm346_vm12, %vm347_vm7  ;;  %vm406_vm12 = vsmask.f32 3328 }
  0x34   : > { %vm11135_vm8 = vmand %vm349_vm15, %vm350_vm9  ;;  %vm13140_vm9 = vcmask 1041408   ;;  %vm409_vm15 = vcmask 1045508  }
  0x35   : > { %vm352_vm7 = vmor %vm11135_vm8, %vm11124_vm14  ;;  %vm410_vm8 = vsmask.f32 5376 }
  0x36   : > { %9697 = vmatpush3.bf16.msra.mxu0 %v9773_v5 }
  0x37   : > { %9698 = vmatprep.subr.bf16.mxu0 %v9774_v6 }
  0x3a   : > { %9699 = vmatpush3.bf16.msra.mxu0 %v9774_v6 }
  0x3b   : > { %9700 = vmatprep.subr.bf16.mxu0 %v9775_v7 }
  0x3e   : > { %9701 = vmatpush3.bf16.msra.mxu0 %v9775_v7 }
  0x3f   : > { %9702 = vmatprep.subr.bf16.mxu0 %v9776_v8 }
  0x42   : > { %9703 = vmatpush3.bf16.msra.mxu0 %v9776_v8 }
  0x45   : > { %9705 = vmatmul.mubr.bf16.vlgmr.msra.gmra.mxu0 %v9778_v9 }
  0x46   : > { %9708 = vmatprep.mubr.bf16.mxu0 %v9779_v10 }
  0x4d   : > { %9709 = vmatmul.mubr.bf16.gmra.mxu0 %v9780_v11 }
 0x105   : > { %v9706_v16 = vpop.f32.mrf.mxu0 }
 0x106   : > { %v647_v18 = vadd.f32 %v9706_v16, %v10736_v12 }
 0x107   : > { %v638_v17 = vpop.f32.mrf.mxu0 }
 0x108   : > { %v639_v24 = vadd.f32 %v10736_v12, %v638_v17  ;;  %v671_v27 = vmax.f32 %v647_v18, 0.0 }
 0x109   : > { %v9707_v21 = vpop.f32.mrf.mxu0 }
 0x10a   : > { %v650_v25 = vadd.f32 %v9707_v21, %v10736_v12  ;;  %v669_v33 = vmax.f32 %v639_v24, 0.0 }
 0x10b   : > { %v641_v26 = vpop.f32.mrf.mxu0 }
 0x10c   : > { %v672_v28 = vmax.f32 %v650_v25, 0.0  ;;  %v642_v30 = vadd.f32 %v10736_v12, %v641_v26 }
 0x10d   : > { %v9710_v32 = vpop.f32.mrf.mxu0 }
 0x10e   : > { %v678_v34 = vpack.c.bf16 %v672_v28, %v671_v27  ;;  %v8042_v35 = vpack.c.bf16 %v672_v28, %v672_v28  ;;  %v670_v36 = vmax.f32 %v642_v30, 0.0  ;;  %v663_v37 = vadd.f32 %v9710_v32, %v10736_v12 }
 0x10f   : > { %v654_v38 = vpop.f32.mrf.mxu0 }
 0x110   : > { %v741_v39 = vrot.slane %v678_v34, %v10744_v29  ;;  %v748_v40 = vrot.slane %v8042_v35, %v10744_v29  ;;  %v677_v41 = vpack.c.bf16 %v670_v36, %v669_v33  ;;  %v8041_v42 = vpack.c.bf16 %v670_v36, %v670_v36 }
 0x111   : > { %v655_v44 = vadd.f32 %v10736_v12, %v654_v38  ;;  %v9711_v45 = vpop.f32.mrf.mxu0  ;;  %v675_v52 = vmax.f32 %v663_v37, 0.0 }
 0x112   : > { %v749_v46 = vcombine.high %v741_v39, %v741_v39  ;;  %v750_v47 = vcombine.high %v748_v40, %v748_v40  ;;  %v757_v48 = vrot.slane %v741_v39, %v10744_v29  ;;  %v764_v49 = vrot.slane %v748_v40, %v10744_v29 }
 0x113   : > { %v692_v50 = vrot.slane %v677_v41, %v10744_v29  ;;  %v699_v51 = vrot.slane %v8041_v42, %v10744_v29  ;;  %v673_v53 = vmax.f32 %v655_v44, 0.0  ;;  %v666_v55 = vadd.f32 %v9711_v45, %v10736_v12  ;;  %v657_v1 = vpop.f32.mrf.mxu0 }
 0x114   : > { %v10759_v54 = vrot.slane %v750_v47, %v10744_v29  ;;  %v10763_v56 = vrot.slane %v749_v46, %v10744_v29  ;;  %v1267_v57 = vrot.slane %v764_v49, %v10751_v43  ;;  %v779_v60 = vcombine.high %v757_v48, %v757_v48 }
 0x115   : > { %v700_v58 = vcombine.high %v692_v50, %v692_v50  ;;  %v701_v59 = vcombine.high %v699_v51, %v699_v51  ;;  %v943_v61 = vrot.slane %v757_v48, %v10751_v43  ;;  %v780_v62 = vcombine.high %v764_v49, %v764_v49 }
 0x116   : > { %v10768_v63 = vrot.slane %v1267_v57, %v10751_v43  ;;  %v1281_v0 = vrot.slane %v10759_v54, %v10751_v43  ;;  %v708_v2 = vrot.slane %v692_v50, %v10744_v29  ;;  %v715_v3 = vrot.slane %v699_v51, %v10744_v29 }
 0x117   : > { %v10775_v4 = vrot.slane %v700_v58, %v10744_v29  ;;  %v10778_v5 = vrot.slane %v701_v59, %v10744_v29  ;;  %v781_v6 = vcombine.high %v10763_v56, %v10763_v56  ;;  %v782_v7 = vcombine.high %v10759_v54, %v10759_v54 }
 0x118   : > { %v957_v8 = vrot.slane %v10763_v56, %v10751_v43  ;;  %v676_v9 = vmax.f32 %v666_v55, 0.0  ;;  %v10787_v10 = vrot.slane %v943_v61, %v10751_v43  ;;  %v10790_v11 = vrot.slane %v779_v60, %v10751_v43 }
 0x119   : > { %v10793_v13 = vrot.slane %v1281_v0, %v10751_v43  ;;  %v658_v14 = vadd.f32 %v10736_v12, %v657_v1  ;;  %v730_v15 = vcombine.high %v708_v2, %v708_v2  ;;  %v887_v16 = vrot.slane %v708_v2, %v10751_v43 }
 0x11a   : > { %v901_v17 = vrot.slane %v10775_v4, %v10751_v43  ;;  %v1211_v18 = vrot.slane %v715_v3, %v10751_v43  ;;  %v10801_v19 = vrot.slane %v780_v62, %v10751_v43  ;;  %v1433_v21 = vunpack.c.l.b16 %v10768_v63 }
 0x11b   : > { %v1225_v22 = vrot.slane %v10778_v5, %v10751_v43  ;;  %v680_v23 = vpack.c.bf16 %v676_v9, %v675_v52  ;;  %v731_v24 = vcombine.high %v715_v3, %v715_v3  ;;  %v732_v12 = vcombine.high %v10775_v4, %v10775_v4 }
 0x11c   : > { %v733_v25 = vcombine.high %v10778_v5, %v10778_v5  ;;  %v8044_v26 = vpack.c.bf16 %v676_v9, %v676_v9  ;;  %v1434_v27 = vunpack.c.l.b16 %v10793_v13  ;;  %v10812_v28 = vrot.slane %v887_v16, %v10751_v43  ;;  %v370_v13 = vld [vmem:[#allocation2 + $0x8] sm:$0x11] }
 0x11d   : > { %v839_v30 = vrot.slane %v680_v23, %v10744_v29  ;;  %v674_v31 = vmax.f32 %v658_v14, 0.0  ;;  %v10816_v32 = vrot.slane %v901_v17, %v10751_v43  ;;  %v10819_v33 = vrot.slane %v730_v15, %v10751_v43 }
 0x11e   : > { %v10822_v34 = vrot.slane %v1211_v18, %v10751_v43  ;;  %v846_v35 = vrot.slane %v8044_v26, %v10744_v29  ;;  %v10826_v36 = vrot.slane %v1225_v22, %v10751_v43  ;;  %v10830_v40 = vrot.slane %v731_v24, %v10751_v43 }
 0x11f   : > { %v847_v37 = vcombine.high %v839_v30, %v839_v30  ;;  %v855_v38 = vrot.slane %v839_v30, %v10744_v29  ;;  %v679_v39 = vpack.c.bf16 %v674_v31, %v673_v53  ;;  %v8043_v44 = vpack.c.bf16 %v674_v31, %v674_v31 }
 0x120   : > { %v848_v41 = vcombine.high %v846_v35, %v846_v35  ;;  %v862_v42 = vrot.slane %v846_v35, %v10744_v29  ;;  %v1105_v45 = vunpack.c.l.b16 %v10812_v28  ;;  %v964_v48 = vrot.slane %v957_v8, %v10751_v43 }
 0x121   : > { %v10835_v46 = vrot.slane %v847_v37, %v10744_v29  ;;  %v790_v47 = vrot.slane %v679_v39, %v10744_v29  ;;  %v877_v50 = vcombine.high %v855_v38, %v855_v38  ;;  %v1055_v51 = vrot.slane %v855_v38, %v10751_v43 }
 0x122   : > { %v10840_v49 = vrot.slane %v848_v41, %v10744_v29  ;;  %v797_v52 = vrot.slane %v8043_v44, %v10744_v29  ;;  %v1106_v53 = vunpack.c.l.b16 %v10816_v32  ;;  %v1429_v55 = vunpack.c.l.b16 %v10822_v34 }
 0x123   : > { %v1430_v57 = vunpack.c.l.b16 %v10826_v36  ;;  %v978_v58 = vrot.slane %v10790_v11, %v10751_v43  ;;  %v878_v59 = vcombine.high %v862_v42, %v862_v42  ;;  %v879_v60 = vcombine.high %v10835_v46, %v10835_v46 }
 0x124   : > { %v1379_v61 = vrot.slane %v862_v42, %v10751_v43  ;;  %v1393_v62 = vrot.slane %v10840_v49, %v10751_v43  ;;  %v798_v0 = vcombine.high %v790_v47, %v790_v47  ;;  %v799_v1 = vcombine.high %v797_v52, %v797_v52 }
 0x125   : > { %v806_v2 = vrot.slane %v790_v47, %v10744_v29  ;;  %v813_v3 = vrot.slane %v797_v52, %v10744_v29  ;;  %v10857_v8 = vrot.slane %v1055_v51, %v10751_v43  ;;  %v1069_v9 = vrot.slane %v10835_v46, %v10751_v43 }
 0x126   : > { %v1083_v11 = vrot.slane %v877_v50, %v10751_v43  ;;  %v985_v14 = vrot.slane %v781_v6, %v10751_v43  ;;  %v880_v15 = vcombine.high %v10840_v49, %v10840_v49  ;;  %v10869_v16 = vrot.slane %v798_v0, %v10744_v29 }
 0x127   : > { %v10872_v17 = vrot.slane %v799_v1, %v10744_v29  ;;  %v828_v18 = vcombine.high %v806_v2, %v806_v2  ;;  %v829_v22 = vcombine.high %v813_v3, %v813_v3  ;;  %v999_v23 = vrot.slane %v806_v2, %v10751_v43 }
 0x128   : > { %v1323_v24 = vrot.slane %v813_v3, %v10751_v43  ;;  %v992_v26 = vrot.slane %v985_v14, %v10751_v43  ;;  %v10878_v56 = vrot.slane %v1379_v61, %v10751_v43  ;;  %v10881_v6 = vrot.slane %v1393_v62, %v10751_v43 }
 0x129   : > { %v10884_v30 = vrot.slane %v878_v59, %v10751_v43  ;;  %v1013_v31 = vrot.slane %v10869_v16, %v10751_v43  ;;  %v830_v32 = vcombine.high %v10869_v16, %v10869_v16  ;;  %v831_v35 = vcombine.high %v10872_v17, %v10872_v17 }
 0x12a   : > { %v10893_v37 = vrot.slane %v999_v23, %v10751_v43  ;;  %v1109_v38 = vunpack.c.l.b16 %v10787_v10  ;;  %v10897_v39 = vrot.slane %v828_v18, %v10751_v43  ;;  %v1110_v41 = vunpack.c.l.b16 %v964_v48 }
 0x12b   : > { %v1111_v42 = vunpack.c.l.b16 %v978_v58  ;;  %v1112_v44 = vunpack.c.l.b16 %v992_v26  ;;  %v10900_v47 = vrot.slane %v1323_v24, %v10751_v43  ;;  %v1337_v50 = vrot.slane %v10872_v17, %v10751_v43 }
 0x12c   : > { %v10905_v51 = vrot.slane %v829_v22, %v10751_v43  ;;  %v922_v52 = vrot.slane %v10819_v33, %v10751_v43  ;;  %v10910_v10 = vrot.slane %v1013_v31, %v10751_v43  ;;  %v1130_v59 = vrot.slane %v1110_v41, 7 }
 0x12d   : > { %v1132_v61 = vrot.slane %v1111_v42, 6  ;;  %v1134_v48 = vrot.slane %v1112_v44, 5  ;;  %v1113_v58 = vunpack.c.l.b16 %v10893_v37  ;;  %v929_v62 = vrot.slane %v732_v12, %v10751_v43 }
 0x12e   : > { %v1107_v0 = vunpack.c.l.b16 %v922_v52  ;;  %v1121_v1 = vrot.slane %v1106_v53, 7  ;;  %v1131_v2 = vsel %vm13141_vm1, %v1130_v59, %v1109_v38  ;;  %v1173_v33 = vsel %vm13139_vm0, %v1130_v59, %v1109_v38 }
 0x12f   : > { %v1076_v3 = vrot.slane %v1069_v9, %v10751_v43  ;;  %v1090_v14 = vrot.slane %v1083_v11, %v10751_v43  ;;  %v1133_v18 = vsel %vm13139_vm0, %v1132_v61, %v1131_v2  ;;  %v1174_v22 = vsel %vm13143_vm2, %v1132_v61, %v1173_v33 }
 0x130   : > { %v936_v23 = vrot.slane %v929_v62, %v10751_v43  ;;  %v1123_v4 = vsel %vm13141_vm1, %v1121_v1, %v1105_v45  ;;  %v1135_v12 = vsel %vm13143_vm2, %v1134_v48, %v1133_v18  ;;  %v10929_v53 = vsel %vm363_vm3, %v1134_v48, %v1174_v22  ;;  %v9781_v48 = vld [vmem:[#allocation5 + $0x78] sm:$0xff]  }
 0x131   : > { %v1124_v24 = vrot.slane %v1107_v0, 6  ;;  %v1169_v9 = vsel %vm13139_vm0, %v1121_v1, %v1105_v45  ;;  %v10935_v11 = vrot.slane %v1337_v50, %v10751_v43  ;;  %v1149_v26 = vpack.c.b16 %v1135_v12, %v1135_v12  ;;  %9270 = vmatprep.subr.bf16.mxu0 %v9781_v48 }
 0x132   : > { %v1108_v31 = vunpack.c.l.b16 %v936_v23  ;;  %v1097_v38 = vrot.slane %v879_v60, %v10751_v43  ;;  %v1117_v44 = vunpack.c.l.b16 %v10857_v8  ;;  %v1118_v52 = vunpack.c.l.b16 %v1076_v3 }
 0x133   : > { %v1126_v41 = vsel %vm13139_vm0, %v1124_v24, %v1123_v4  ;;  %v1170_v42 = vsel %vm13143_vm2, %v1124_v24, %v1169_v9  ;;  %1154 = vrot.lane.b32.xlu0 %v1149_v26, %s10584_s27  ;;  %v1119_v50 = vunpack.c.l.b16 %v1090_v14  ;;  %v1246_v59 = vrot.slane %v10830_v40, %v10751_v43 }
 0x134   : > { %v1127_v28 = vrot.slane %v1108_v31, 5  ;;  %v1104_v45 = vrot.slane %v1097_v38, %v10751_v43  ;;  %v1142_v46 = vrot.slane %v1118_v52, 7  ;;  %v1253_v60 = vrot.slane %v733_v25, %v10751_v43 }
 0x135   : > { %v1445_v8 = vrot.slane %v1430_v57, 7  ;;  %v1034_v61 = vrot.slane %v10897_v39, %v10751_v43  ;;  %v1144_v1 = vrot.slane %v1119_v50, 6  ;;  %v1114_v2 = vunpack.c.l.b16 %v10910_v10  ;;  %v9782_v50 = vld [vmem:[#allocation5 + $0x38] sm:$0xff]  }
 0x136   : > { %v1129_v62 = vsel %vm13143_vm2, %v1127_v28, %v1126_v41  ;;  %v10958_v0 = vsel %vm363_vm3, %v1127_v28, %v1170_v42  ;;  %v1120_v40 = vunpack.c.l.b16 %v1104_v45  ;;  %v1143_v5 = vsel %vm13141_vm1, %v1142_v46, %v1117_v44  ;;  %9271 = vmatpush3.bf16.msra.mxu0 %v9782_v50  ;;  %v396_v45 = vld [vmem:[#allocation2 + $0x18] sm:$0x44] }
 0x137   : > { %v1148_v33 = vpack.c.b16 %v1129_v62, %v1129_v62  ;;  %v1179_v25 = vsel %vm13139_vm0, %v1142_v46, %v1117_v44  ;;  %v1145_v36 = vsel %vm13139_vm0, %v1144_v1, %v1143_v5  ;;  %v1260_v3 = vrot.slane %v1253_v60, %v10751_v43 }
 0x138   : > { %v1146_v57 = vrot.slane %v1120_v40, 5  ;;  %v1180_v39 = vsel %vm13143_vm2, %v1144_v1, %v1179_v25  ;;  %v1431_v10 = vunpack.c.l.b16 %v1246_v59  ;;  %v1446_v18 = vsel %vm13141_vm1, %v1445_v8, %v1429_v55 }
 0x139   : > { %1152 = vrot.lane.b32.xlu0 %v1148_v33, %s10584_s27  ;;  %v1490_v22 = vsel %vm13139_vm0, %v1445_v8, %v1429_v55  ;;  %v1041_v23 = vrot.slane %v830_v32, %v10751_v43  ;;  %v1432_v24 = vunpack.c.l.b16 %v1260_v3  ;;  %v1115_v9 = vunpack.c.l.b16 %v1034_v61 }
 0x13a   : > { %v1147_v4 = vsel %vm13143_vm2, %v1146_v57, %v1145_v36  ;;  %v10985_v12 = vsel %vm363_vm3, %v1146_v57, %v1180_v39  ;;  %v1438_v26 = vunpack.c.l.b16 %v10935_v11  ;;  %v1447_v38 = vrot.slane %v1431_v10, 6 }
 0x13b   : > { %v1151_v31 = vpack.c.b16 %v1147_v4, %v1147_v4  ;;  %v1048_v34 = vrot.slane %v1041_v23, %v10751_v43  ;;  %v1449_v16 = vrot.slane %v1432_v24, 5  ;;  %v1136_v32 = vrot.slane %v1114_v2, 7  ;;  %v9791_v24 = vld [vmem:[#allocation5 + $0x20] sm:$0xff]  }
 0x13c   : > { %v1138_v41 = vrot.slane %v1115_v9, 6  ;;  %v1358_v42 = vrot.slane %v10905_v51, %v10751_v43  ;;  %v1448_v11 = vsel %vm13139_vm0, %v1447_v38, %v1446_v18  ;;  %v1491_v44 = vsel %vm13143_vm2, %v1447_v38, %v1490_v22  ;;  %v9783_v51 = vld [vmem:[#allocation5 + $0x70] sm:$0xff]  }
 0x13d   : > { %1158 = vrot.lane.b32.xlu1 %v1151_v31, %s10584_s27  ;;  %v1116_v52 = vunpack.c.l.b16 %v1048_v34  ;;  %v1365_v28 = vrot.slane %v831_v35, %v10751_v43  ;;  %v1450_v59 = vsel %vm13143_vm2, %v1449_v16, %v1448_v11  ;;  %v11012_v46 = vsel %vm363_vm3, %v1449_v16, %v1491_v44  ;;  %9272 = vmatprep.subr.bf16.mxu0 %v9783_v51  ;;  %v9785_v31 = vld [vmem:[#allocation5 + $0x68] sm:$0xff]   ;;  %v373_v51 = vld [vmem:[#allocation2 + $0x10] sm:$0x11]  ;;  %v9809_v35 = vld [vmem:[#allocation5 + $0x1f8] sm:$0xff]  }
 0x13e   : > { %v1137_v60 = vsel %vm13141_vm1, %v1136_v32, %v1113_v58  ;;  %v1176_v17 = vsel %vm13139_vm0, %v1136_v32, %v1113_v58  ;;  %v1437_v8 = vunpack.c.l.b16 %v10900_v47  ;;  %v1469_v61 = vpack.c.b16 %v1450_v59, %v1450_v59  ;;  %v430_v32 = vld [vmem:[#allocation3 + $0x8] sm:$0x55] }
 0x13f   : > { %v1139_v48 = vsel %vm13139_vm0, %v1138_v41, %v1137_v60  ;;  %v1140_v62 = vrot.slane %v1116_v52, 5  ;;  %v1177_v58 = vsel %vm13143_vm2, %v1138_v41, %v1176_v17  ;;  %v1372_v40 = vrot.slane %v1365_v28, %v10751_v43  ;;  %v376_v28 = vld [vmem:[#allocation2 + $0x18] sm:$0x11]  ;;  %v393_v59 = vld [vmem:[#allocation2 + $0x10] sm:$0x44]  ;;  %v9786_v60 = vld [vmem:[#allocation5 + $0xf8] sm:$0xff]  }
 0x140   : > { %v1439_v1 = vunpack.c.l.b16 %v1358_v42  ;;  %v1457_v2 = vrot.slane %v1438_v26, 7  ;;  %1473 = vrot.lane.b32.xlu0 %v1469_v61, %s10584_s27  ;;  %v1302_v5 = vrot.slane %v10801_v19, %v10751_v43  ;;  %v1309_v25 = vrot.slane %v782_v7, %v10751_v43  ;;  %v9787_v17 = vld [vmem:[#allocation5 + $0x28] sm:$0xff]   ;;  %9248 = vmatprep.subr.bf16.mxu1 %v9786_v60  ;;  %v9923_v52 = vld [vmem:[%s13132_s5 + $0x2a0] ss:$8 sps:$4 sm:$0xff]  }
 0x141   : > { %v1141_v47 = vsel %vm13143_vm2, %v1140_v62, %v1139_v48  ;;  %v11045_v33 = vsel %vm363_vm3, %v1140_v62, %v1177_v58  ;;  %v1442_v36 = vunpack.c.l.b16 %v10881_v6  ;;  %v1440_v39 = vunpack.c.l.b16 %v1372_v40  ;;  %v9789_v58 = vld [vmem:[#allocation5 + $0x60] sm:$0xff]  }
 0x142   : > { %v1150_v57 = vpack.c.b16 %v1141_v47, %v1141_v47  ;;  %v1458_v3 = vsel %vm13141_vm1, %v1457_v2, %v1437_v8  ;;  %v1459_v10 = vrot.slane %v1439_v1, 6  ;;  %v1496_v18 = vsel %vm13139_vm0, %v1457_v2, %v1437_v8  ;;  %v9788_v8 = vld [vmem:[#allocation5 + $0xb8] sm:$0xff]   ;;  %v353_v47 = vld [vmem:[#allocation2] sm:$0x77] }
 0x143   : > { %v1316_v22 = vrot.slane %v1309_v25, %v10751_v43  ;;  %v1435_v23 = vunpack.c.l.b16 %v1302_v5  ;;  %v1461_v54 = vrot.slane %v1440_v39, 5  ;;  %v1451_v7 = vrot.slane %v1434_v27, 7  ;;  %v390_v27 = vld [vmem:[#allocation2 + $0x8] sm:$0x44]  ;;  %v357_v5 = vld [vmem:[#allocation2 + $0x20] sm:$0x77]  ;;  %9249 = vmatpush3.bf16.msra.mxu1 %v9788_v8 }
 0x144   : > { %1156 = vrot.lane.b32.xlu1 %v1150_v57, %s10584_s27  ;;  %v1414_v6 = vrot.slane %v10884_v30, %v10751_v43  ;;  %v1421_v4 = vrot.slane %v880_v15, %v10751_v43  ;;  %v1460_v30 = vsel %vm13139_vm0, %v1459_v10, %v1458_v3  ;;  %v1497_v9 = vsel %vm13143_vm2, %v1459_v10, %v1496_v18  ;;  %v9784_v15 = vld [vmem:[#allocation5 + $0x30] sm:$0xff]   ;;  %v450_v3 = vld [vmem:[#allocation3 + $0x8] sm:$0xaa] }
 0x145   : > { %v1436_v26 = vunpack.c.l.b16 %v1316_v22  ;;  %v1453_v49 = vrot.slane %v1435_v23, 6  ;;  %v1462_v38 = vsel %vm13143_vm2, %v1461_v54, %v1460_v30  ;;  %v11089_v34 = vsel %vm363_vm3, %v1461_v54, %v1497_v9  ;;  %9273 = vmatpush3.bf16.msra.mxu0 %v9784_v15  ;;  %v9792_v30 = vld [vmem:[#allocation5 + $0xb0] sm:$0xff]   ;;  %v9793_v9 = vld [vmem:[#allocation5 + $0x58] sm:$0xff]  }
 0x146   : > { %v1452_v55 = vsel %vm13141_vm1, %v1451_v7, %v1433_v21  ;;  %v1493_v16 = vsel %vm13139_vm0, %v1451_v7, %v1433_v21  ;;  %v1441_v41 = vunpack.c.l.b16 %v10878_v56  ;;  %v1471_v42 = vpack.c.b16 %v1462_v38, %v1462_v38  ;;  %9274 = vmatprep.subr.bf16.mxu0 %v9785_v31  ;;  %v9794_v31 = vld [vmem:[#allocation5 + $0xe8] sm:$0xff]   ;;  %v9795_v38 = vld [vmem:[#allocation5 + $0x18] sm:$0xff]  }
 0x147   : > { %v1454_v11 = vsel %vm13139_vm0, %v1453_v49, %v1452_v55  ;;  %v1455_v44 = vrot.slane %v1436_v26, 5  ;;  %v1494_v63 = vsel %vm13143_vm2, %v1453_v49, %v1493_v16  ;;  %v1428_v21 = vrot.slane %v1421_v4, %v10751_v43  ;;  %v9790_v4 = vld [vmem:[#allocation5 + $0xf0] sm:$0xff]   ;;  %v9796_v55 = vld [vmem:[#allocation5 + $0xa8] sm:$0xff]  }
 0x148   : > { %v1443_v56 = vunpack.c.l.b16 %v1414_v6  ;;  %v1463_v50 = vrot.slane %v1442_v36, 7  ;;  %1477 = vrot.lane.b32.xlu0 %v1471_v42, %s10584_s27  ;;  %v371_v62 = vsel %vm11024_vm13, 0, %v370_v13  ;;  %v391_v37 = vsel %vm11061_vm6, 0, %v390_v27  ;;  %9250 = vmatprep.subr.bf16.mxu1 %v9790_v4  ;;  %v9797_v16 = vld [vmem:[#allocation5 + $0x50] sm:$0xff]   ;;  %v9800_v42 = vld [vmem:[#allocation5 + $0xa0] sm:$0xff]  }
 0x149   : > { %v1456_v61 = vsel %vm13143_vm2, %v1455_v44, %v1454_v11  ;;  %v11112_v48 = vsel %vm363_vm3, %v1455_v44, %v1494_v63  ;;  %v1444_v1 = vunpack.c.l.b16 %v1428_v21  ;;  %372 = vst [vmem:[#allocation2 + $0x8] sm:$0x11] %v371_v62  ;;  %392 = vst [vmem:[#allocation2 + $0x8] sm:$0x44] %v391_v37  ;;  %v431_v57 = vsel %vm11103_vm11, 0, %v430_v32  ;;  %9275 = vmatpush3.bf16.msra.mxu0 %v9787_v17  ;;  %v9798_v32 = vld [vmem:[#allocation5 + $0xe0] sm:$0xff]  }
 0x14a   : > { %v1470_v40 = vpack.c.b16 %v1456_v61, %v1456_v61  ;;  %v1464_v2 = vsel %vm13141_vm1, %v1463_v50, %v1441_v41  ;;  %v1465_v25 = vrot.slane %v1443_v56, 6  ;;  %v1499_v36 = vsel %vm13139_vm0, %v1463_v50, %v1441_v41  ;;  %432 = vst [vmem:[#allocation3 + $0x8] sm:$0x55] %v431_v57  ;;  %9276 = vmatprep.subr.bf16.mxu0 %v9789_v58  ;;  %v9799_v41 = vld [vmem:[#allocation5 + $0x10] sm:$0xff]   ;;  %v9801_v11 = vld [vmem:[#allocation5 + $0x48] sm:$0xff]   ;;  %v9802_v44 = vld [vmem:[#allocation5 + $0xd8] sm:$0xff]  }
 0x14b   : > { %v1467_v39 = vrot.slane %v1444_v1, 5  ;;  %v377_v10 = vsel %vm11024_vm13, 0, %v376_v28  ;;  %v397_v18 = vsel %vm11061_vm6, 0, %v396_v45  ;;  %v374_v7 = vsel %vm11024_vm13, 0, %v373_v51  ;;  %9251 = vmatpush3.bf16.msra.mxu1 %v9792_v30  ;;  %v9803_v28 = vld [vmem:[#allocation5 + $0x8] sm:$0xff]   ;;  %v9804_v45 = vld [vmem:[#allocation5 + $0x98] sm:$0xff]  }
 0x14c   : > { %1475 = vrot.lane.b32.xlu1 %v1470_v40, %s10584_s27  ;;  %v1466_v22 = vsel %vm13139_vm0, %v1465_v25, %v1464_v2  ;;  %v1500_v23 = vsel %vm13143_vm2, %v1465_v25, %v1499_v36  ;;  %378 = vst [vmem:[#allocation2 + $0x18] sm:$0x11] %v377_v10  ;;  %398 = vst [vmem:[#allocation2 + $0x18] sm:$0x44] %v397_v18  ;;  %v394_v6 = vsel %vm11061_vm6, 0, %v393_v59  ;;  %v354_v49 = vsel %vm352_vm7, 0, %v353_v47 }
 0x14d   : > { %v1468_v13 = vsel %vm13143_vm2, %v1467_v39, %v1466_v22  ;;  %v11145_v27 = vsel %vm363_vm3, %v1467_v39, %v1500_v23  ;;  %375 = vst [vmem:[#allocation2 + $0x10] sm:$0x11] %v374_v7  ;;  %395 = vst [vmem:[#allocation2 + $0x10] sm:$0x44] %v394_v6  ;;  %v358_v15 = vsel %vm352_vm7, 0, %v357_v5  ;;  %9277 = vmatpush3.bf16.msra.mxu0 %v9791_v24  ;;  %9252 = vmatprep.subr.bf16.mxu1 %v9794_v31  ;;  %v9805_v17 = vld [vmem:[#allocation5 + $0x40] sm:$0xff]  }
 0x14e   : > { %v1472_v26 = vpack.c.b16 %v1468_v13, %v1468_v13  ;;  %355 = vst [vmem:[#allocation2] sm:$0x77] %v354_v49  ;;  %359 = vst [vmem:[#allocation2 + $0x20] sm:$0x77] %v358_v15  ;;  %9278 = vmatprep.subr.bf16.mxu0 %v9793_v9  ;;  %v9806_v61 = vld [vmem:[#allocation5 + $0xd0] sm:$0xff]   ;;  %v9807_v62 = vld [vmem:[#allocation5] sm:$0xff]   ;;  %v1183_v24 = vpack.c.b16 %v10929_v53, %v10929_v53  ;;  %v1185_v53 = vpack.c.b16 %v10985_v12, %v10985_v12 }
 0x14f   : > { %9253 = vmatpush3.bf16.msra.mxu1 %v9796_v55  ;;  %v9808_v37 = vld [vmem:[#allocation5 + $0x90] sm:$0xff]   ;;  %vm13142_vm3 = vsmask.f32 1280  ;;  %v9810_v58 = vld [vmem:[#allocation5 + $0xc8] sm:$0xff]   ;;  %vm414_vm0 = vsmask.f32 7424  ;;  %v1184_v12 = vpack.c.b16 %v11045_v33, %v11045_v33  ;;  %v1503_v33 = vpack.c.b16 %v11112_v48, %v11112_v48 }
 0x150   : > { %1479 = vrot.lane.b32.xlu1 %v1472_v26, %s10584_s27  ;;  %9254 = vmatprep.subr.bf16.mxu1 %v9798_v32  ;;  %vm11162_vm14 = vmand %vm13141_vm1, %vm13142_vm3  ;;  %v9812_v1 = vld [vmem:[#allocation5 + $0x88] sm:$0xff]   ;;  %v9814_v2 = vld [vmem:[#allocation5 + $0xc0] sm:$0xff]   ;;  %vm441_vm2 = vcmask 1045509   ;;  %v1182_v26 = vpack.c.b16 %v10958_v0, %v10958_v0  ;;  %v1502_v0 = vpack.c.b16 %v11012_v46, %v11012_v46  ;;  %v1504_v46 = vpack.c.b16 %v11089_v34, %v11089_v34  ;;  %s9232_s27 = sshll.u32 %s10659_s13, 4  ;;  %s10519_s13 = scalar_lea.vmem %s10518_s26, 32 }
 0x151   : > { %9279 = vmatpush3.bf16.msra.mxu0 %v9795_v38  ;;  %v417_v47 = vld [vmem:[#allocation3] sm:$0xff]  ;;  %v421_v5 = vld [vmem:[#allocation3 + $0x10] sm:$0xff]  ;;  %v9816_v25 = vld [vmem:[#allocation5 + $0x80] sm:$0xff]   ;;  %v1505_v48 = vpack.c.b16 %v11145_v27, %v11145_v27  ;;  %s7951_s22 = scalar_lea.hbm %s13136_s9, %s9232_s27  ;;  %p10521_p12 = scmp.lt.s32.totalorder %s10519_s13, %s10513_s23 }
 0x152   : > { %9280 = vmatprep.subr.bf16.mxu0 %v9797_v16  ;;  %v9818_v39 = vld [vmem:[#allocation5 + $0x178] sm:$0xff]  }
 0x153   : > { %9255 = vmatpush3.bf16.msra.mxu1 %v9800_v42  ;;  %p10522_p13 = por %p10521_p12, %p10520_p11 }
 0x154   : > { %9256 = vmatprep.subr.bf16.mxu1 %v9802_v44 }
 0x155   : > { %v367_v63 = vld [vmem:[#allocation2] sm:$0x11]  ;;  %v387_v21 = vld [vmem:[#allocation2] sm:$0x44]  ;;  %9281 = vmatpush3.bf16.msra.mxu0 %v9799_v41  ;;  %p10523_p0 = pnand %p10522_p13, %p10516_p10 }
 0x156   : > { %v379_v56 = vld [vmem:[#allocation2 + $0x20] sm:$0x11]  ;;  %v368_v50 = vsel %vm11024_vm13, 0, %v367_v63  ;;  %v388_v51 = vsel %vm11061_vm6, 0, %v387_v21  ;;  %v399_v60 = vld [vmem:[#allocation2 + $0x20] sm:$0x44]  ;;  %9282 = vmatprep.subr.bf16.mxu0 %v9801_v11 }
 0x157   : > { %v380_v59 = vsel %vm11024_vm13, 0, %v379_v56  ;;  %369 = vst [vmem:[#allocation2] sm:$0x11] %v368_v50  ;;  %389 = vst [vmem:[#allocation2] sm:$0x44] %v388_v51  ;;  %v400_v8 = vsel %vm11061_vm6, 0, %v399_v60  ;;  %9257 = vmatpush3.bf16.msra.mxu1 %v9804_v45 }
 0x158   : > { %381 = vst [vmem:[#allocation2 + $0x20] sm:$0x11] %v380_v59  ;;  %401 = vst [vmem:[#allocation2 + $0x20] sm:$0x44] %v400_v8  ;;  %9258 = vmatprep.subr.bf16.mxu1 %v9806_v61  ;;  %vm405_vm13 = vcmask 1043458  }
 0x159   : > { %9283 = vmatpush3.bf16.msra.mxu0 %v9803_v28  ;;  %vm11168_vm6 = vmand %vm13140_vm9, %vm13142_vm3 }
 0x15a   : > { %9284 = vmatprep.subr.bf16.mxu0 %v9805_v17  ;;  %vm407_vm7 = vmand %vm405_vm13, %vm406_vm12  ;;  %v10585_v17 = vmov 1983009808  }
 0x15b   : > { %9259 = vmatpush3.bf16.msra.mxu1 %v9808_v37  ;;  %vm408_vm4 = vmor %vm407_vm7, %vm11168_vm6  ;;  %vm13171_vm6 = vcmask 1043459   ;;  %v1729_v8 = vunpack.c.l.s4 %v10585_v17 }
 0x15c   : > { %9260 = vmatprep.subr.bf16.mxu1 %v9810_v58  ;;  %vm411_vm9 = vmand %vm409_vm15, %vm410_vm8 }
 0x15d   : > { %9285 = vmatpush3.bf16.msra.mxu0 %v9807_v62  ;;  %vm412_vm1 = vmor %vm411_vm9, %vm408_vm4  ;;  %vm444_vm9 = vcmask 1047559  }
 0x15e   : > { %9314 = vmatprep.subr.bf16.mxu0 %v9809_v35  ;;  %vm415_vm3 = vmand %vm413_vm5, %vm414_vm0 }
 0x15f   : > { %9261 = vmatpush3.bf16.msra.mxu1 %v9812_v1  ;;  %vm416_vm13 = vmor %vm415_vm3, %vm412_vm1 }
 0x160   : > { %9262 = vmatprep.subr.bf16.mxu1 %v9814_v2  ;;  %v418_v36 = vsel %vm416_vm13, 0, %v417_v47  ;;  %v422_v57 = vsel %vm416_vm13, 0, %v421_v5  ;;  %vm439_vm7 = vmand %vm13171_vm6, %vm406_vm12  ;;  %vm1164_vm12 = vcmask 1041920   ;;  %v1730_v2 = vunpack.c.0.s8 %v1729_v8 }
 0x161   : > { %419 = vst [vmem:[#allocation3] sm:$0xff] %v418_v36  ;;  %423 = vst [vmem:[#allocation3 + $0x10] sm:$0xff] %v422_v57  ;;  %vm1633_vm6 = vsmask.f32 5392 }
 0x162   : > { %vm440_vm4 = vmor %vm439_vm7, %vm11162_vm14  ;;  %vm1635_vm7 = vsmask.f32 7448 }
 0x163   : > { %vm442_vm15 = vmand %vm441_vm2, %vm410_vm8  ;;  %9263 = vmatpush3.bf16.msra.mxu1 %v9816_v25  ;;  %vm1190_vm2 = vcmask 518144   ;;  %vm1191_vm8 = vsmask.f32 2306 }
 0x164   : > { %vm443_vm5 = vmor %vm442_vm15, %vm440_vm4  ;;  %9292 = vmatprep.subr.bf16.mxu1 %v9818_v39  ;;  %vm13174_vm4 = vsmask.f32 1280 }
 0x165   : > { %vm445_vm1 = vmand %vm444_vm9, %vm414_vm0  ;;  %vm1631_vm0 = vsmask.f32 3336 }
 0x166   : > { %vm446_vm3 = vmor %vm445_vm1, %vm443_vm5  ;;  %vm2721_vm1 = vsmask.f32 1282 }
 0x167   : > { %v451_v10 = vsel %vm446_vm3, 0, %v450_v3  ;;  %vm11184_vm13 = vmand %vm1190_vm2, %vm1191_vm8  ;;  %vm13179_vm8 = vcmask 1042434  }
 0x168   : > { %452 = vst [vmem:[#allocation3 + $0x8] sm:$0xaa] %v451_v10  ;;  %v447_v18 = vld [vmem:[#allocation3] sm:$0xaa]  ;;  %v453_v22 = vld [vmem:[#allocation3 + $0x10] sm:$0xaa]  ;;  %vm1632_vm9 = vmor %vm13174_vm4, %vm1631_vm0 }
 0x169   : > { %v448_v23 = vsel %vm446_vm3, 0, %v447_v18  ;;  %v454_v54 = vsel %vm446_vm3, 0, %v453_v22  ;;  %v11233_v22 = vsub.s32 %v1730_v2, %v10739_v20  ;;  %vm1634_vm15 = vmor %vm1632_vm9, %vm1633_vm6  ;;  %vm2945_vm3 = vsmask.f32 2312 }
 0x16a   : > { %449 = vst [vmem:[#allocation3] sm:$0xaa] %v448_v23  ;;  %455 = vst [vmem:[#allocation3 + $0x10] sm:$0xaa] %v454_v54  ;;  %vm13181_vm0 = vsmask.f32 256 }
 0x16b   : > { %vm11244_vm5 = vmor %vm1634_vm15, %vm1635_vm7  ;;  %vm13184_vm7 = vcmask 1041408   ;;  %vm2947_vm9 = vsmask.f32 3340 }
 0x16c   : > { %vm11513_vm4 = vmand %vm13184_vm7, %vm2721_vm1 }
 0x16d   : > { %vm13190_vm1 = vmmov %vm13179_vm8 }
 0x1a5   : > { %v1155_v7 = vpop.permute.xlu0 %1154 }
 0x1a6   : > { %1166 = vst.msk [vmem:[#allocation2 + $0xc] sm:$0x3] %vm1164_vm12, %v1155_v7 }
 0x1ab   : > { %v1153_v6 = vpop.permute.xlu0 %1152 }
 0x1ac   : > { %1165 = vst.msk [vmem:[#allocation2 + $0x4] sm:$0x3] %vm1164_vm12, %v1153_v6 }
 0x1ad   : > { %v1196_v13 = vld [vmem:[#allocation2 + $0xc] sm:$0x7] }
 0x1ae   : > { %v1197_v30 = vsel %vm11184_vm13, %v1183_v24, %v1196_v13 }
 0x1af   : > { %v1159_v9 = vpop.permute.xlu1 %1158  ;;  %1198 = vst [vmem:[#allocation2 + $0xc] sm:$0x7] %v1197_v30 }
 0x1b0   : > { %1168 = vst.msk [vmem:[#allocation2 + $0x1c] sm:$0x3] %vm1164_vm12, %v1159_v9 }
 0x1b2   : > { %v1474_v15 = vpop.permute.xlu0 %1473 }
 0x1b3   : > { %v1193_v49 = vld [vmem:[#allocation2 + $0x4] sm:$0x7]  ;;  %1486 = vst.msk [vmem:[#allocation2 + $0x8] sm:$0x3] %vm1164_vm12, %v1474_v15 }
 0x1b4   : > { %v1194_v31 = vsel %vm11184_vm13, %v1182_v26, %v1193_v49 }
 0x1b5   : > { %1195 = vst [vmem:[#allocation2 + $0x4] sm:$0x7] %v1194_v31 }
 0x1b6   : > { %v1157_v38 = vpop.permute.xlu1 %1156 }
 0x1b7   : > { %v1202_v55 = vld [vmem:[#allocation2 + $0x1c] sm:$0x7]  ;;  %1167 = vst.msk [vmem:[#allocation2 + $0x14] sm:$0x3] %vm1164_vm12, %v1157_v38 }
 0x1b8   : > { %v1203_v16 = vsel %vm11184_vm13, %v1185_v53, %v1202_v55 }
 0x1b9   : > { %1204 = vst [vmem:[#allocation2 + $0x1c] sm:$0x7] %v1203_v16 }
 0x1ba   : > { %v1510_v32 = vld [vmem:[#allocation2 + $0x8] sm:$0x7]  ;;  %v1478_v41 = vpop.permute.xlu0 %1477 }
 0x1bb   : > { %v1511_v42 = vsel %vm11184_vm13, %v1502_v0, %v1510_v32  ;;  %1488 = vst.msk [vmem:[#allocation2 + $0x18] sm:$0x3] %vm1164_vm12, %v1478_v41  ;;  %v9827_v41 = vld [vmem:[#allocation5 + $0x198] sm:$0xff]  }
 0x1bc   : > { %1512 = vst [vmem:[#allocation2 + $0x8] sm:$0x7] %v1511_v42  ;;  %v8049_v45 = vld.sshfl [vmem:[#allocation2] sm:$0x5f pattern:$0x76325410] }
 0x1bd   : > { %v1638_v51 = vshrl.u32 %v8049_v45, 16  ;;  %v1641_v59 = vshll.u32 %v8049_v45, 16  ;;  %v1606_v25 = vcombine.high %v8049_v45, %v8049_v45  ;;  %v8045_v39 = vld.sshfl [vmem:[#allocation2] sm:$0xf pattern:$0x76325410] }
 0x1be   : > { %v1199_v11 = vld [vmem:[#allocation2 + $0x14] sm:$0x7]  ;;  %v1476_v44 = vpop.permute.xlu1 %1475  ;;  %v9811_v45 = vld [vmem:[#allocation5 + $0x1b8] sm:$0xff]  }
 0x1bf   : > { %v1200_v28 = vsel %vm11184_vm13, %v1184_v12, %v1199_v11  ;;  %1487 = vst.msk [vmem:[#allocation2 + $0x10] sm:$0x3] %vm1164_vm12, %v1476_v44  ;;  %v1640_v40 = vrot.slane %v1638_v51, 6  ;;  %v1643_v1 = vrot.slane %v1641_v59, 7  ;;  %v1647_v24 = vshll.u32 %v1606_v25, 16 }
 0x1c0   : > { %1201 = vst [vmem:[#allocation2 + $0x14] sm:$0x7] %v1200_v28 }
 0x1c1   : > { %v1644_v10 = vor.u32 %v1643_v1, %v1640_v40 }
 0x1c2   : > { %v1516_v63 = vld [vmem:[#allocation2 + $0x18] sm:$0x7]  ;;  %v1480_v21 = vpop.permute.xlu1 %1479 }
 0x1c3   : > { %v1517_v56 = vsel %vm11184_vm13, %v1504_v46, %v1516_v63  ;;  %1489 = vst.msk [vmem:[#allocation2 + $0x20] sm:$0x3] %vm1164_vm12, %v1480_v21  ;;  %v8050_v50 = vld.sshfl [vmem:[#allocation2 + $0x8] sm:$0x5f pattern:$0x76325410] }
 0x1c4   : > { %1518 = vst [vmem:[#allocation2 + $0x18] sm:$0x7] %v1517_v56  ;;  %v1652_v61 = vshrl.u32 %v8050_v50, 16  ;;  %v1655_v34 = vshll.u32 %v8050_v50, 16  ;;  %v1614_v58 = vcombine.high %v8050_v50, %v8050_v50  ;;  %v1645_v31 = vrot.slane %v1644_v10, 2 }
 0x1c5   : > { %v11225_v5 = vld.sshfl [vmem:[#allocation2 + $0x8] sm:$0xf pattern:$0x76325410]  ;;  %v1649_v63 = vrot.slane %v1647_v24, 7  ;;  %vm13177_vm12 = vcmask 1041409  }
 0x1c6   : > { %v1513_v60 = vld [vmem:[#allocation2 + $0x10] sm:$0x7]  ;;  %v1654_v37 = vrot.slane %v1652_v61, 6  ;;  %v1657_v35 = vrot.slane %v1655_v34, 7  ;;  %v1661_v18 = vshll.u32 %v1614_v58, 16  ;;  %v1883_v23 = vcombine.low %v8045_v39, %v11225_v5  ;;  %v9815_v58 = vld [vmem:[#allocation5 + $0x1b0] sm:$0xff]   ;;  %vm13178_vm2 = vmmov %vm13177_vm12 }
 0x1c7   : > { %v1514_v62 = vsel %vm11184_vm13, %v1503_v33, %v1513_v60  ;;  %v9813_v33 = vld [vmem:[#allocation5 + $0x1f0] sm:$0xff]   ;;  %v1650_v60 = vsel %vm11244_vm5, %v1645_v31, %v1649_v63  ;;  %v9823_v31 = vld [vmem:[#allocation5 + $0x1a0] sm:$0xff]   ;;  %v9835_v63 = vld [vmem:[#allocation5 + $0x188] sm:$0xff]  }
 0x1c8   : > { %1515 = vst [vmem:[#allocation2 + $0x10] sm:$0x7] %v1514_v62  ;;  %v1658_v36 = vor.u32 %v1657_v35, %v1654_v37  ;;  %v1891_v55 = vrot.slane %v1883_v23, %v11233_v22  ;;  %v1663_v0 = vrot.slane %v1661_v18, 7  ;;  %vm13187_vm15 = vmmov %vm13178_vm2 }
 0x1ca   : > { %v1519_v47 = vld [vmem:[#allocation2 + $0x20] sm:$0x7]  ;;  %v1659_v13 = vrot.slane %v1658_v36, 2 }
 0x1cb   : > { %v1520_v57 = vsel %vm11184_vm13, %v1505_v48, %v1519_v47  ;;  %v8052_v3 = vld.sshfl [vmem:[#allocation2 + $0x18] sm:$0x5f pattern:$0x76325410]  ;;  %vm13180_vm13 = vmmov %vm13179_vm8 }
 0x1cc   : > { %1521 = vst [vmem:[#allocation2 + $0x20] sm:$0x7] %v1520_v57  ;;  %v11230_v27 = vld.sshfl [vmem:[#allocation2 + $0x18] sm:$0xf pattern:$0x76325410]  ;;  %v1630_v4 = vcombine.high %v8052_v3, %v8052_v3  ;;  %v1664_v21 = vsel %vm11244_vm5, %v1659_v13, %v1663_v0 }
 0x1cd   : > { %v1680_v54 = vshrl.u32 %v8052_v3, 16  ;;  %v1683_v7 = vshll.u32 %v8052_v3, 16  ;;  %v1726_v35 = vcombine.low %v1650_v60, %v1664_v21  ;;  %v9817_v47 = vld [vmem:[#allocation5 + $0x1e8] sm:$0xff]  }
 0x1ce   : > { %v1689_v44 = vshll.u32 %v1630_v4, 16  ;;  %v9821_v4 = vld [vmem:[#allocation5 + $0x1e0] sm:$0xff]  }
 0x1cf   : > { %v11236_v6 = vld.sshfl [vmem:[#allocation2 + $0x10] sm:$0xf pattern:$0x76325410]  ;;  %v1682_v26 = vrot.slane %v1680_v54, 6  ;;  %v1685_v49 = vrot.slane %v1683_v7, 7  ;;  %v1734_v10 = vrot.slane %v1726_v35, %v11233_v22 }
 0x1d0   : > { %v1884_v30 = vcombine.low %v11236_v6, %v11230_v27  ;;  %v8051_v9 = vld.sshfl [vmem:[#allocation2 + $0x10] sm:$0x5f pattern:$0x76325410]  ;;  %v1691_v37 = vrot.slane %v1689_v44, 7  ;;  %v2109_v39 = vcombine.low %v11225_v5, %v11236_v6  ;;  %v9831_v44 = vld [vmem:[#allocation5 + $0x190] sm:$0xff]  }
 0x1d1   : > { %v1622_v15 = vcombine.high %v8051_v9, %v8051_v9  ;;  %v1666_v53 = vshrl.u32 %v8051_v9, 16  ;;  %v1669_v38 = vshll.u32 %v8051_v9, 16  ;;  %v1686_v32 = vor.u32 %v1685_v49, %v1682_v26  ;;  %v9820_v9 = vld [vmem:[#allocation5 + $0x138] sm:$0xff]   ;;  %v9822_v26 = vld [vmem:[#allocation5 + $0x170] sm:$0xff]   ;;  %v9848_v35 = vld [vmem:[%s13132_s5 + $0x370] ss:$8 sps:$4 sm:$0xff]  }
 0x1d2   : > { %v1898_v16 = vrot.slane %v1884_v30, %v11233_v22  ;;  %v11265_v5 = vrot.slane %v2109_v39, %v11233_v22  ;;  %v9865_v39 = vld [vmem:[%s13132_s5 + $0x244] ss:$8 sps:$4 sm:$0xff]  }
 0x1d3   : > { %v1668_v42 = vrot.slane %v1666_v53, 6  ;;  %v1671_v12 = vrot.slane %v1669_v38, 7  ;;  %v1675_v11 = vshll.u32 %v1622_v15, 16  ;;  %v1687_v51 = vrot.slane %v1686_v32, 2  ;;  %v9826_v32 = vld [vmem:[#allocation5 + $0x168] sm:$0xff]  }
 0x1d4   : > { %v1899_v28 = vcombine.low %v1891_v55, %v1898_v16  ;;  %v1900_v46 = vcombine.high %v1891_v55, %v1898_v16  ;;  %v8088_v56 = vld.sshfl [vmem:[#allocation2 + $0x20] sm:$0xf pattern:$0x76325410]  ;;  %v9825_v55 = vld [vmem:[#allocation5 + $0x1d8] sm:$0xff]  }
 0x1d5   : > { %v1672_v50 = vor.u32 %v1671_v12, %v1668_v42  ;;  %v8108_v59 = vld.sshfl [vmem:[#allocation2 + $0x20] sm:$0x5f pattern:$0x76325410]  ;;  %v1677_v62 = vrot.slane %v1675_v11, 7  ;;  %v2110_v40 = vcombine.low %v11230_v27, %v8088_v56  ;;  %v1692_v36 = vsel %vm11244_vm5, %v1687_v51, %v1691_v37  ;;  %v9819_v27 = vld [vmem:[#allocation5 + $0x1a8] sm:$0xff]  }
 0x1d6   : > { %2031 = vmatprep.mubr.bf16.mxu0 %v1900_v46  ;;  %v2307_v17 = vcombine.high %v8108_v59, %v8108_v59  ;;  %v2351_v8 = vshrl.u32 %v8108_v59, 16  ;;  %v2354_v61 = vshll.u32 %v8108_v59, 16  ;;  %v9824_v16 = vld [vmem:[#allocation5 + $0x130] sm:$0xff]   ;;  %v9828_v12 = vld [vmem:[#allocation5 + $0x128] sm:$0xff]   ;;  %v9830_v11 = vld [vmem:[#allocation5 + $0x160] sm:$0xff]  }
 0x1d7   : > { %2032 = vmatmul.mubr.bf16.vlgmr.msra.gmra.mxu0 %v1899_v28  ;;  %v1673_v34 = vrot.slane %v1672_v50, 2  ;;  %v11262_v23 = vrot.slane %v2110_v40, %v11233_v22  ;;  %v9829_v42 = vld [vmem:[#allocation5 + $0x1d0] sm:$0xff]   ;;  %v9833_v28 = vld [vmem:[#allocation5 + $0x1c8] sm:$0xff]   ;;  %v9832_v46 = vld [vmem:[#allocation5 + $0x120] sm:$0xff]  }
 0x1d8   : > { %9315 = vmatpush3.bf16.msra.mxu0 %v9811_v45  ;;  %v2353_v1 = vrot.slane %v2351_v8, 6  ;;  %v2356_v48 = vrot.slane %v2354_v61, 7  ;;  %v2360_v2 = vshll.u32 %v2307_v17, 16  ;;  %v9834_v45 = vld [vmem:[#allocation5 + $0x158] sm:$0xff]   ;;  %v9839_v50 = vld [vmem:[#allocation5 + $0x180] sm:$0xff]   ;;  %v9840_v51 = vld [vmem:[#allocation5 + $0x110] sm:$0xff]  }
 0x1d9   : > { %9316 = vmatprep.subr.bf16.mxu0 %v9813_v33  ;;  %v1678_v25 = vsel %vm11244_vm5, %v1673_v34, %v1677_v62  ;;  %v2126_v15 = vcombine.high %v11265_v5, %v11262_v23  ;;  %v9836_v56 = vld [vmem:[#allocation5 + $0x118] sm:$0xff]   ;;  %v9838_v33 = vld [vmem:[#allocation5 + $0x150] sm:$0xff]   ;;  %v9841_v59 = vld [vmem:[#allocation5 + $0x148] sm:$0xff]   ;;  %v2125_v34 = vcombine.low %v11265_v5, %v11262_v23 }
 0x1da   : > { %v1727_v57 = vcombine.low %v1678_v25, %v1692_v36  ;;  %v2357_v3 = vor.u32 %v2356_v48, %v2353_v1  ;;  %v2362_v7 = vrot.slane %v2360_v2, 7  ;;  %v2397_v24 = vcombine.low %v1664_v21, %v1678_v25  ;;  %v9837_v21 = vld [vmem:[#allocation5 + $0x1c0] sm:$0xff]   ;;  %v9842_v17 = vld [vmem:[#allocation5 + $0x108] sm:$0xff]   ;;  %v9851_v40 = vld [vmem:[%s13132_s5 + $0x260] ss:$8 sps:$4 sm:$0xff]  }
 0x1db   : > { %v9843_v8 = vld [vmem:[#allocation5 + $0x140] sm:$0xff]   ;;  %v9853_v1 = vld [vmem:[%s13132_s5 + $0x264] ss:$8 sps:$4 sm:$0xff]   ;;  %v9854_v48 = vld [vmem:[%s13132_s5 + $0x360] ss:$8 sps:$4 sm:$0xff]  }
 0x1dc   : > { %9317 = vmatpush3.bf16.msra.mxu0 %v9815_v58  ;;  %v1741_v18 = vrot.slane %v1727_v57, %v11233_v22  ;;  %v2358_v54 = vrot.slane %v2357_v3, 2  ;;  %v2405_v53 = vrot.slane %v2397_v24, %v11233_v22  ;;  %v9844_v61 = vld [vmem:[#allocation5 + $0x100] sm:$0xff]   ;;  %v9856_v2 = vld [vmem:[%s13132_s5 + $0x364] ss:$8 sps:$4 sm:$0xff]   ;;  %v9863_v3 = vld [vmem:[%s13132_s5 + $0x240] ss:$8 sps:$4 sm:$0xff]  }
 0x1dd   : > { %9318 = vmatprep.subr.bf16.mxu0 %v9817_v47  ;;  %v9845_v62 = vld [vmem:[%s13132_s5 + $0x270] ss:$8 sps:$4 sm:$0xff]   ;;  %v9847_v37 = vld [vmem:[%s13132_s5 + $0x274] ss:$8 sps:$4 sm:$0xff]   ;;  %v9875_v24 = vld [vmem:[%s13132_s5 + $0x220] ss:$8 sps:$4 sm:$0xff]  }
 0x1de   : > { %v1743_v13 = vcombine.high %v1734_v10, %v1741_v18  ;;  %v1742_v30 = vcombine.low %v1734_v10, %v1741_v18  ;;  %v2363_v6 = vsel %vm11244_vm5, %v2358_v54, %v2362_v7  ;;  %v9850_v58 = vld [vmem:[%s13132_s5 + $0x374] ss:$8 sps:$4 sm:$0xff]   ;;  %v9857_v25 = vld [vmem:[%s13132_s5 + $0x250] ss:$8 sps:$4 sm:$0xff]   ;;  %v9868_v10 = vld [vmem:[%s13132_s5 + $0x344] ss:$8 sps:$4 sm:$0xff]  }
 0x1df   : > { %v2398_v49 = vcombine.low %v1692_v36, %v2363_v6  ;;  %v9859_v47 = vld [vmem:[%s13132_s5 + $0x254] ss:$8 sps:$4 sm:$0xff]   ;;  %v9860_v57 = vld [vmem:[%s13132_s5 + $0x350] ss:$8 sps:$4 sm:$0xff]   ;;  %v9866_v18 = vld [vmem:[%s13132_s5 + $0x340] ss:$8 sps:$4 sm:$0xff]  }
 0x1e0   : > { %1874 = vmatprep.mubr.bf16.mxu1 %v1743_v13  ;;  %9319 = vmatpush3.bf16.msra.mxu0 %v9819_v27  ;;  %v9862_v36 = vld [vmem:[%s13132_s5 + $0x354] ss:$8 sps:$4 sm:$0xff]   ;;  %v9869_v23 = vld [vmem:[%s13132_s5 + $0x230] ss:$8 sps:$4 sm:$0xff]   ;;  %v9880_v13 = vld [vmem:[%s13132_s5 + $0x324] ss:$8 sps:$4 sm:$0xff]  }
 0x1e1   : > { %1875 = vmatmul.mubr.bf16.vlgmr.msra.gmra.mxu1 %v1742_v30  ;;  %9320 = vmatprep.subr.bf16.mxu0 %v9821_v4  ;;  %v2412_v38 = vrot.slane %v2398_v49, %v11233_v22  ;;  %v9871_v27 = vld [vmem:[%s13132_s5 + $0x234] ss:$8 sps:$4 sm:$0xff]   ;;  %v9872_v7 = vld [vmem:[%s13132_s5 + $0x330] ss:$8 sps:$4 sm:$0xff]   ;;  %v9877_v4 = vld [vmem:[%s13132_s5 + $0x224] ss:$8 sps:$4 sm:$0xff]  }
 0x1e2   : > { %9293 = vmatpush3.bf16.msra.mxu1 %v9820_v9  ;;  %2257 = vmatprep.mubr.bf16.mxu1 %v2126_v15  ;;  %v9874_v54 = vld [vmem:[%s13132_s5 + $0x334] ss:$8 sps:$4 sm:$0xff]   ;;  %v9878_v30 = vld [vmem:[%s13132_s5 + $0x320] ss:$8 sps:$4 sm:$0xff]   ;;  %v9881_v5 = vld [vmem:[%s13132_s5 + $0x210] ss:$8 sps:$4 sm:$0xff]  }
 0x1e3   : > { %9294 = vmatprep.subr.bf16.mxu1 %v9822_v26  ;;  %v2414_v0 = vcombine.high %v2405_v53, %v2412_v38  ;;  %v2413_v60 = vcombine.low %v2405_v53, %v2412_v38  ;;  %v9883_v9 = vld [vmem:[%s13132_s5 + $0x214] ss:$8 sps:$4 sm:$0xff]   ;;  %v9884_v26 = vld [vmem:[%s13132_s5 + $0x310] ss:$8 sps:$4 sm:$0xff]   ;;  %v9889_v49 = vld [vmem:[%s13132_s5 + $0x204] ss:$8 sps:$4 sm:$0xff]  }
 0x1e4   : > { %9321 = vmatpush3.bf16.msra.mxu0 %v9823_v31  ;;  %v9886_v6 = vld [vmem:[%s13132_s5 + $0x314] ss:$8 sps:$4 sm:$0xff]   ;;  %v9887_v15 = vld [vmem:[%s13132_s5 + $0x200] ss:$8 sps:$4 sm:$0xff]   ;;  %v9892_v31 = vld [vmem:[%s13132_s5 + $0x304] ss:$8 sps:$4 sm:$0xff]  }
 0x1e5   : > { %2545 = vmatprep.mubr.bf16.mxu0 %v2414_v0  ;;  %9322 = vmatprep.subr.bf16.mxu0 %v9825_v55  ;;  %v9890_v53 = vld [vmem:[%s13132_s5 + $0x300] ss:$8 sps:$4 sm:$0xff]   ;;  %v9895_v38 = vld [vmem:[%s13132_s5 + $0x2f4] ss:$8 sps:$4 sm:$0xff]   ;;  %v9893_v55 = vld [vmem:[%s13132_s5 + $0x2f0] ss:$8 sps:$4 sm:$0xff]  }
 0x1e6   : > { %9295 = vmatpush3.bf16.msra.mxu1 %v9824_v16  ;;  %v9896_v16 = vld [vmem:[%s13132_s5 + $0x3f0] ss:$8 sps:$4 sm:$0xff]   ;;  %v9898_v0 = vld [vmem:[%s13132_s5 + $0x3f4] ss:$8 sps:$4 sm:$0xff]   ;;  %vm13188_vm5 = vmmov %vm13178_vm2 }
 0x1e7   : > { %9296 = vmatprep.subr.bf16.mxu1 %v9826_v32  ;;  %v9901_v32 = vld [vmem:[%s13132_s5 + $0x2e4] ss:$8 sps:$4 sm:$0xff]  }
 0x1e8   : > { %9323 = vmatpush3.bf16.msra.mxu0 %v9827_v41  ;;  %v9899_v41 = vld [vmem:[%s13132_s5 + $0x2e0] ss:$8 sps:$4 sm:$0xff]  }
 0x1e9   : > { %9324 = vmatprep.subr.bf16.mxu0 %v9829_v42  ;;  %v9904_v42 = vld [vmem:[%s13132_s5 + $0x3e4] ss:$8 sps:$4 sm:$0xff]  }
 0x1ea   : > { %9297 = vmatpush3.bf16.msra.mxu1 %v9828_v12  ;;  %v9907_v12 = vld [vmem:[%s13132_s5 + $0x2d4] ss:$8 sps:$4 sm:$0xff]  }
 0x1eb   : > { %9298 = vmatprep.subr.bf16.mxu1 %v9830_v11  ;;  %v9902_v11 = vld [vmem:[%s13132_s5 + $0x3e0] ss:$8 sps:$4 sm:$0xff]  }
 0x1ec   : > { %9325 = vmatpush3.bf16.msra.mxu0 %v9831_v44  ;;  %v9910_v44 = vld [vmem:[%s13132_s5 + $0x3d4] ss:$8 sps:$4 sm:$0xff]  }
 0x1ed   : > { %9326 = vmatprep.subr.bf16.mxu0 %v9833_v28  ;;  %v9905_v28 = vld [vmem:[%s13132_s5 + $0x2d0] ss:$8 sps:$4 sm:$0xff]  }
 0x1ee   : > { %9299 = vmatpush3.bf16.msra.mxu1 %v9832_v46  ;;  %v9913_v46 = vld [vmem:[%s13132_s5 + $0x2c4] ss:$8 sps:$4 sm:$0xff]  }
 0x1ef   : > { %9300 = vmatprep.subr.bf16.mxu1 %v9834_v45  ;;  %v427_v45 = vld [vmem:[#allocation3] sm:$0x55] }
 0x1f0   : > { %9327 = vmatpush3.bf16.msra.mxu0 %v9835_v63  ;;  %v9908_v63 = vld [vmem:[%s13132_s5 + $0x3d0] ss:$8 sps:$4 sm:$0xff]  }
 0x1f1   : > { %9328 = vmatprep.subr.bf16.mxu0 %v9837_v21  ;;  %v9916_v21 = vld [vmem:[%s13132_s5 + $0x3c4] ss:$8 sps:$4 sm:$0xff]  }
 0x1f2   : > { %9301 = vmatpush3.bf16.msra.mxu1 %v9836_v56  ;;  %v9911_v56 = vld [vmem:[%s13132_s5 + $0x2c0] ss:$8 sps:$4 sm:$0xff]  }
 0x1f3   : > { %9302 = vmatprep.subr.bf16.mxu1 %v9838_v33  ;;  %v428_v33 = vsel %vm11103_vm11, 0, %v427_v45 }
 0x1f4   : > { %9329 = vmatpush3.bf16.msra.mxu0 %v9839_v50  ;;  %v9919_v50 = vld [vmem:[%s13132_s5 + $0x2b4] ss:$8 sps:$4 sm:$0xff]   ;;  %429 = vst [vmem:[#allocation3] sm:$0x55] %v428_v33 }
 0x1f5   : > { %3430 = vmatprep.subr.bf16.mxu0 %v9850_v58  ;;  %v9934_v58 = vld [vmem:[%s13132_s5 + $0x394] ss:$8 sps:$4 sm:$0xff]  }
 0x1f6   : > { %9303 = vmatpush3.bf16.msra.mxu1 %v9840_v51  ;;  %v9914_v51 = vld [vmem:[%s13132_s5 + $0x3c0] ss:$8 sps:$4 sm:$0xff]  }
 0x1f7   : > { %2546 = vmatmul.mubr.bf16.vlgmr.msra.gmra.mxu0 %v2413_v60  ;;  %9304 = vmatprep.subr.bf16.mxu1 %v9841_v59  ;;  %v9922_v59 = vld [vmem:[%s13132_s5 + $0x3b4] ss:$8 sps:$4 sm:$0xff]  }
 0x1f8   : > { %3431 = vmatpush1.bf16.msra.mxu0 %v9848_v35  ;;  %v433_v60 = vld [vmem:[#allocation3 + $0x10] sm:$0x55]  ;;  %v9926_v35 = vld [vmem:[%s13132_s5 + $0x3a0] ss:$8 sps:$4 sm:$0xff]  }
 0x1f9   : > { %3432 = vmatprep.subr.bf16.mxu0 %v9856_v2  ;;  %v9940_v2 = vld [vmem:[%s13132_s5 + $0x384] ss:$8 sps:$4 sm:$0xff]  }
 0x1fa   : > { %9305 = vmatpush3.bf16.msra.mxu1 %v9842_v17  ;;  %v9917_v17 = vld [vmem:[%s13132_s5 + $0x2b0] ss:$8 sps:$4 sm:$0xff]  }
 0x1fb   : > { %9306 = vmatprep.subr.bf16.mxu1 %v9843_v8  ;;  %v434_v8 = vsel %vm11103_vm11, 0, %v433_v60  ;;  %vm2943_vm11 = vsmask.f32 1284 }
 0x1fc   : > { %3433 = vmatpush1.bf16.msra.mxu0 %v9854_v48  ;;  %435 = vst [vmem:[#allocation3 + $0x10] sm:$0x55] %v434_v8  ;;  %v9932_v48 = vld [vmem:[%s13132_s5 + $0x390] ss:$8 sps:$4 sm:$0xff]   ;;  %vm11508_vm6 = vmor %vm13181_vm0, %vm2943_vm11 }
 0x1fd   : > { %3434 = vmatprep.subr.bf16.mxu0 %v9862_v36  ;;  %v9938_v36 = vld [vmem:[%s13132_s5 + $0x380] ss:$8 sps:$4 sm:$0xff]   ;;  %vm13189_vm11 = vmmov %vm13179_vm8 }
 0x1fe   : > { %9307 = vmatpush3.bf16.msra.mxu1 %v9844_v61  ;;  %v9925_v61 = vld [vmem:[%s13132_s5 + $0x2a4] ss:$8 sps:$4 sm:$0xff]  }
 0x1ff   : > { %3389 = vmatprep.subr.bf16.mxu1 %v9847_v37  ;;  %v9931_v37 = vld [vmem:[%s13132_s5 + $0x294] ss:$8 sps:$4 sm:$0xff]  }
 0x200   : > { %3435 = vmatpush1.bf16.msra.mxu0 %v9860_v57  ;;  %v9946_v57 = vld [vmem:[%s13132_s5 + $0x174] ss:$8 sps:$4 sm:$0xff]  }
 0x201   : > { %2258 = vmatmul.mubr.bf16.vlgmr.msra.gmra.mxu1 %v2125_v34  ;;  %3436 = vmatprep.subr.bf16.mxu0 %v9868_v10  ;;  %v9920_v34 = vld [vmem:[%s13132_s5 + $0x3b0] ss:$8 sps:$4 sm:$0xff]  }
 0x202   : > { %3390 = vmatpush1.bf16.msra.mxu1 %v9845_v62  ;;  %v9928_v62 = vld [vmem:[%s13132_s5 + $0x3a4] ss:$8 sps:$4 sm:$0xff]  }
 0x203   : > { %3391 = vmatprep.subr.bf16.mxu1 %v9853_v1  ;;  %v9937_v1 = vld [vmem:[%s13132_s5 + $0x284] ss:$8 sps:$4 sm:$0xff]  }
 0x204   : > { %3437 = vmatpush1.bf16.msra.mxu0 %v9866_v18 }
 0x205   : > { %3438 = vmatprep.subr.bf16.mxu0 %v9874_v54 }
 0x206   : > { %3392 = vmatpush1.bf16.msra.mxu1 %v9851_v40  ;;  %v9929_v40 = vld [vmem:[%s13132_s5 + $0x290] ss:$8 sps:$4 sm:$0xff]  }
 0x207   : > { %3393 = vmatprep.subr.bf16.mxu1 %v9859_v47  ;;  %v9935_v47 = vld [vmem:[%s13132_s5 + $0x280] ss:$8 sps:$4 sm:$0xff]  }
 0x208   : > { %3439 = vmatpush1.bf16.msra.mxu0 %v9872_v7 }
 0x209   : > { %3440 = vmatprep.subr.bf16.mxu0 %v9880_v13 }
 0x20a   : > { %3394 = vmatpush1.bf16.msra.mxu1 %v9857_v25  ;;  %v9943_v25 = vld [vmem:[%s13132_s5 + $0x74] ss:$8 sps:$4 sm:$0xff]  }
 0x20b   : > { %3395 = vmatprep.subr.bf16.mxu1 %v9865_v39 }
 0x20c   : > { %3441 = vmatpush1.bf16.msra.mxu0 %v9878_v30 }
 0x20d   : > { %3442 = vmatprep.subr.bf16.mxu0 %v9886_v6 }
 0x20e   : > { %3396 = vmatpush1.bf16.msra.mxu1 %v9863_v3 }
 0x20f   : > { %3397 = vmatprep.subr.bf16.mxu1 %v9871_v27 }
 0x210   : > { %3443 = vmatpush1.bf16.msra.mxu0 %v9884_v26 }
 0x211   : > { %3444 = vmatprep.subr.bf16.mxu0 %v9892_v31 }
 0x212   : > { %3398 = vmatpush1.bf16.msra.mxu1 %v9869_v23 }
 0x213   : > { %3399 = vmatprep.subr.bf16.mxu1 %v9877_v4 }
 0x214   : > { %3445 = vmatpush1.bf16.msra.mxu0 %v9890_v53 }
 0x215   : > { %3446 = vmatprep.subr.bf16.mxu0 %v9898_v0 }
 0x216   : > { %3400 = vmatpush1.bf16.msra.mxu1 %v9875_v24 }
 0x217   : > { %3401 = vmatprep.subr.bf16.mxu1 %v9883_v9 }
 0x218   : > { %3447 = vmatpush2.bf16.msra.mxu0 %v9896_v16 }
 0x219   : > { %3448 = vmatprep.subr.bf16.mxu0 %v9904_v42 }
 0x21a   : > { %3402 = vmatpush1.bf16.msra.mxu1 %v9881_v5 }
 0x21b   : > { %3403 = vmatprep.subr.bf16.mxu1 %v9889_v49 }
 0x21c   : > { %3449 = vmatpush2.bf16.msra.mxu0 %v9902_v11 }
 0x21d   : > { %3450 = vmatprep.subr.bf16.mxu0 %v9910_v44 }
 0x21e   : > { %3404 = vmatpush1.bf16.msra.mxu1 %v9887_v15 }
 0x21f   : > { %3405 = vmatprep.subr.bf16.mxu1 %v9895_v38 }
 0x220   : > { %3451 = vmatpush2.bf16.msra.mxu0 %v9908_v63 }
 0x221   : > { %3452 = vmatprep.subr.bf16.mxu0 %v9916_v21 }
 0x222   : > { %3406 = vmatpush2.bf16.msra.mxu1 %v9893_v55 }
 0x223   : > { %3407 = vmatprep.subr.bf16.mxu1 %v9901_v32 }
 0x224   : > { %3453 = vmatpush2.bf16.msra.mxu0 %v9914_v51 }
 0x225   : > { %3454 = vmatprep.subr.bf16.mxu0 %v9922_v59 }
 0x226   : > { %3408 = vmatpush2.bf16.msra.mxu1 %v9899_v41 }
 0x227   : > { %3409 = vmatprep.subr.bf16.mxu1 %v9907_v12  ;;  %v8125_v12 = vld [vmem:[%s13131_s4] ss:$0 sm:$0xff] }
 0x228   : > { %3455 = vmatpush2.bf16.msra.mxu0 %v9920_v34 }
 0x229   : > { %3456 = vmatprep.subr.bf16.mxu0 %v9928_v62 }
 0x22a   : > { %3410 = vmatpush2.bf16.msra.mxu1 %v9905_v28 }
 0x22b   : > { %3411 = vmatprep.subr.bf16.mxu1 %v9913_v46 }
 0x22c   : > { %3457 = vmatpush2.bf16.msra.mxu0 %v9926_v35 }
 0x22d   : > { %3458 = vmatprep.subr.bf16.mxu0 %v9934_v58 }
 0x22e   : > { %3412 = vmatpush2.bf16.msra.mxu1 %v9911_v56 }
 0x22f   : > { %3413 = vmatprep.subr.bf16.mxu1 %v9919_v50 }
 0x230   : > { %3459 = vmatpush2.bf16.msra.mxu0 %v9932_v48 }
 0x231   : > { %3460 = vmatprep.subr.bf16.mxu0 %v9940_v2 }
 0x232   : > { %3414 = vmatpush2.bf16.msra.mxu1 %v9917_v17 }
 0x233   : > { %3415 = vmatprep.subr.bf16.mxu1 %v9925_v61 }
 0x234   : > { %3461 = vmatpush2.bf16.msra.mxu0 %v9938_v36 }
 0x235   : > { %3861 = vmatprep.subr.bf16.mxu0 %v9946_v57 }
 0x236   : > { %3416 = vmatpush2.bf16.msra.mxu1 %v9923_v52 }
 0x237   : > { %3417 = vmatprep.subr.bf16.mxu1 %v9931_v37 }
 0x23a   : > { %3418 = vmatpush2.bf16.msra.mxu1 %v9929_v40 }
 0x23b   : > { %3419 = vmatprep.subr.bf16.mxu1 %v9937_v1 }
 0x23e   : > { %3420 = vmatpush2.bf16.msra.mxu1 %v9935_v47 }
 0x23f   : > { %3820 = vmatprep.subr.bf16.mxu1 %v9943_v25 }
 0x297   : > { %v9286_v39 = vpop.f32.mrf.mxu0 }
 0x299   : > { %v9287_v3 = vpop.f32.mrf.mxu0 }
 0x29a   : > { %v9288_v9 = vadd.f32 %v9287_v3, %v9286_v39 }
 0x29b   : > { %v9289_v18 = vpop.f32.mrf.mxu0 }
 0x29d   : > { %v9290_v23 = vpop.f32.mrf.mxu0 }
 0x29e   : > { %v9291_v53 = vadd.f32 %v9290_v23, %v9289_v18 }
 0x2a1   : > { %v9264_v10 = vpop.f32.mrf.mxu1 }
 0x2a3   : > { %v9265_v27 = vpop.f32.mrf.mxu1 }
 0x2a4   : > { %v9266_v13 = vadd.f32 %v9265_v27, %v9264_v10 }
 0x2a5   : > { %v9267_v54 = vpop.f32.mrf.mxu1 }
 0x2a6   : > { %v2034_v26 = vadd.f32 %v9288_v9, %v9266_v13 }
 0x2a7   : > { %v9268_v4 = vpop.f32.mrf.mxu1 }
 0x2a8   : > { %v9269_v49 = vadd.f32 %v9268_v4, %v9267_v54 }
 0x2aa   : > { %v2037_v32 = vadd.f32 %v9291_v53, %v9269_v49 }
 0x2b7   : > { %v9330_v7 = vpop.f32.mrf.mxu0 }
 0x2b9   : > { %v9331_v24 = vpop.f32.mrf.mxu0 }
 0x2ba   : > { %v9332_v38 = vadd.f32 %v9331_v24, %v9330_v7 }
 0x2bb   : > { %v9333_v5 = vpop.f32.mrf.mxu0 }
 0x2bd   : > { %v9334_v16 = vpop.f32.mrf.mxu0 }
 0x2be   : > { %v9335_v11 = vadd.f32 %v9334_v16, %v9333_v5  ;;  %v9947_v16 = vld [vmem:[%s13132_s5 + $0x60] ss:$8 sps:$4 sm:$0xff]  }
 0x2c1   : > { %v9308_v30 = vpop.f32.mrf.mxu1 }
 0x2c3   : > { %v9309_v6 = vpop.f32.mrf.mxu1 }
 0x2c4   : > { %v9310_v15 = vadd.f32 %v9309_v6, %v9308_v30 }
 0x2c5   : > { %v9311_v31 = vpop.f32.mrf.mxu1 }
 0x2c6   : > { %v2266_v55 = vadd.f32 %v9310_v15, %v2034_v26 }
 0x2c7   : > { %v9312_v0 = vpop.f32.mrf.mxu1 }
 0x2c8   : > { %v2554_v41 = vadd.f32 %v9332_v38, %v2266_v55  ;;  %v9313_v42 = vadd.f32 %v9312_v0, %v9311_v31 }
 0x2ca   : > { %v2267_v44 = vadd.f32 %v9313_v42, %v2037_v32  ;;  %v2562_v28 = vadd.f32 %v8125_v12, %v2554_v41  ;;  %v2726_v32 = vld [vmem:[#allocation3 + $0xc] sm:$0x3] }
 0x2cc   : > { %v2555_v46 = vadd.f32 %v9335_v11, %v2267_v44  ;;  %v2564_v63 = vmax.f32 %v2562_v28, 0.0 }
 0x2ce   : > { %v2563_v45 = vadd.f32 %v8125_v12, %v2555_v46  ;;  %v2723_v46 = vld [vmem:[#allocation3 + $0x4] sm:$0x3] }
 0x2d0   : > { %v2565_v21 = vmax.f32 %v2563_v45, 0.0 }
 0x2d2   : > { %v2566_v56 = vpack.c.bf16 %v2565_v21, %v2564_v63  ;;  %v8126_v33 = vpack.c.bf16 %v2565_v21, %v2565_v21 }
 0x2d4   : > { %v2575_v50 = vrot.slane %v2566_v56, %v10744_v29  ;;  %v2582_v51 = vrot.slane %v8126_v33, %v10744_v29 }
 0x2d6   : > { %v2583_v59 = vcombine.high %v2575_v50, %v2575_v50  ;;  %v2584_v60 = vcombine.high %v2582_v51, %v2582_v51  ;;  %v2591_v17 = vrot.slane %v2575_v50, %v10744_v29  ;;  %v2598_v8 = vrot.slane %v2582_v51, %v10744_v29 }
 0x2d8   : > { %v2605_v61 = vrot.slane %v2583_v59, %v10744_v29  ;;  %v2612_v34 = vrot.slane %v2584_v60, %v10744_v29  ;;  %v2613_v62 = vcombine.high %v2591_v17, %v2591_v17  ;;  %v2614_v52 = vcombine.high %v2598_v8, %v2598_v8 }
 0x2d9   : > { %v2623_v37 = vrot.slane %v2591_v17, %v10751_v43  ;;  %v2637_v35 = vrot.slane %v2598_v8, %v10751_v43  ;;  %v2834_v17 = vld [vmem:[#allocation3 + $0x8] sm:$0x3] }
 0x2da   : > { %v2615_v58 = vcombine.high %v2605_v61, %v2605_v61  ;;  %v2616_v40 = vcombine.high %v2612_v34, %v2612_v34  ;;  %v2630_v1 = vrot.slane %v2605_v61, %v10751_v43  ;;  %v2644_v48 = vrot.slane %v2612_v34, %v10751_v43  ;;  %v2837_v34 = vld [vmem:[#allocation3 + $0x10] sm:$0x3] }
 0x2db   : > { %v2651_v2 = vrot.slane %v2623_v37, %v11233_v22  ;;  %v2665_v47 = vrot.slane %v2637_v35, %v11233_v22  ;;  %v2735_v25 = vrot.slane %v2613_v62, %v10751_v43  ;;  %v2749_v36 = vrot.slane %v2614_v52, %v10751_v43 }
 0x2dc   : > { %v2658_v57 = vrot.slane %v2630_v1, %v11233_v22  ;;  %v2672_v39 = vrot.slane %v2644_v48, %v11233_v22  ;;  %v2742_v3 = vrot.slane %v2615_v58, %v10751_v43  ;;  %v2756_v10 = vrot.slane %v2616_v40, %v10751_v43 }
 0x2dd   : > { %v2673_v7 = vunpack.c.l.b16 %v2651_v2  ;;  %v2675_v4 = vunpack.c.l.b16 %v2665_v47  ;;  %v2763_v24 = vrot.slane %v2735_v25, %v11233_v22  ;;  %v2777_v13 = vrot.slane %v2749_v36, %v11233_v22  ;;  %v10000_v47 = vld [vmem:[%s13132_s5 + $0x1e4] ss:$8 sps:$4 sm:$0xff]  }
 0x2de   : > { %v2674_v18 = vunpack.c.l.b16 %v2658_v57  ;;  %v2676_v27 = vunpack.c.l.b16 %v2672_v39  ;;  %v2770_v23 = vrot.slane %v2742_v3, %v11233_v22  ;;  %v2784_v54 = vrot.slane %v2756_v10, %v11233_v22 }
 0x2df   : > { %v2785_v41 = vunpack.c.l.b16 %v2763_v24  ;;  %v2787_v42 = vunpack.c.l.b16 %v2777_v13 }
 0x2e0   : > { %v2677_v30 = vrot.slane %v2674_v18, 7  ;;  %v2679_v9 = vrot.slane %v2676_v27, 7  ;;  %v2786_v5 = vunpack.c.l.b16 %v2770_v23  ;;  %v2788_v6 = vunpack.c.l.b16 %v2784_v54 }
 0x2e2   : > { %v2678_v43 = vsel %vm13177_vm12, %v2677_v30, %v2673_v7  ;;  %v2680_v26 = vsel %vm13178_vm2, %v2679_v9, %v2675_v4  ;;  %v2701_v49 = vsel %vm13179_vm8, %v2677_v30, %v2673_v7  ;;  %v2702_v15 = vsel %vm13180_vm13, %v2679_v9, %v2675_v4  ;;  %vm2946_vm12 = vmor %vm11508_vm6, %vm2945_vm3 }
 0x2e3   : > { %v2681_v31 = vpack.c.b16 %v2678_v43, %v2678_v43  ;;  %v2682_v53 = vpack.c.b16 %v2680_v26, %v2680_v26  ;;  %v2703_v38 = vpack.c.b16 %v2701_v49, %v2701_v49  ;;  %v2704_v55 = vpack.c.b16 %v2702_v15, %v2702_v15  ;;  %vm2948_vm2 = vmor %vm2946_vm12, %vm2947_vm9  ;;  %v9941_v26 = vld [vmem:[%s13132_s5 + $0x70] ss:$8 sps:$4 sm:$0xff]  }
 0x2e4   : > { %v2789_v12 = vrot.slane %v2786_v5, 7  ;;  %v2791_v11 = vrot.slane %v2788_v6, 7  ;;  %vm2949_vm8 = vsmask.f32 4368  ;;  %vm2951_vm13 = vsmask.f32 5396 }
 0x2e5   : > { %8128 = vst.sshfl [vmem:[#allocation3 + $0xe] sm:$0x1 pattern:$0x76325410] %v2682_v53  ;;  %v2711_v44 = vrot.slane %v2703_v38, %v11233_v22  ;;  %v2718_v28 = vrot.slane %v2704_v55, %v11233_v22  ;;  %vm2950_vm3 = vmor %vm2948_vm2, %vm2949_vm8  ;;  %vm2953_vm6 = vsmask.f32 6424 }
 0x2e6   : > { %8127 = vst.sshfl [vmem:[#allocation3 + $0x6] sm:$0x1 pattern:$0x76325410] %v2681_v31  ;;  %v2790_v45 = vsel %vm13187_vm15, %v2789_v12, %v2785_v41  ;;  %v2792_v63 = vsel %vm13188_vm5, %v2791_v11, %v2787_v42  ;;  %v2814_v21 = vsel %vm13189_vm11, %v2789_v12, %v2785_v41  ;;  %v2815_v56 = vsel %vm13190_vm1, %v2791_v11, %v2787_v42  ;;  %vm2952_vm0 = vmor %vm2950_vm3, %vm2951_vm13  ;;  %v9944_v31 = vld [vmem:[%s13132_s5 + $0x170] ss:$8 sps:$4 sm:$0xff]  }
 0x2e7   : > { %v2727_v33 = vsel %vm11513_vm4, %v2718_v28, %v2726_v32  ;;  %v2793_v50 = vpack.c.b16 %v2790_v45, %v2790_v45  ;;  %v2794_v51 = vpack.c.b16 %v2792_v63, %v2792_v63  ;;  %v2816_v59 = vpack.c.b16 %v2814_v21, %v2814_v21  ;;  %vm2954_vm7 = vmor %vm2952_vm0, %vm2953_vm6  ;;  %v9949_v53 = vld [vmem:[%s13132_s5 + $0x64] ss:$8 sps:$4 sm:$0xff]   ;;  %v9955_v32 = vld [vmem:[%s13132_s5 + $0x54] ss:$8 sps:$4 sm:$0xff]  }
 0x2e8   : > { %2728 = vst [vmem:[#allocation3 + $0xc] sm:$0x3] %v2727_v33  ;;  %v2817_v60 = vpack.c.b16 %v2815_v56, %v2815_v56  ;;  %v2724_v8 = vsel %vm11513_vm4, %v2711_v44, %v2723_v46  ;;  %vm2955_vm9 = vsmask.f32 7452  ;;  %v9952_v55 = vld [vmem:[%s13132_s5 + $0x164] ss:$8 sps:$4 sm:$0xff]  }
 0x2e9   : > { %8129 = vst.sshfl [vmem:[#allocation3 + $0xa] sm:$0x1 pattern:$0x76325410] %v2793_v50  ;;  %v2824_v61 = vrot.slane %v2816_v59, %v11233_v22  ;;  %2725 = vst [vmem:[#allocation3 + $0x4] sm:$0x3] %v2724_v8 }
 0x2ea   : > { %8130 = vst.sshfl [vmem:[#allocation3 + $0x12] sm:$0x1 pattern:$0x76325410] %v2794_v51  ;;  %v2831_v62 = vrot.slane %v2817_v60, %v11233_v22  ;;  %vm11539_vm15 = vmor %vm2954_vm7, %vm2955_vm9  ;;  %v9950_v41 = vld [vmem:[%s13132_s5 + $0x160] ss:$8 sps:$4 sm:$0xff]  }
 0x2eb   : > { %v2835_v52 = vsel %vm11513_vm4, %v2824_v61, %v2834_v17  ;;  %v9958_v42 = vld [vmem:[%s13132_s5 + $0x154] ss:$8 sps:$4 sm:$0xff]   ;;  %v9953_v12 = vld [vmem:[%s13132_s5 + $0x50] ss:$8 sps:$4 sm:$0xff]   ;;  %v9961_v11 = vld [vmem:[%s13132_s5 + $0x44] ss:$8 sps:$4 sm:$0xff]  }
 0x2ec   : > { %2836 = vst [vmem:[#allocation3 + $0x8] sm:$0x3] %v2835_v52  ;;  %v2838_v37 = vsel %vm11513_vm4, %v2831_v62, %v2837_v34  ;;  %v9956_v44 = vld [vmem:[%s13132_s5 + $0x150] ss:$8 sps:$4 sm:$0xff]   ;;  %v9964_v28 = vld [vmem:[%s13132_s5 + $0x144] ss:$8 sps:$4 sm:$0xff]   ;;  %vm459_vm4 = vmor %vm11162_vm14, %vm10968_vm10 }
 0x2ed   : > { %2839 = vst [vmem:[#allocation3 + $0x10] sm:$0x3] %v2838_v37  ;;  %v9959_v46 = vld [vmem:[%s13132_s5 + $0x40] ss:$8 sps:$4 sm:$0xff]   ;;  %v9967_v45 = vld [vmem:[%s13132_s5 + $0x34] ss:$8 sps:$4 sm:$0xff]  }
 0x2ee   : > { %v9962_v63 = vld [vmem:[%s13132_s5 + $0x140] ss:$8 sps:$4 sm:$0xff]   ;;  %v9970_v21 = vld [vmem:[%s13132_s5 + $0x134] ss:$8 sps:$4 sm:$0xff]   ;;  %v9965_v56 = vld [vmem:[%s13132_s5 + $0x30] ss:$8 sps:$4 sm:$0xff]  }
 0x2ef   : > { %v9973_v33 = vld [vmem:[%s13132_s5 + $0x24] ss:$8 sps:$4 sm:$0xff]   ;;  %v9968_v50 = vld [vmem:[%s13132_s5 + $0x130] ss:$8 sps:$4 sm:$0xff]   ;;  %v9971_v59 = vld [vmem:[%s13132_s5 + $0x20] ss:$8 sps:$4 sm:$0xff]  }
 0x2f0   : > { %v8133_v35 = vld.sshfl [vmem:[#allocation3] sm:$0xff pattern:$0x75316420]  ;;  %v9979_v60 = vld [vmem:[%s13132_s5 + $0x14] ss:$8 sps:$4 sm:$0xff]   ;;  %vm13193_vm1 = vcmask 1040384  }
 0x2f1   : > { %v2934_v58 = vcombine.high %v8133_v35, %v8133_v35  ;;  %v8131_v40 = vld.sshfl [vmem:[#allocation3] sm:$0xf pattern:$0x75316420]  ;;  %v2958_v36 = vshrl.u32 %v8133_v35, 16  ;;  %vm13196_vm2 = vcmask 1041409  }
 0x2f2   : > { %v9976_v51 = vld [vmem:[%s13132_s5 + $0x124] ss:$8 sps:$4 sm:$0xff]   ;;  %v9974_v17 = vld [vmem:[%s13132_s5 + $0x120] ss:$8 sps:$4 sm:$0xff]   ;;  %v9982_v8 = vld [vmem:[%s13132_s5 + $0x114] ss:$8 sps:$4 sm:$0xff]  }
 0x2f3   : > { %v8134_v1 = vld.sshfl [vmem:[#allocation3 + $0x8] sm:$0xff pattern:$0x75316420]  ;;  %v2963_v22 = vshll.u32 %v2934_v58, 16  ;;  %v9985_v34 = vld [vmem:[%s13132_s5 + $0x4] ss:$8 sps:$4 sm:$0xff]  }
 0x2f4   : > { %v2942_v48 = vcombine.high %v8134_v1, %v8134_v1  ;;  %v11537_v2 = vld.sshfl [vmem:[#allocation3 + $0x8] sm:$0xf pattern:$0x75316420]  ;;  %v2967_v57 = vshrl.u32 %v8134_v1, 16 }
 0x2f5   : > { %v3471_v25 = vcombine.low %v8131_v40, %v11537_v2  ;;  %v2965_v3 = vsel %vm11539_vm15, %v2958_v36, %v2963_v22  ;;  %v8460_v27 = vld.sshfl [vmem:[#allocation3 + $0x10] sm:$0xff pattern:$0x75316420]  ;;  %v9988_v52 = vld [vmem:[%s13132_s5 + $0x104] ss:$8 sps:$4 sm:$0xff]  }
 0x2f6   : > { %v2972_v39 = vshll.u32 %v2942_v48, 16  ;;  %v4437_v54 = vcombine.high %v8460_v27, %v8460_v27  ;;  %v4448_v4 = vshrl.u32 %v8460_v27, 16  ;;  %v9977_v61 = vld [vmem:[%s13132_s5 + $0x10] ss:$8 sps:$4 sm:$0xff]   ;;  %v9983_v37 = vld [vmem:[%s13132_s5] ss:$8 sps:$4 sm:$0xff]  }
 0x2f7   : > { %v11551_v18 = vrot.slane %v3471_v25, %v10744_v29  ;;  %v9980_v62 = vld [vmem:[%s13132_s5 + $0x110] ss:$8 sps:$4 sm:$0xff]   ;;  %v9991_v35 = vld [vmem:[%s13132_s5 + $0xf4] ss:$8 sps:$4 sm:$0xff]   ;;  %v9986_v58 = vld [vmem:[%s13132_s5 + $0x100] ss:$8 sps:$4 sm:$0xff]  }
 0x2f8   : > { %v11548_v10 = vsel %vm11539_vm15, %v2967_v57, %v2972_v39  ;;  %v4453_v24 = vshll.u32 %v4437_v54, 16  ;;  %v9994_v40 = vld [vmem:[%s13132_s5 + $0x1f4] ss:$8 sps:$4 sm:$0xff]   ;;  %v9989_v1 = vld [vmem:[%s13132_s5 + $0xf0] ss:$8 sps:$4 sm:$0xff]  }
 0x2f9   : > { %v3040_v23 = vcombine.low %v2965_v3, %v11548_v10  ;;  %v3479_v13 = vcombine.high %v11551_v18, %v11551_v18  ;;  %v9997_v48 = vld [vmem:[%s13132_s5 + $0xe4] ss:$8 sps:$4 sm:$0xff]   ;;  %v9992_v22 = vld [vmem:[%s13132_s5 + $0x1f0] ss:$8 sps:$4 sm:$0xff]   ;;  %v9995_v25 = vld [vmem:[%s13132_s5 + $0xe0] ss:$8 sps:$4 sm:$0xff]  }
 0x2fa   : > { %v11559_v9 = vsel %vm11539_vm15, %v4448_v4, %v4453_v24  ;;  %v10003_v36 = vld [vmem:[%s13132_s5 + $0xd4] ss:$8 sps:$4 sm:$0xff]   ;;  %v9998_v57 = vld [vmem:[%s13132_s5 + $0x1e0] ss:$8 sps:$4 sm:$0xff]   ;;  %v10001_v3 = vld [vmem:[%s13132_s5 + $0xd0] ss:$8 sps:$4 sm:$0xff]  }
 0x2fb   : > { %v3047_v7 = vrot.slane %v3040_v23, %v10744_v29  ;;  %v4521_v6 = vcombine.low %v11548_v10, %v11559_v9  ;;  %v3493_v49 = vrot.slane %v3479_v13, %v10744_v29  ;;  %v10006_v39 = vld [vmem:[%s13132_s5 + $0x1d4] ss:$8 sps:$4 sm:$0xff]   ;;  %v10009_v27 = vld [vmem:[%s13132_s5 + $0xc4] ss:$8 sps:$4 sm:$0xff]   ;;  %v10004_v23 = vld [vmem:[%s13132_s5 + $0x1d0] ss:$8 sps:$4 sm:$0xff]  }
 0x2fc   : > { %v10012_v54 = vld [vmem:[%s13132_s5 + $0x1c4] ss:$8 sps:$4 sm:$0xff]   ;;  %v10015_v4 = vld [vmem:[%s13132_s5 + $0xb4] ss:$8 sps:$4 sm:$0xff]   ;;  %v10010_v24 = vld [vmem:[%s13132_s5 + $0x1c0] ss:$8 sps:$4 sm:$0xff]  }
 0x2fd   : > { %v3048_v30 = vcombine.high %v3047_v7, %v3047_v7  ;;  %v3055_v5 = vrot.slane %v3047_v7, %v10744_v29  ;;  %v3495_v0 = vcombine.high %v3493_v49, %v3493_v49  ;;  %v10007_v7 = vld [vmem:[%s13132_s5 + $0xc0] ss:$8 sps:$4 sm:$0xff]   ;;  %v10018_v13 = vld [vmem:[%s13132_s5 + $0x1b4] ss:$8 sps:$4 sm:$0xff]   ;;  %vm472_vm5 = vsmask.f32 7938 }
 0x2fe   : > { %v10127_v10 = vld [vmem:[%s13132_s5 + $0x480] ss:$8 sps:$4 sm:$0xff]   ;;  %vm474_vm11 = vsmask.f32 7942  ;;  %vm12176_vm12 = vmand %vm13193_vm1, %vm472_vm5 }
 0x2ff   : > { %v3062_v43 = vrot.slane %v3048_v30, %v10744_v29  ;;  %v3063_v38 = vcombine.high %v3055_v5, %v3055_v5  ;;  %v10013_v30 = vld [vmem:[%s13132_s5 + $0xb0] ss:$8 sps:$4 sm:$0xff]   ;;  %vm12184_vm8 = vmand %vm13196_vm2, %vm474_vm11 }
 0x300   : > { %vm476_vm3 = vmor %vm12184_vm8, %vm12176_vm12 }
 0x301   : > { %3421 = vmatprep.mubr.bf16.mxu1 %v3062_v43  ;;  %v3064_v15 = vcombine.high %v3062_v43, %v3062_v43  ;;  %v8330_v43 = vld.sshfl [vmem:[#allocation3 + $0x10] sm:$0xf pattern:$0x75316420] }
 0x302   : > { %3422 = vmatmul.mubr.bf16.vlgmr.msra.gmra.mxu1 %v3055_v5  ;;  %v10021_v5 = vld [vmem:[%s13132_s5 + $0xa4] ss:$8 sps:$4 sm:$0xff]  }
 0x303   : > { %3821 = vmatpush1.bf16.msra.mxu1 %v9941_v26  ;;  %3462 = vmatprep.mubr.bf16.mxu0 %v3064_v15  ;;  %v10016_v26 = vld [vmem:[%s13132_s5 + $0x1b0] ss:$8 sps:$4 sm:$0xff]   ;;  %v10019_v15 = vld [vmem:[%s13132_s5 + $0xa0] ss:$8 sps:$4 sm:$0xff]  }
 0x304   : > { %3852 = vmatprep.mubr.bf16.mxu1 %v3493_v49  ;;  %3463 = vmatmul.mubr.bf16.vlgmr.msra.gmra.mxu0 %v3063_v38  ;;  %v10024_v49 = vld [vmem:[%s13132_s5 + $0x1a4] ss:$8 sps:$4 sm:$0xff]   ;;  %v10022_v38 = vld [vmem:[%s13132_s5 + $0x1a0] ss:$8 sps:$4 sm:$0xff]  }
 0x305   : > { %3862 = vmatpush1.bf16.msra.mxu0 %v9944_v31  ;;  %3822 = vmatprep.subr.bf16.mxu1 %v9949_v53  ;;  %v3985_v31 = vcombine.low %v11537_v2, %v8330_v43  ;;  %v10027_v53 = vld [vmem:[%s13132_s5 + $0x94] ss:$8 sps:$4 sm:$0xff]   ;;  %v10025_v2 = vld [vmem:[%s13132_s5 + $0x90] ss:$8 sps:$4 sm:$0xff]   ;;  %v10096_v43 = vld [vmem:[%s13132_s5 + $0x5e4] ss:$8 sps:$4 sm:$0xff]  }
 0x306   : > { %3893 = vmatprep.mubr.bf16.mxu0 %v3495_v0  ;;  %3863 = vmatprep.subr.bf16.mxu0 %v9952_v55  ;;  %v10030_v55 = vld [vmem:[%s13132_s5 + $0x194] ss:$8 sps:$4 sm:$0xff]   ;;  %v10033_v0 = vld [vmem:[%s13132_s5 + $0x84] ss:$8 sps:$4 sm:$0xff]  }
 0x307   : > { %3823 = vmatpush1.bf16.msra.mxu1 %v9947_v16  ;;  %v11739_v16 = vrot.slane %v3985_v31, %v10744_v29  ;;  %v10102_v31 = vld [vmem:[%s13132_s5 + $0x5d4] ss:$8 sps:$4 sm:$0xff]  }
 0x308   : > { %3824 = vmatprep.subr.bf16.mxu1 %v9955_v32  ;;  %v10028_v32 = vld [vmem:[%s13132_s5 + $0x190] ss:$8 sps:$4 sm:$0xff]  }
 0x309   : > { %3864 = vmatpush1.bf16.msra.mxu0 %v9950_v41  ;;  %v10036_v41 = vld [vmem:[%s13132_s5 + $0x184] ss:$8 sps:$4 sm:$0xff]  }
 0x30a   : > { %3865 = vmatprep.subr.bf16.mxu0 %v9958_v42  ;;  %v10031_v42 = vld [vmem:[%s13132_s5 + $0x80] ss:$8 sps:$4 sm:$0xff]  }
 0x30b   : > { %3825 = vmatpush1.bf16.msra.mxu1 %v9953_v12  ;;  %v3993_v12 = vcombine.high %v11739_v16, %v11739_v16 }
 0x30c   : > { %3826 = vmatprep.subr.bf16.mxu1 %v9961_v11  ;;  %v10039_v11 = vld [vmem:[%s13132_s5 + $0x474] ss:$8 sps:$4 sm:$0xff]  }
 0x30d   : > { %3866 = vmatpush1.bf16.msra.mxu0 %v9956_v44  ;;  %v10034_v44 = vld [vmem:[%s13132_s5 + $0x180] ss:$8 sps:$4 sm:$0xff]  }
 0x30e   : > { %3867 = vmatprep.subr.bf16.mxu0 %v9964_v28  ;;  %v3486_v28 = vrot.slane %v11551_v18, %v10744_v29  ;;  %v10040_v18 = vld [vmem:[%s13132_s5 + $0x570] ss:$8 sps:$4 sm:$0xff]  }
 0x30f   : > { %3827 = vmatpush1.bf16.msra.mxu1 %v9959_v46  ;;  %v10042_v46 = vld [vmem:[%s13132_s5 + $0x574] ss:$8 sps:$4 sm:$0xff]  }
 0x310   : > { %3828 = vmatprep.subr.bf16.mxu1 %v9967_v45  ;;  %v10037_v45 = vld [vmem:[%s13132_s5 + $0x470] ss:$8 sps:$4 sm:$0xff]  }
 0x311   : > { %3868 = vmatpush1.bf16.msra.mxu0 %v9962_v63  ;;  %v4007_v63 = vrot.slane %v3993_v12, %v10744_v29  ;;  %v10109_v12 = vld [vmem:[%s13132_s5 + $0x4b0] ss:$8 sps:$4 sm:$0xff]  }
 0x312   : > { %3869 = vmatprep.subr.bf16.mxu0 %v9970_v21  ;;  %v10045_v21 = vld [vmem:[%s13132_s5 + $0x464] ss:$8 sps:$4 sm:$0xff]  }
 0x313   : > { %3829 = vmatpush1.bf16.msra.mxu1 %v9965_v56  ;;  %v3494_v56 = vcombine.high %v3486_v28, %v3486_v28 }
 0x314   : > { %3830 = vmatprep.subr.bf16.mxu1 %v9973_v33  ;;  %v10048_v33 = vld [vmem:[%s13132_s5 + $0x564] ss:$8 sps:$4 sm:$0xff]  }
 0x315   : > { %3870 = vmatpush1.bf16.msra.mxu0 %v9968_v50  ;;  %v4009_v50 = vcombine.high %v4007_v63, %v4007_v63 }
 0x316   : > { %3871 = vmatprep.subr.bf16.mxu0 %v9976_v51  ;;  %v10043_v51 = vld [vmem:[%s13132_s5 + $0x460] ss:$8 sps:$4 sm:$0xff]  }
 0x317   : > { %3831 = vmatpush1.bf16.msra.mxu1 %v9971_v59  ;;  %v10051_v59 = vld [vmem:[%s13132_s5 + $0x454] ss:$8 sps:$4 sm:$0xff]  }
 0x318   : > { %3832 = vmatprep.subr.bf16.mxu1 %v9979_v60  ;;  %v10046_v60 = vld [vmem:[%s13132_s5 + $0x560] ss:$8 sps:$4 sm:$0xff]  }
 0x319   : > { %3872 = vmatpush1.bf16.msra.mxu0 %v9974_v17  ;;  %v10054_v17 = vld [vmem:[%s13132_s5 + $0x554] ss:$8 sps:$4 sm:$0xff]  }
 0x31a   : > { %3873 = vmatprep.subr.bf16.mxu0 %v9982_v8  ;;  %v10049_v8 = vld [vmem:[%s13132_s5 + $0x450] ss:$8 sps:$4 sm:$0xff]  }
 0x31b   : > { %3833 = vmatpush1.bf16.msra.mxu1 %v9977_v61  ;;  %v10057_v61 = vld [vmem:[%s13132_s5 + $0x444] ss:$8 sps:$4 sm:$0xff]  }
 0x31c   : > { %3834 = vmatprep.subr.bf16.mxu1 %v9985_v34  ;;  %v10052_v34 = vld [vmem:[%s13132_s5 + $0x550] ss:$8 sps:$4 sm:$0xff]  }
 0x31d   : > { %3874 = vmatpush1.bf16.msra.mxu0 %v9980_v62  ;;  %v10060_v62 = vld [vmem:[%s13132_s5 + $0x544] ss:$8 sps:$4 sm:$0xff]  }
 0x31e   : > { %3875 = vmatprep.subr.bf16.mxu0 %v9988_v52  ;;  %v10055_v52 = vld [vmem:[%s13132_s5 + $0x440] ss:$8 sps:$4 sm:$0xff]  }
 0x31f   : > { %3835 = vmatpush1.bf16.msra.mxu1 %v9983_v37  ;;  %v10063_v37 = vld [vmem:[%s13132_s5 + $0x434] ss:$8 sps:$4 sm:$0xff]  }
 0x320   : > { %3836 = vmatprep.subr.bf16.mxu1 %v9991_v35  ;;  %v10058_v35 = vld [vmem:[%s13132_s5 + $0x540] ss:$8 sps:$4 sm:$0xff]  }
 0x321   : > { %3876 = vmatpush1.bf16.msra.mxu0 %v9986_v58  ;;  %v10066_v58 = vld [vmem:[%s13132_s5 + $0x534] ss:$8 sps:$4 sm:$0xff]  }
 0x322   : > { %3877 = vmatprep.subr.bf16.mxu0 %v9994_v40  ;;  %v10061_v40 = vld [vmem:[%s13132_s5 + $0x430] ss:$8 sps:$4 sm:$0xff]  }
 0x323   : > { %3837 = vmatpush2.bf16.msra.mxu1 %v9989_v1  ;;  %v10069_v1 = vld [vmem:[%s13132_s5 + $0x424] ss:$8 sps:$4 sm:$0xff]  }
 0x324   : > { %3838 = vmatprep.subr.bf16.mxu1 %v9997_v48  ;;  %v10064_v48 = vld [vmem:[%s13132_s5 + $0x530] ss:$8 sps:$4 sm:$0xff]  }
 0x325   : > { %3878 = vmatpush2.bf16.msra.mxu0 %v9992_v22  ;;  %v10072_v22 = vld [vmem:[%s13132_s5 + $0x524] ss:$8 sps:$4 sm:$0xff]  }
 0x326   : > { %3879 = vmatprep.subr.bf16.mxu0 %v10000_v47  ;;  %v10067_v47 = vld [vmem:[%s13132_s5 + $0x420] ss:$8 sps:$4 sm:$0xff]  }
 0x327   : > { %3839 = vmatpush2.bf16.msra.mxu1 %v9995_v25  ;;  %v10075_v25 = vld [vmem:[%s13132_s5 + $0x414] ss:$8 sps:$4 sm:$0xff]  }
 0x328   : > { %3840 = vmatprep.subr.bf16.mxu1 %v10003_v36  ;;  %v10070_v36 = vld [vmem:[%s13132_s5 + $0x520] ss:$8 sps:$4 sm:$0xff]  }
 0x329   : > { %3880 = vmatpush2.bf16.msra.mxu0 %v9998_v57  ;;  %v10078_v57 = vld [vmem:[%s13132_s5 + $0x514] ss:$8 sps:$4 sm:$0xff]  }
 0x32a   : > { %3881 = vmatprep.subr.bf16.mxu0 %v10006_v39  ;;  %v10073_v39 = vld [vmem:[%s13132_s5 + $0x410] ss:$8 sps:$4 sm:$0xff]  }
 0x32b   : > { %3841 = vmatpush2.bf16.msra.mxu1 %v10001_v3  ;;  %v10081_v3 = vld [vmem:[%s13132_s5 + $0x404] ss:$8 sps:$4 sm:$0xff]  }
 0x32c   : > { %3842 = vmatprep.subr.bf16.mxu1 %v10009_v27  ;;  %v10076_v27 = vld [vmem:[%s13132_s5 + $0x510] ss:$8 sps:$4 sm:$0xff]  }
 0x32d   : > { %3882 = vmatpush2.bf16.msra.mxu0 %v10004_v23  ;;  %v10084_v23 = vld [vmem:[%s13132_s5 + $0x504] ss:$8 sps:$4 sm:$0xff]  }
 0x32e   : > { %3883 = vmatprep.subr.bf16.mxu0 %v10012_v54  ;;  %v10079_v54 = vld [vmem:[%s13132_s5 + $0x400] ss:$8 sps:$4 sm:$0xff]  }
 0x32f   : > { %3843 = vmatpush2.bf16.msra.mxu1 %v10007_v7  ;;  %v10087_v7 = vld [vmem:[%s13132_s5 + $0x4f4] ss:$8 sps:$4 sm:$0xff]  }
 0x330   : > { %3844 = vmatprep.subr.bf16.mxu1 %v10015_v4  ;;  %v10082_v4 = vld [vmem:[%s13132_s5 + $0x500] ss:$8 sps:$4 sm:$0xff]  }
 0x331   : > { %3884 = vmatpush2.bf16.msra.mxu0 %v10010_v24  ;;  %v10090_v24 = vld [vmem:[%s13132_s5 + $0x5f4] ss:$8 sps:$4 sm:$0xff]  }
 0x332   : > { %3885 = vmatprep.subr.bf16.mxu0 %v10018_v13  ;;  %v10085_v13 = vld [vmem:[%s13132_s5 + $0x4f0] ss:$8 sps:$4 sm:$0xff]  }
 0x333   : > { %3845 = vmatpush2.bf16.msra.mxu1 %v10013_v30  ;;  %v10093_v30 = vld [vmem:[%s13132_s5 + $0x4e4] ss:$8 sps:$4 sm:$0xff]  }
 0x334   : > { %3846 = vmatprep.subr.bf16.mxu1 %v10021_v5  ;;  %v10088_v5 = vld [vmem:[%s13132_s5 + $0x5f0] ss:$8 sps:$4 sm:$0xff]  }
 0x335   : > { %3886 = vmatpush2.bf16.msra.mxu0 %v10016_v26  ;;  %v10091_v26 = vld [vmem:[%s13132_s5 + $0x4e0] ss:$8 sps:$4 sm:$0xff]  }
 0x336   : > { %3887 = vmatprep.subr.bf16.mxu0 %v10024_v49  ;;  %v10099_v49 = vld [vmem:[%s13132_s5 + $0x4d4] ss:$8 sps:$4 sm:$0xff]  }
 0x337   : > { %3847 = vmatpush2.bf16.msra.mxu1 %v10019_v15  ;;  %v10094_v15 = vld [vmem:[%s13132_s5 + $0x5e0] ss:$8 sps:$4 sm:$0xff]  }
 0x338   : > { %3848 = vmatprep.subr.bf16.mxu1 %v10027_v53  ;;  %v10097_v53 = vld [vmem:[%s13132_s5 + $0x4d0] ss:$8 sps:$4 sm:$0xff]  }
 0x339   : > { %3888 = vmatpush2.bf16.msra.mxu0 %v10022_v38  ;;  %v10105_v38 = vld [vmem:[%s13132_s5 + $0x4c4] ss:$8 sps:$4 sm:$0xff]  }
 0x33a   : > { %3889 = vmatprep.subr.bf16.mxu0 %v10030_v55  ;;  %v10100_v55 = vld [vmem:[%s13132_s5 + $0x5d0] ss:$8 sps:$4 sm:$0xff]  }
 0x33b   : > { %3849 = vmatpush2.bf16.msra.mxu1 %v10025_v2  ;;  %v10108_v2 = vld [vmem:[%s13132_s5 + $0x5c4] ss:$8 sps:$4 sm:$0xff]  }
 0x33c   : > { %3850 = vmatprep.subr.bf16.mxu1 %v10033_v0  ;;  %v10103_v0 = vld [vmem:[%s13132_s5 + $0x4c0] ss:$8 sps:$4 sm:$0xff]  }
 0x33d   : > { %3890 = vmatpush2.bf16.msra.mxu0 %v10028_v32  ;;  %v10111_v32 = vld [vmem:[%s13132_s5 + $0x4b4] ss:$8 sps:$4 sm:$0xff]  }
 0x33e   : > { %3891 = vmatprep.subr.bf16.mxu0 %v10036_v41  ;;  %v10106_v41 = vld [vmem:[%s13132_s5 + $0x5c0] ss:$8 sps:$4 sm:$0xff]  }
 0x33f   : > { %3851 = vmatpush2.bf16.msra.mxu1 %v10031_v42  ;;  %v10114_v42 = vld [vmem:[%s13132_s5 + $0x5b4] ss:$8 sps:$4 sm:$0xff]  }
 0x340   : > { %4334 = vmatprep.subr.bf16.mxu1 %v10039_v11  ;;  %v10117_v11 = vld [vmem:[%s13132_s5 + $0x4a4] ss:$8 sps:$4 sm:$0xff]  }
 0x341   : > { %3892 = vmatpush2.bf16.msra.mxu0 %v10034_v44  ;;  %v10112_v44 = vld [vmem:[%s13132_s5 + $0x5b0] ss:$8 sps:$4 sm:$0xff]  }
 0x342   : > { %3853 = vmatmul.mubr.bf16.vlgmr.msra.gmra.mxu1 %v3486_v28  ;;  %4375 = vmatprep.subr.bf16.mxu0 %v10042_v46  ;;  %v10120_v28 = vld [vmem:[%s13132_s5 + $0x5a4] ss:$8 sps:$4 sm:$0xff]   ;;  %v10115_v46 = vld [vmem:[%s13132_s5 + $0x4a0] ss:$8 sps:$4 sm:$0xff]  }
 0x343   : > { %4335 = vmatpush1.bf16.msra.mxu1 %v10037_v45  ;;  %4366 = vmatprep.mubr.bf16.mxu1 %v4007_v63  ;;  %v10123_v45 = vld [vmem:[%s13132_s5 + $0x494] ss:$8 sps:$4 sm:$0xff]   ;;  %v10118_v63 = vld [vmem:[%s13132_s5 + $0x5a0] ss:$8 sps:$4 sm:$0xff]  }
 0x344   : > { %3894 = vmatmul.mubr.bf16.vlgmr.msra.gmra.mxu0 %v3494_v56  ;;  %4336 = vmatprep.subr.bf16.mxu1 %v10045_v21  ;;  %v10126_v21 = vld [vmem:[%s13132_s5 + $0x594] ss:$8 sps:$4 sm:$0xff]   ;;  %v11942_v56 = vrot.slane %v4521_v6, %v10744_v29 }
 0x345   : > { %4376 = vmatpush1.bf16.msra.mxu0 %v10040_v18  ;;  %4407 = vmatprep.mubr.bf16.mxu0 %v4009_v50  ;;  %v10121_v18 = vld [vmem:[%s13132_s5 + $0x490] ss:$8 sps:$4 sm:$0xff]   ;;  %v10135_v6 = vld [vmem:[%s13132_s5 + $0x674] ss:$8 sps:$4 sm:$0xff]  }
 0x346   : > { %4377 = vmatprep.subr.bf16.mxu0 %v10048_v33  ;;  %v10129_v33 = vld [vmem:[%s13132_s5 + $0x484] ss:$8 sps:$4 sm:$0xff]   ;;  %v10124_v50 = vld [vmem:[%s13132_s5 + $0x590] ss:$8 sps:$4 sm:$0xff]   ;;  %v4529_v9 = vcombine.high %v11942_v56, %v11942_v56 }
 0x347   : > { %4337 = vmatpush1.bf16.msra.mxu1 %v10043_v51  ;;  %v10132_v51 = vld [vmem:[%s13132_s5 + $0x584] ss:$8 sps:$4 sm:$0xff]  }
 0x348   : > { %4338 = vmatprep.subr.bf16.mxu1 %v10051_v59  ;;  %v10130_v59 = vld [vmem:[%s13132_s5 + $0x580] ss:$8 sps:$4 sm:$0xff]  }
 0x349   : > { %4378 = vmatpush1.bf16.msra.mxu0 %v10046_v60  ;;  %v4000_v60 = vrot.slane %v11739_v16, %v10744_v29  ;;  %v10136_v16 = vld [vmem:[%s13132_s5 + $0x770] ss:$8 sps:$4 sm:$0xff]  }
 0x34a   : > { %4379 = vmatprep.subr.bf16.mxu0 %v10054_v17  ;;  %v10138_v17 = vld [vmem:[%s13132_s5 + $0x774] ss:$8 sps:$4 sm:$0xff]  }
 0x34b   : > { %4339 = vmatpush1.bf16.msra.mxu1 %v10049_v8  ;;  %v10133_v8 = vld [vmem:[%s13132_s5 + $0x670] ss:$8 sps:$4 sm:$0xff]  }
 0x34c   : > { %4340 = vmatprep.subr.bf16.mxu1 %v10057_v61  ;;  %v4543_v61 = vrot.slane %v4529_v9, %v10744_v29  ;;  %v10216_v9 = vld [vmem:[%s13132_s5 + $0x7a4] ss:$8 sps:$4 sm:$0xff]  }
 0x34d   : > { %4380 = vmatpush1.bf16.msra.mxu0 %v10052_v34  ;;  %v10141_v34 = vld [vmem:[%s13132_s5 + $0x664] ss:$8 sps:$4 sm:$0xff]  }
 0x34e   : > { %4381 = vmatprep.subr.bf16.mxu0 %v10060_v62  ;;  %v4008_v62 = vcombine.high %v4000_v60, %v4000_v60 }
 0x34f   : > { %4341 = vmatpush1.bf16.msra.mxu1 %v10055_v52  ;;  %v10144_v52 = vld [vmem:[%s13132_s5 + $0x764] ss:$8 sps:$4 sm:$0xff]  }
 0x350   : > { %4342 = vmatprep.subr.bf16.mxu1 %v10063_v37  ;;  %v4545_v37 = vcombine.high %v4543_v61, %v4543_v61 }
 0x351   : > { %4382 = vmatpush1.bf16.msra.mxu0 %v10058_v35  ;;  %v10139_v35 = vld [vmem:[%s13132_s5 + $0x660] ss:$8 sps:$4 sm:$0xff]  }
 0x352   : > { %4383 = vmatprep.subr.bf16.mxu0 %v10066_v58  ;;  %v10147_v58 = vld [vmem:[%s13132_s5 + $0x654] ss:$8 sps:$4 sm:$0xff]  }
 0x353   : > { %4343 = vmatpush1.bf16.msra.mxu1 %v10061_v40  ;;  %v10142_v40 = vld [vmem:[%s13132_s5 + $0x760] ss:$8 sps:$4 sm:$0xff]  }
 0x354   : > { %4344 = vmatprep.subr.bf16.mxu1 %v10069_v1  ;;  %v10150_v1 = vld [vmem:[%s13132_s5 + $0x754] ss:$8 sps:$4 sm:$0xff]  }
 0x355   : > { %4384 = vmatpush1.bf16.msra.mxu0 %v10064_v48  ;;  %v10145_v48 = vld [vmem:[%s13132_s5 + $0x650] ss:$8 sps:$4 sm:$0xff]  }
 0x356   : > { %4385 = vmatprep.subr.bf16.mxu0 %v10072_v22  ;;  %v10153_v22 = vld [vmem:[%s13132_s5 + $0x644] ss:$8 sps:$4 sm:$0xff]  }
 0x357   : > { %4345 = vmatpush1.bf16.msra.mxu1 %v10067_v47  ;;  %v10148_v47 = vld [vmem:[%s13132_s5 + $0x750] ss:$8 sps:$4 sm:$0xff]  }
 0x358   : > { %4346 = vmatprep.subr.bf16.mxu1 %v10075_v25  ;;  %v10156_v25 = vld [vmem:[%s13132_s5 + $0x744] ss:$8 sps:$4 sm:$0xff]  }
 0x359   : > { %4386 = vmatpush1.bf16.msra.mxu0 %v10070_v36  ;;  %v10151_v36 = vld [vmem:[%s13132_s5 + $0x640] ss:$8 sps:$4 sm:$0xff]  }
 0x35a   : > { %4387 = vmatprep.subr.bf16.mxu0 %v10078_v57  ;;  %v10159_v57 = vld [vmem:[%s13132_s5 + $0x634] ss:$8 sps:$4 sm:$0xff]  }
 0x35b   : > { %4347 = vmatpush1.bf16.msra.mxu1 %v10073_v39  ;;  %v10154_v39 = vld [vmem:[%s13132_s5 + $0x740] ss:$8 sps:$4 sm:$0xff]  }
 0x35c   : > { %4348 = vmatprep.subr.bf16.mxu1 %v10081_v3  ;;  %v10162_v3 = vld [vmem:[%s13132_s5 + $0x734] ss:$8 sps:$4 sm:$0xff]  }
 0x35d   : > { %4388 = vmatpush1.bf16.msra.mxu0 %v10076_v27  ;;  %v10157_v27 = vld [vmem:[%s13132_s5 + $0x630] ss:$8 sps:$4 sm:$0xff]  }
 0x35e   : > { %4389 = vmatprep.subr.bf16.mxu0 %v10084_v23  ;;  %v10165_v23 = vld [vmem:[%s13132_s5 + $0x624] ss:$8 sps:$4 sm:$0xff]  }
 0x35f   : > { %4349 = vmatpush1.bf16.msra.mxu1 %v10079_v54  ;;  %v10160_v54 = vld [vmem:[%s13132_s5 + $0x730] ss:$8 sps:$4 sm:$0xff]  }
 0x360   : > { %4350 = vmatprep.subr.bf16.mxu1 %v10087_v7  ;;  %v10168_v7 = vld [vmem:[%s13132_s5 + $0x724] ss:$8 sps:$4 sm:$0xff]  }
 0x361   : > { %4390 = vmatpush1.bf16.msra.mxu0 %v10082_v4  ;;  %v10163_v4 = vld [vmem:[%s13132_s5 + $0x620] ss:$8 sps:$4 sm:$0xff]  }
 0x362   : > { %4391 = vmatprep.subr.bf16.mxu0 %v10090_v24  ;;  %v10171_v24 = vld [vmem:[%s13132_s5 + $0x614] ss:$8 sps:$4 sm:$0xff]  }
 0x363   : > { %4351 = vmatpush2.bf16.msra.mxu1 %v10085_v13  ;;  %v10166_v13 = vld [vmem:[%s13132_s5 + $0x720] ss:$8 sps:$4 sm:$0xff]  }
 0x364   : > { %4352 = vmatprep.subr.bf16.mxu1 %v10093_v30  ;;  %v10174_v30 = vld [vmem:[%s13132_s5 + $0x714] ss:$8 sps:$4 sm:$0xff]  }
 0x365   : > { %4392 = vmatpush2.bf16.msra.mxu0 %v10088_v5  ;;  %v10169_v5 = vld [vmem:[%s13132_s5 + $0x610] ss:$8 sps:$4 sm:$0xff]  }
 0x366   : > { %4393 = vmatprep.subr.bf16.mxu0 %v10096_v43  ;;  %v10177_v43 = vld [vmem:[%s13132_s5 + $0x604] ss:$8 sps:$4 sm:$0xff]  }
 0x367   : > { %4353 = vmatpush2.bf16.msra.mxu1 %v10091_v26  ;;  %v10172_v26 = vld [vmem:[%s13132_s5 + $0x710] ss:$8 sps:$4 sm:$0xff]  }
 0x368   : > { %4354 = vmatprep.subr.bf16.mxu1 %v10099_v49  ;;  %v10180_v49 = vld [vmem:[%s13132_s5 + $0x704] ss:$8 sps:$4 sm:$0xff]  }
 0x369   : > { %4394 = vmatpush2.bf16.msra.mxu0 %v10094_v15  ;;  %v10175_v15 = vld [vmem:[%s13132_s5 + $0x600] ss:$8 sps:$4 sm:$0xff]  }
 0x36a   : > { %4395 = vmatprep.subr.bf16.mxu0 %v10102_v31  ;;  %v10183_v31 = vld [vmem:[%s13132_s5 + $0x6f4] ss:$8 sps:$4 sm:$0xff]  }
 0x36b   : > { %4355 = vmatpush2.bf16.msra.mxu1 %v10097_v53  ;;  %v10178_v53 = vld [vmem:[%s13132_s5 + $0x700] ss:$8 sps:$4 sm:$0xff]  }
 0x36c   : > { %4356 = vmatprep.subr.bf16.mxu1 %v10105_v38  ;;  %v10186_v38 = vld [vmem:[%s13132_s5 + $0x7f4] ss:$8 sps:$4 sm:$0xff]  }
 0x36d   : > { %4396 = vmatpush2.bf16.msra.mxu0 %v10100_v55  ;;  %v10181_v55 = vld [vmem:[%s13132_s5 + $0x6f0] ss:$8 sps:$4 sm:$0xff]  }
 0x36e   : > { %4397 = vmatprep.subr.bf16.mxu0 %v10108_v2  ;;  %v10189_v2 = vld [vmem:[%s13132_s5 + $0x6e4] ss:$8 sps:$4 sm:$0xff]  }
 0x36f   : > { %4357 = vmatpush2.bf16.msra.mxu1 %v10103_v0  ;;  %v10184_v0 = vld [vmem:[%s13132_s5 + $0x7f0] ss:$8 sps:$4 sm:$0xff]  }
 0x370   : > { %4358 = vmatprep.subr.bf16.mxu1 %v10111_v32  ;;  %v10192_v32 = vld [vmem:[%s13132_s5 + $0x7e4] ss:$8 sps:$4 sm:$0xff]  }
 0x371   : > { %4398 = vmatpush2.bf16.msra.mxu0 %v10106_v41  ;;  %v10187_v41 = vld [vmem:[%s13132_s5 + $0x6e0] ss:$8 sps:$4 sm:$0xff]  }
 0x372   : > { %4399 = vmatprep.subr.bf16.mxu0 %v10114_v42  ;;  %v10195_v42 = vld [vmem:[%s13132_s5 + $0x6d4] ss:$8 sps:$4 sm:$0xff]  }
 0x373   : > { %4359 = vmatpush2.bf16.msra.mxu1 %v10109_v12  ;;  %v10190_v12 = vld [vmem:[%s13132_s5 + $0x7e0] ss:$8 sps:$4 sm:$0xff]  }
 0x374   : > { %4360 = vmatprep.subr.bf16.mxu1 %v10117_v11  ;;  %v10198_v11 = vld [vmem:[%s13132_s5 + $0x7d4] ss:$8 sps:$4 sm:$0xff]  }
 0x375   : > { %4400 = vmatpush2.bf16.msra.mxu0 %v10112_v44  ;;  %v10193_v44 = vld [vmem:[%s13132_s5 + $0x6d0] ss:$8 sps:$4 sm:$0xff]  }
 0x376   : > { %4401 = vmatprep.subr.bf16.mxu0 %v10120_v28  ;;  %v10201_v28 = vld [vmem:[%s13132_s5 + $0x6c4] ss:$8 sps:$4 sm:$0xff]  }
 0x377   : > { %4361 = vmatpush2.bf16.msra.mxu1 %v10115_v46  ;;  %v10196_v46 = vld [vmem:[%s13132_s5 + $0x7d0] ss:$8 sps:$4 sm:$0xff]  }
 0x378   : > { %4362 = vmatprep.subr.bf16.mxu1 %v10123_v45  ;;  %v10204_v45 = vld [vmem:[%s13132_s5 + $0x7c4] ss:$8 sps:$4 sm:$0xff]  }
 0x379   : > { %4402 = vmatpush2.bf16.msra.mxu0 %v10118_v63  ;;  %v10199_v63 = vld [vmem:[%s13132_s5 + $0x6c0] ss:$8 sps:$4 sm:$0xff]  }
 0x37a   : > { %4403 = vmatprep.subr.bf16.mxu0 %v10126_v21  ;;  %v10207_v21 = vld [vmem:[%s13132_s5 + $0x6b4] ss:$8 sps:$4 sm:$0xff]  }
 0x37b   : > { %4363 = vmatpush2.bf16.msra.mxu1 %v10121_v18  ;;  %v10202_v18 = vld [vmem:[%s13132_s5 + $0x7c0] ss:$8 sps:$4 sm:$0xff]  }
 0x37c   : > { %4364 = vmatprep.subr.bf16.mxu1 %v10129_v33  ;;  %v10210_v33 = vld [vmem:[%s13132_s5 + $0x7b4] ss:$8 sps:$4 sm:$0xff]  }
 0x37d   : > { %4404 = vmatpush2.bf16.msra.mxu0 %v10124_v50  ;;  %v10205_v50 = vld [vmem:[%s13132_s5 + $0x6b0] ss:$8 sps:$4 sm:$0xff]  }
 0x37e   : > { %4405 = vmatprep.subr.bf16.mxu0 %v10132_v51  ;;  %v10213_v51 = vld [vmem:[%s13132_s5 + $0x6a4] ss:$8 sps:$4 sm:$0xff]  }
 0x37f   : > { %4365 = vmatpush2.bf16.msra.mxu1 %v10127_v10  ;;  %v10208_v10 = vld [vmem:[%s13132_s5 + $0x7b0] ss:$8 sps:$4 sm:$0xff]  }
 0x380   : > { %4870 = vmatprep.subr.bf16.mxu1 %v10135_v6  ;;  %v10211_v6 = vld [vmem:[%s13132_s5 + $0x6a0] ss:$8 sps:$4 sm:$0xff]  }
 0x381   : > { %4406 = vmatpush2.bf16.msra.mxu0 %v10130_v59  ;;  %v10219_v59 = vld [vmem:[%s13132_s5 + $0x694] ss:$8 sps:$4 sm:$0xff]  }
 0x382   : > { %4367 = vmatmul.mubr.bf16.vlgmr.msra.gmra.mxu1 %v4000_v60  ;;  %4911 = vmatprep.subr.bf16.mxu0 %v10138_v17  ;;  %v10214_v60 = vld [vmem:[%s13132_s5 + $0x7a0] ss:$8 sps:$4 sm:$0xff]   ;;  %v10222_v17 = vld [vmem:[%s13132_s5 + $0x794] ss:$8 sps:$4 sm:$0xff]  }
 0x383   : > { %4871 = vmatpush1.bf16.msra.mxu1 %v10133_v8  ;;  %4902 = vmatprep.mubr.bf16.mxu1 %v4543_v61  ;;  %v10217_v8 = vld [vmem:[%s13132_s5 + $0x690] ss:$8 sps:$4 sm:$0xff]   ;;  %v10225_v61 = vld [vmem:[%s13132_s5 + $0x684] ss:$8 sps:$4 sm:$0xff]  }
 0x384   : > { %4408 = vmatmul.mubr.bf16.vlgmr.msra.gmra.mxu0 %v4008_v62  ;;  %4872 = vmatprep.subr.bf16.mxu1 %v10141_v34  ;;  %v10220_v34 = vld [vmem:[%s13132_s5 + $0x790] ss:$8 sps:$4 sm:$0xff]   ;;  %v10223_v62 = vld [vmem:[%s13132_s5 + $0x680] ss:$8 sps:$4 sm:$0xff]  }
 0x385   : > { %4912 = vmatpush1.bf16.msra.mxu0 %v10136_v16  ;;  %4943 = vmatprep.mubr.bf16.mxu0 %v4545_v37  ;;  %v10228_v16 = vld [vmem:[%s13132_s5 + $0x784] ss:$8 sps:$4 sm:$0xff]   ;;  %v4536_v37 = vrot.slane %v11942_v56, %v10744_v29 }
 0x386   : > { %4913 = vmatprep.subr.bf16.mxu0 %v10144_v52  ;;  %v10226_v52 = vld [vmem:[%s13132_s5 + $0x780] ss:$8 sps:$4 sm:$0xff]  }
 0x387   : > { %4873 = vmatpush1.bf16.msra.mxu1 %v10139_v35 }
 0x388   : > { %4874 = vmatprep.subr.bf16.mxu1 %v10147_v58  ;;  %v4544_v58 = vcombine.high %v4536_v37, %v4536_v37 }
 0x389   : > { %4914 = vmatpush1.bf16.msra.mxu0 %v10142_v40 }
 0x38a   : > { %4915 = vmatprep.subr.bf16.mxu0 %v10150_v1 }
 0x38b   : > { %4875 = vmatpush1.bf16.msra.mxu1 %v10145_v48 }
 0x38c   : > { %4876 = vmatprep.subr.bf16.mxu1 %v10153_v22 }
 0x38d   : > { %4916 = vmatpush1.bf16.msra.mxu0 %v10148_v47 }
 0x38e   : > { %4917 = vmatprep.subr.bf16.mxu0 %v10156_v25 }
 0x38f   : > { %4877 = vmatpush1.bf16.msra.mxu1 %v10151_v36 }
 0x390   : > { %4878 = vmatprep.subr.bf16.mxu1 %v10159_v57 }
 0x391   : > { %4918 = vmatpush1.bf16.msra.mxu0 %v10154_v39 }
 0x392   : > { %4919 = vmatprep.subr.bf16.mxu0 %v10162_v3 }
 0x393   : > { %4879 = vmatpush1.bf16.msra.mxu1 %v10157_v27 }
 0x394   : > { %4880 = vmatprep.subr.bf16.mxu1 %v10165_v23 }
 0x395   : > { %4920 = vmatpush1.bf16.msra.mxu0 %v10160_v54 }
 0x396   : > { %4921 = vmatprep.subr.bf16.mxu0 %v10168_v7 }
 0x397   : > { %4881 = vmatpush1.bf16.msra.mxu1 %v10163_v4 }
 0x398   : > { %4882 = vmatprep.subr.bf16.mxu1 %v10171_v24 }
 0x399   : > { %4922 = vmatpush1.bf16.msra.mxu0 %v10166_v13 }
 0x39a   : > { %4923 = vmatprep.subr.bf16.mxu0 %v10174_v30 }
 0x39b   : > { %4883 = vmatpush1.bf16.msra.mxu1 %v10169_v5 }
 0x39c   : > { %4884 = vmatprep.subr.bf16.mxu1 %v10177_v43 }
 0x39d   : > { %4924 = vmatpush1.bf16.msra.mxu0 %v10172_v26  ;;  %v10229_v26 = vld [vmem:[%s13134_s7 + $0x278] sm:$0xff]  }
 0x39e   : > { %4925 = vmatprep.subr.bf16.mxu0 %v10180_v49  ;;  %v10230_v49 = vld [vmem:[%s13134_s7 + $0x238] sm:$0xff]  }
 0x39f   : > { %4885 = vmatpush1.bf16.msra.mxu1 %v10175_v15  ;;  %v10231_v15 = vld [vmem:[%s13134_s7 + $0x2f8] sm:$0xff]  }
 0x3a0   : > { %4886 = vmatprep.subr.bf16.mxu1 %v10183_v31 }
 0x3a1   : > { %4926 = vmatpush1.bf16.msra.mxu0 %v10178_v53  ;;  %v10232_v53 = vld [vmem:[%s13134_s7 + $0x2b8] sm:$0xff]  }
 0x3a2   : > { %4927 = vmatprep.subr.bf16.mxu0 %v10186_v38 }
 0x3a3   : > { %4887 = vmatpush2.bf16.msra.mxu1 %v10181_v55  ;;  %v10233_v55 = vld [vmem:[%s13134_s7 + $0x270] sm:$0xff]  }
 0x3a4   : > { %4888 = vmatprep.subr.bf16.mxu1 %v10189_v2  ;;  %v10234_v2 = vld [vmem:[%s13134_s7 + $0x230] sm:$0xff]  }
 0x3a5   : > { %4928 = vmatpush2.bf16.msra.mxu0 %v10184_v0  ;;  %v10235_v0 = vld [vmem:[%s13134_s7 + $0x2f0] sm:$0xff]  }
 0x3a6   : > { %4929 = vmatprep.subr.bf16.mxu0 %v10192_v32  ;;  %v10236_v32 = vld [vmem:[%s13134_s7 + $0x2b0] sm:$0xff]  }
 0x3a7   : > { %4889 = vmatpush2.bf16.msra.mxu1 %v10187_v41  ;;  %v10237_v41 = vld [vmem:[%s13134_s7 + $0x268] sm:$0xff]  }
 0x3a8   : > { %4890 = vmatprep.subr.bf16.mxu1 %v10195_v42  ;;  %v10238_v42 = vld [vmem:[%s13134_s7 + $0x228] sm:$0xff]  }
 0x3a9   : > { %4930 = vmatpush2.bf16.msra.mxu0 %v10190_v12  ;;  %v10239_v12 = vld [vmem:[%s13134_s7 + $0x2e8] sm:$0xff]  }
 0x3aa   : > { %4931 = vmatprep.subr.bf16.mxu0 %v10198_v11  ;;  %v10240_v11 = vld [vmem:[%s13134_s7 + $0x2a8] sm:$0xff]  }
 0x3ab   : > { %4891 = vmatpush2.bf16.msra.mxu1 %v10193_v44  ;;  %v10241_v44 = vld [vmem:[%s13134_s7 + $0x260] sm:$0xff]  }
 0x3ac   : > { %4892 = vmatprep.subr.bf16.mxu1 %v10201_v28  ;;  %v10242_v28 = vld [vmem:[%s13134_s7 + $0x220] sm:$0xff]  }
 0x3ad   : > { %4932 = vmatpush2.bf16.msra.mxu0 %v10196_v46  ;;  %v10243_v46 = vld [vmem:[%s13134_s7 + $0x2e0] sm:$0xff]  }
 0x3ae   : > { %4933 = vmatprep.subr.bf16.mxu0 %v10204_v45  ;;  %v10245_v45 = vld [vmem:[%s13134_s7 + $0x258] sm:$0xff]  }
 0x3af   : > { %4893 = vmatpush2.bf16.msra.mxu1 %v10199_v63  ;;  %v10244_v63 = vld [vmem:[%s13134_s7 + $0x2a0] sm:$0xff]  }
 0x3b0   : > { %4894 = vmatprep.subr.bf16.mxu1 %v10207_v21  ;;  %v10247_v21 = vld [vmem:[%s13134_s7 + $0x2d8] sm:$0xff]  }
 0x3b1   : > { %4934 = vmatpush2.bf16.msra.mxu0 %v10202_v18  ;;  %v10246_v18 = vld [vmem:[%s13134_s7 + $0x218] sm:$0xff]  }
 0x3b2   : > { %4935 = vmatprep.subr.bf16.mxu0 %v10210_v33  ;;  %v10249_v33 = vld [vmem:[%s13134_s7 + $0x250] sm:$0xff]  }
 0x3b3   : > { %4895 = vmatpush2.bf16.msra.mxu1 %v10205_v50  ;;  %v10248_v50 = vld [vmem:[%s13134_s7 + $0x298] sm:$0xff]  }
 0x3b4   : > { %4896 = vmatprep.subr.bf16.mxu1 %v10213_v51  ;;  %v10251_v51 = vld [vmem:[%s13134_s7 + $0x2d0] sm:$0xff]  }
 0x3b5   : > { %4936 = vmatpush2.bf16.msra.mxu0 %v10208_v10  ;;  %v10586_v10 = vmov 0  }
 0x3b6   : > { %4937 = vmatprep.subr.bf16.mxu0 %v10216_v9  ;;  %497 = vst [vmem:[#allocation4] sm:$0xff] %v10586_v10  ;;  %500 = vst [vmem:[#allocation4 + $0x8] sm:$0xff] %v10586_v10  ;;  %v10250_v9 = vld [vmem:[%s13134_s7 + $0x210] sm:$0xff]  }
 0x3b7   : > { %4897 = vmatpush2.bf16.msra.mxu1 %v10211_v6  ;;  %v10253_v6 = vld [vmem:[%s13134_s7 + $0x248] sm:$0xff]  }
 0x3b8   : > { %4898 = vmatprep.subr.bf16.mxu1 %v10219_v59  ;;  %v10252_v59 = vld [vmem:[%s13134_s7 + $0x290] sm:$0xff]  }
 0x3b9   : > { %4938 = vmatpush2.bf16.msra.mxu0 %v10214_v60  ;;  %v10255_v60 = vld [vmem:[%s13134_s7 + $0x2c8] sm:$0xff]  }
 0x3ba   : > { %4939 = vmatprep.subr.bf16.mxu0 %v10222_v17  ;;  %v10254_v17 = vld [vmem:[%s13134_s7 + $0x208] sm:$0xff]  }
 0x3bb   : > { %4899 = vmatpush2.bf16.msra.mxu1 %v10217_v8  ;;  %v10257_v8 = vld [vmem:[%s13134_s7 + $0x240] sm:$0xff]  }
 0x3bc   : > { %4900 = vmatprep.subr.bf16.mxu1 %v10225_v61  ;;  %v10256_v61 = vld [vmem:[%s13134_s7 + $0x288] sm:$0xff]  }
 0x3bd   : > { %4940 = vmatpush2.bf16.msra.mxu0 %v10220_v34  ;;  %v10259_v34 = vld [vmem:[%s13134_s7 + $0x2c0] sm:$0xff]  }
 0x3be   : > { %4941 = vmatprep.subr.bf16.mxu0 %v10228_v16  ;;  %v10258_v16 = vld [vmem:[%s13134_s7 + $0x200] sm:$0xff]  }
 0x3bf   : > { %4901 = vmatpush2.bf16.msra.mxu1 %v10223_v62  ;;  %v10261_v62 = vld [vmem:[%s13134_s7 + $0x378] sm:$0xff]  }
 0x3c0   : > { %9336 = vmatprep.subr.bf16.mxu1 %v10229_v26 }
 0x3c1   : > { %4942 = vmatpush2.bf16.msra.mxu0 %v10226_v52  ;;  %v10260_v52 = vld [vmem:[%s13134_s7 + $0x280] sm:$0xff]  }
 0x3c2   : > { %4903 = vmatmul.mubr.bf16.vlgmr.msra.gmra.mxu1 %v4536_v37  ;;  %v3423_v35 = vpop.f32.mrf.mxu1  ;;  %9358 = vmatprep.subr.bf16.mxu0 %v10231_v15  ;;  %v10264_v37 = vld [vmem:[%s13134_s7 + $0x3f8] sm:$0xff]  }
 0x3c3   : > { %9337 = vmatpush3.bf16.msra.mxu1 %v10230_v49 }
 0x3c4   : > { %4944 = vmatmul.mubr.bf16.vlgmr.msra.gmra.mxu0 %v4544_v58  ;;  %v3425_v40 = vpop.f32.mrf.mxu1  ;;  %v3464_v1 = vpop.f32.mrf.mxu0  ;;  %9338 = vmatprep.subr.bf16.mxu1 %v10233_v55 }
 0x3c5   : > { %v3465_v48 = vadd.f32 %v3464_v1, %v3423_v35  ;;  %9359 = vmatpush3.bf16.msra.mxu0 %v10232_v53 }
 0x3c6   : > { %v3427_v22 = vpop.f32.mrf.mxu1  ;;  %v3466_v47 = vpop.f32.mrf.mxu0  ;;  %9360 = vmatprep.subr.bf16.mxu0 %v10235_v0 }
 0x3c7   : > { %v3467_v25 = vadd.f32 %v3466_v47, %v3425_v40  ;;  %9339 = vmatpush3.bf16.msra.mxu1 %v10234_v2 }
 0x3c8   : > { %v3428_v36 = vpop.f32.mrf.mxu1  ;;  %v3468_v57 = vpop.f32.mrf.mxu0  ;;  %9340 = vmatprep.subr.bf16.mxu1 %v10237_v41 }
 0x3c9   : > { %9361 = vmatpush3.bf16.msra.mxu0 %v10236_v32 }
 0x3ca   : > { %v3469_v39 = vpop.f32.mrf.mxu0  ;;  %9362 = vmatprep.subr.bf16.mxu0 %v10239_v12 }
 0x3cb   : > { %9341 = vmatpush3.bf16.msra.mxu1 %v10238_v42 }
 0x3cc   : > { %9342 = vmatprep.subr.bf16.mxu1 %v10241_v44  ;;  %v4992_v44 = vld [vmem:[#allocation4 + $0x4] sm:$0x3] }
 0x3cd   : > { %9363 = vmatpush3.bf16.msra.mxu0 %v10240_v11  ;;  %v4989_v11 = vld [vmem:[#allocation4 + $0x6] sm:$0x3] }
 0x3ce   : > { %9364 = vmatprep.subr.bf16.mxu0 %v10243_v46 }
 0x3cf   : > { %9343 = vmatpush3.bf16.msra.mxu1 %v10242_v28 }
 0x3d0   : > { %9344 = vmatprep.subr.bf16.mxu1 %v10245_v45  ;;  %v5004_v45 = vld [vmem:[#allocation4 + $0xa] sm:$0x3] }
 0x3d1   : > { %9365 = vmatpush3.bf16.msra.mxu0 %v10244_v63  ;;  %v5007_v63 = vld [vmem:[#allocation4 + $0x8] sm:$0x3] }
 0x3d2   : > { %9366 = vmatprep.subr.bf16.mxu0 %v10247_v21 }
 0x3d3   : > { %9345 = vmatpush3.bf16.msra.mxu1 %v10246_v18 }
 0x3d4   : > { %9346 = vmatprep.subr.bf16.mxu1 %v10249_v33 }
 0x3d5   : > { %9367 = vmatpush3.bf16.msra.mxu0 %v10248_v50 }
 0x3d6   : > { %9368 = vmatprep.subr.bf16.mxu0 %v10251_v51 }
 0x3d7   : > { %9347 = vmatpush3.bf16.msra.mxu1 %v10250_v9 }
 0x3d8   : > { %9348 = vmatprep.subr.bf16.mxu1 %v10253_v6 }
 0x3d9   : > { %9369 = vmatpush3.bf16.msra.mxu0 %v10252_v59 }
 0x3da   : > { %9370 = vmatprep.subr.bf16.mxu0 %v10255_v60 }
 0x3db   : > { %9349 = vmatpush3.bf16.msra.mxu1 %v10254_v17 }
 0x3dc   : > { %9350 = vmatprep.subr.bf16.mxu1 %v10257_v8  ;;  %v10262_v8 = vld [vmem:[%s13134_s7 + $0x338] sm:$0xff]  }
 0x3dd   : > { %9371 = vmatpush3.bf16.msra.mxu0 %v10256_v61 }
 0x3de   : > { %9372 = vmatprep.subr.bf16.mxu0 %v10259_v34 }
 0x3df   : > { %9351 = vmatpush3.bf16.msra.mxu1 %v10258_v16 }
 0x3e0   : > { %9380 = vmatprep.subr.bf16.mxu1 %v10261_v62 }
 0x3e1   : > { %9373 = vmatpush3.bf16.msra.mxu0 %v10260_v52 }
 0x3e2   : > { %9402 = vmatprep.subr.bf16.mxu0 %v10264_v37  ;;  %v10265_v37 = vld [vmem:[%s13134_s7 + $0x3b8] sm:$0xff]  }
 0x402   : > { %v3854_v3 = vpop.f32.mrf.mxu1 }
 0x403   : > { %v3855_v27 = vadd.f32 %v3854_v3, %v3465_v48 }
 0x404   : > { %v3856_v23 = vpop.f32.mrf.mxu1  ;;  %v3895_v54 = vpop.f32.mrf.mxu0 }
 0x405   : > { %v3857_v56 = vadd.f32 %v3856_v23, %v3467_v25  ;;  %v12158_v7 = vadd.f32 %v3895_v54, %v3855_v27  ;;  %v4957_v27 = vsub.s32 0, %v10739_v20  ;;  %v2840_v54 = vld [vmem:[%s13133_s6] sm:$0x3] }
 0x406   : > { %v3858_v4 = vpop.f32.mrf.mxu1  ;;  %v3897_v24 = vpop.f32.mrf.mxu0 }
 0x407   : > { %v12160_v13 = vadd.f32 %v3897_v24, %v3857_v56  ;;  %v4961_v56 = vsub.s32 1, %v10739_v20 }
 0x408   : > { %v3859_v30 = vpop.f32.mrf.mxu1  ;;  %v3899_v5 = vpop.f32.mrf.mxu0 }
 0x409   : > { %v4958_v5 = vrot.slane %v2840_v54, %v4957_v27  ;;  %v4962_v15 = vrot.slane %v2840_v54, %v4961_v56  ;;  %v10276_v27 = vld [vmem:[%s13134_s7 + $0x3e0] sm:$0xff]   ;;  %v10278_v54 = vld [vmem:[%s13134_s7 + $0x358] sm:$0xff]  }
 0x40a   : > { %v3900_v43 = vpop.f32.mrf.mxu0  ;;  %v10277_v56 = vld [vmem:[%s13134_s7 + $0x3a0] sm:$0xff]  }
 0x442   : > { %v4368_v35 = vpop.f32.mrf.mxu1 }
 0x444   : > { %v4370_v58 = vpop.f32.mrf.mxu1  ;;  %v4409_v40 = vpop.f32.mrf.mxu0 }
 0x445   : > { %v4410_v1 = vadd.f32 %v4409_v40, %v4368_v35  ;;  %v10266_v35 = vld [vmem:[%s13134_s7 + $0x370] sm:$0xff]  }
 0x446   : > { %v4372_v48 = vpop.f32.mrf.mxu1  ;;  %v4411_v22 = vpop.f32.mrf.mxu0 }
 0x447   : > { %v4416_v47 = vadd.f32 %v4410_v1, %v12158_v7  ;;  %v4412_v25 = vadd.f32 %v4411_v22, %v4370_v58  ;;  %v10268_v1 = vld [vmem:[%s13134_s7 + $0x3f0] sm:$0xff]  }
 0x448   : > { %v4373_v36 = vpop.f32.mrf.mxu1  ;;  %v4413_v57 = vpop.f32.mrf.mxu0  ;;  %v10267_v22 = vld [vmem:[%s13134_s7 + $0x330] sm:$0xff]  }
 0x449   : > { %v4417_v39 = vadd.f32 %v4412_v25, %v12160_v13  ;;  %v10269_v25 = vld [vmem:[%s13134_s7 + $0x3b0] sm:$0xff]   ;;  %v10272_v36 = vld [vmem:[%s13134_s7 + $0x3e8] sm:$0xff]  }
 0x44a   : > { %v4414_v3 = vpop.f32.mrf.mxu0  ;;  %v10271_v57 = vld [vmem:[%s13134_s7 + $0x328] sm:$0xff]  }
 0x44b   : > { %v10273_v3 = vld [vmem:[%s13134_s7 + $0x3a8] sm:$0xff]  }
 0x482   : > { %v4904_v23 = vpop.f32.mrf.mxu1 }
 0x484   : > { %v4906_v4 = vpop.f32.mrf.mxu1  ;;  %v4945_v24 = vpop.f32.mrf.mxu0 }
 0x485   : > { %v4946_v30 = vadd.f32 %v4945_v24, %v4904_v23  ;;  %v10275_v23 = vld [vmem:[%s13134_s7 + $0x320] sm:$0xff]   ;;  %v10279_v24 = vld [vmem:[%s13134_s7 + $0x318] sm:$0xff]  }
 0x486   : > { %v4908_v7 = vpop.f32.mrf.mxu1  ;;  %v4947_v43 = vpop.f32.mrf.mxu0 }
 0x487   : > { %v4952_v26 = vadd.f32 %v4946_v30, %v4416_v47  ;;  %v4948_v49 = vadd.f32 %v4947_v43, %v4906_v4  ;;  %v10270_v47 = vld [vmem:[%s13134_s7 + $0x368] sm:$0xff]   ;;  %v10280_v4 = vld [vmem:[%s13134_s7 + $0x3d8] sm:$0xff]   ;;  %v10282_v30 = vld [vmem:[%s13134_s7 + $0x350] sm:$0xff]  }
 0x488   : > { %v4909_v13 = vpop.f32.mrf.mxu1  ;;  %v4949_v53 = vpop.f32.mrf.mxu0  ;;  %v10284_v7 = vld [vmem:[%s13134_s7 + $0x3d0] sm:$0xff]  }
 0x489   : > { %v4965_v55 = vadd.f32 %v4958_v5, %v4952_v26  ;;  %v4953_v2 = vadd.f32 %v4948_v49, %v4417_v39  ;;  %v10274_v39 = vld [vmem:[%s13134_s7 + $0x360] sm:$0xff]   ;;  %v10281_v5 = vld [vmem:[%s13134_s7 + $0x398] sm:$0xff]   ;;  %v10283_v43 = vld [vmem:[%s13134_s7 + $0x310] sm:$0xff]  }
 0x48a   : > { %v4950_v0 = vpop.f32.mrf.mxu0  ;;  %v10286_v26 = vld [vmem:[%s13134_s7 + $0x348] sm:$0xff]   ;;  %v10285_v49 = vld [vmem:[%s13134_s7 + $0x390] sm:$0xff]   ;;  %v10290_v53 = vld [vmem:[%s13134_s7 + $0x340] sm:$0xff]  }
 0x48b   : > { %v4966_v32 = vadd.f32 %v4962_v15, %v4953_v2  ;;  %v4967_v41 = vmax.f32 %v4965_v55, 0.0  ;;  %v10288_v15 = vld [vmem:[%s13134_s7 + $0x3c8] sm:$0xff]   ;;  %v10292_v2 = vld [vmem:[%s13134_s7 + $0x3c0] sm:$0xff]  }
 0x48c   : > { %v10287_v13 = vld [vmem:[%s13134_s7 + $0x308] sm:$0xff]  }
 0x48d   : > { %v4968_v42 = vmax.f32 %v4966_v32, 0.0  ;;  %v10289_v55 = vld [vmem:[%s13134_s7 + $0x388] sm:$0xff]   ;;  %v10291_v32 = vld [vmem:[%s13134_s7 + $0x300] sm:$0xff]  }
 0x48f   : > { %v8591_v12 = vpack.c.bf16 %v4968_v42, %v4967_v41  ;;  %v10294_v41 = vld [vmem:[%s13134_s7 + $0x78] sm:$0xff]   ;;  %v10293_v42 = vld [vmem:[%s13134_s7 + $0x380] sm:$0xff]  }
 0x491   : > { %v4980_v20 = vrot.slane %v8591_v12, %v10744_v29 }
 0x493   : > { %v4987_v28 = vrot.slane %v4980_v20, %v10744_v29  ;;  %v4995_v46 = vcombine.high %v4980_v20, %v4980_v20  ;;  %v10296_v20 = vld [vmem:[%s13134_s7 + $0xf8] sm:$0xff]  }
 0x495   : > { %v4990_v21 = vsel %vm459_vm4, %v4987_v28, %v4989_v11  ;;  %v4993_v18 = vsel %vm476_vm3, %v4987_v28, %v4992_v44  ;;  %v5002_v33 = vrot.slane %v4995_v46, %v10744_v29  ;;  %v10295_v11 = vld [vmem:[%s13134_s7 + $0x38] sm:$0xff]   ;;  %v10298_v28 = vld [vmem:[%s13134_s7 + $0x70] sm:$0xff]  }
 0x496   : > { %4991 = vst [vmem:[#allocation4 + $0x6] sm:$0x3] %v4990_v21  ;;  %4994 = vst [vmem:[#allocation4 + $0x4] sm:$0x3] %v4993_v18  ;;  %v10297_v46 = vld [vmem:[%s13134_s7 + $0xb8] sm:$0xff]   ;;  %v10299_v21 = vld [vmem:[%s13134_s7 + $0x30] sm:$0xff]  }
 0x497   : > { %v5005_v50 = vsel %vm459_vm4, %v5002_v33, %v5004_v45  ;;  %v5008_v51 = vsel %vm476_vm3, %v5002_v33, %v5007_v63  ;;  %v10300_v63 = vld [vmem:[%s13134_s7 + $0xf0] sm:$0xff]   ;;  %v10302_v18 = vld [vmem:[%s13134_s7 + $0x68] sm:$0xff]  }
 0x498   : > { %5006 = vst [vmem:[#allocation4 + $0xa] sm:$0x3] %v5005_v50  ;;  %5009 = vst [vmem:[#allocation4 + $0x8] sm:$0x3] %v5008_v51  ;;  %v10301_v33 = vld [vmem:[%s13134_s7 + $0xb0] sm:$0xff]   ;;  %v10304_v50 = vld [vmem:[%s13134_s7 + $0xe8] sm:$0xff]  }
 0x499   : > { %v10303_v51 = vld [vmem:[%s13134_s7 + $0x28] sm:$0xff]  }
 0x49d   : > { %v5011_v10 = vld [vmem:[#allocation4] sm:$0xff] }
 0x49e   : > { %v5277_v9 = vrot.slane %v5011_v10, %v10744_v29  ;;  %v5270_v6 = vcombine.high %v5011_v10, %v5011_v10  ;;  %v10306_v10 = vld [vmem:[%s13134_s7 + $0x60] sm:$0xff]  }
 0x4a0   : > { %v5285_v59 = vcombine.high %v5277_v9, %v5277_v9  ;;  %v12314_v60 = vrot.slane %v5277_v9, %v10744_v29  ;;  %v12317_v14 = vrot.slane %v5270_v6, %v10744_v29  ;;  %v10305_v9 = vld [vmem:[%s13134_s7 + $0xa8] sm:$0xff]   ;;  %v10308_v6 = vld [vmem:[%s13134_s7 + $0xe0] sm:$0xff]  }
 0x4a2   : > { %v12320_v19 = vrot.slane %v5285_v59, %v10744_v29  ;;  %v5286_v31 = vcombine.high %v12317_v14, %v12317_v14  ;;  %v12326_v38 = vcombine.high %v12314_v60, %v12314_v60  ;;  %v5320_v16 = vshrl.u32 %v12314_v60, 16  ;;  %v10307_v59 = vld [vmem:[%s13134_s7 + $0x20] sm:$0xff]  }
 0x4a3   : > { %v12431_v0 = vrot.slane %v12317_v14, %v10744_v29  ;;  %v10310_v14 = vld [vmem:[%s13134_s7 + $0x58] sm:$0xff]  }
 0x4a4   : > { %v5323_v17 = vshrl.u32 %v12320_v19, 16  ;;  %v12334_v61 = vcombine.high %v12320_v19, %v12320_v19  ;;  %v12337_v34 = vrot.slane %v5286_v31, %v10744_v29  ;;  %v5326_v40 = vshrl.u32 %v12326_v38, 16  ;;  %v10312_v31 = vld [vmem:[%s13134_s7 + $0xd8] sm:$0xff]  }
 0x4a5   : > { %v12444_v12 = vcombine.high %v12431_v0, %v12431_v0  ;;  %v5332_v44 = vshrl.u32 %v12431_v0, 16 }
 0x4a6   : > { %5767 = vmatprep.mubr.bf16.mxu1 %v5323_v17  ;;  %v5329_v62 = vshrl.u32 %v12334_v61, 16  ;;  %v5335_v52 = vshrl.u32 %v12337_v34, 16  ;;  %v12350_v58 = vcombine.high %v12337_v34, %v12337_v34  ;;  %v10311_v17 = vld [vmem:[%s13134_s7 + $0x18] sm:$0xff]  }
 0x4a7   : > { %5768 = vmatmul.mubr.bf16.vlgmr.msra.gmra.mxu1 %v5320_v16  ;;  %v5338_v45 = vshrl.u32 %v12444_v12, 16  ;;  %v10316_v16 = vld [vmem:[%s13134_s7 + $0xd0] sm:$0xff]  }
 0x4a8   : > { %9381 = vmatpush3.bf16.msra.mxu1 %v10262_v8  ;;  %5807 = vmatprep.mubr.bf16.mxu0 %v5329_v62  ;;  %v5341_v48 = vshrl.u32 %v12350_v58, 16  ;;  %v10314_v8 = vld [vmem:[%s13134_s7 + $0x50] sm:$0xff]  }
 0x4a9   : > { %5847 = vmatprep.mubr.bf16.mxu1 %v5335_v52  ;;  %5808 = vmatmul.mubr.bf16.vlgmr.msra.gmra.mxu0 %v5326_v40  ;;  %v10315_v62 = vld [vmem:[%s13134_s7 + $0x10] sm:$0xff]   ;;  %v10318_v52 = vld [vmem:[%s13134_s7 + $0x48] sm:$0xff]  }
 0x4aa   : > { %9403 = vmatpush3.bf16.msra.mxu0 %v10265_v37  ;;  %9382 = vmatprep.subr.bf16.mxu1 %v10266_v35  ;;  %v10317_v37 = vld [vmem:[%s13134_s7 + $0x90] sm:$0xff]   ;;  %v10320_v35 = vld [vmem:[%s13134_s7 + $0xc8] sm:$0xff]  }
 0x4ab   : > { %5887 = vmatprep.mubr.bf16.mxu0 %v5341_v48  ;;  %9404 = vmatprep.subr.bf16.mxu0 %v10268_v1  ;;  %v10319_v40 = vld [vmem:[%s13134_s7 + $0x8] sm:$0xff]   ;;  %v10322_v1 = vld [vmem:[%s13134_s7 + $0x40] sm:$0xff]  }
 0x4ac   : > { %9383 = vmatpush3.bf16.msra.mxu1 %v10267_v22  ;;  %v10321_v48 = vld [vmem:[%s13134_s7 + $0x88] sm:$0xff]   ;;  %v10324_v22 = vld [vmem:[%s13134_s7 + $0xc0] sm:$0xff]  }
 0x4ad   : > { %9384 = vmatprep.subr.bf16.mxu1 %v10270_v47  ;;  %v10323_v47 = vld [vmem:[%s13134_s7] sm:$0xff]  }
 0x4ae   : > { %9405 = vmatpush3.bf16.msra.mxu0 %v10269_v25  ;;  %v10326_v25 = vld [vmem:[%s13134_s7 + $0x178] sm:$0xff]  }
 0x4af   : > { %9406 = vmatprep.subr.bf16.mxu0 %v10272_v36  ;;  %v10325_v36 = vld [vmem:[%s13134_s7 + $0x80] sm:$0xff]  }
 0x4b0   : > { %9385 = vmatpush3.bf16.msra.mxu1 %v10271_v57  ;;  %v10328_v57 = vld [vmem:[%s13134_s7 + $0x1f8] sm:$0xff]  }
 0x4b1   : > { %9386 = vmatprep.subr.bf16.mxu1 %v10274_v39  ;;  %v10327_v39 = vld [vmem:[%s13134_s7 + $0x138] sm:$0xff]  }
 0x4b2   : > { %9407 = vmatpush3.bf16.msra.mxu0 %v10273_v3  ;;  %v10330_v3 = vld [vmem:[%s13134_s7 + $0x170] sm:$0xff]  }
 0x4b3   : > { %9408 = vmatprep.subr.bf16.mxu0 %v10276_v27  ;;  %v10329_v27 = vld [vmem:[%s13134_s7 + $0x1b8] sm:$0xff]  }
 0x4b4   : > { %9387 = vmatpush3.bf16.msra.mxu1 %v10275_v23  ;;  %v10332_v23 = vld [vmem:[%s13134_s7 + $0x1f0] sm:$0xff]  }
 0x4b5   : > { %9388 = vmatprep.subr.bf16.mxu1 %v10278_v54  ;;  %v10331_v54 = vld [vmem:[%s13134_s7 + $0x130] sm:$0xff]  }
 0x4b6   : > { %9409 = vmatpush3.bf16.msra.mxu0 %v10277_v56  ;;  %v10334_v56 = vld [vmem:[%s13134_s7 + $0x168] sm:$0xff]  }
 0x4b7   : > { %9410 = vmatprep.subr.bf16.mxu0 %v10280_v4  ;;  %v10338_v4 = vld [vmem:[%s13134_s7 + $0x160] sm:$0xff]  }
 0x4b8   : > { %9389 = vmatpush3.bf16.msra.mxu1 %v10279_v24  ;;  %v10340_v24 = vld [vmem:[%s13134_s7 + $0x1e0] sm:$0xff]  }
 0x4b9   : > { %9390 = vmatprep.subr.bf16.mxu1 %v10282_v30  ;;  %v10339_v30 = vld [vmem:[%s13134_s7 + $0x120] sm:$0xff]  }
 0x4ba   : > { %9411 = vmatpush3.bf16.msra.mxu0 %v10281_v5  ;;  %v10342_v5 = vld [vmem:[%s13134_s7 + $0x158] sm:$0xff]  }
 0x4bb   : > { %9412 = vmatprep.subr.bf16.mxu0 %v10284_v7  ;;  %v10341_v7 = vld [vmem:[%s13134_s7 + $0x1a0] sm:$0xff]  }
 0x4bc   : > { %9391 = vmatpush3.bf16.msra.mxu1 %v10283_v43  ;;  %v10344_v43 = vld [vmem:[%s13134_s7 + $0x1d8] sm:$0xff]  }
 0x4bd   : > { %9392 = vmatprep.subr.bf16.mxu1 %v10286_v26  ;;  %v10343_v26 = vld [vmem:[%s13134_s7 + $0x118] sm:$0xff]  }
 0x4be   : > { %9413 = vmatpush3.bf16.msra.mxu0 %v10285_v49  ;;  %v10346_v49 = vld [vmem:[%s13134_s7 + $0x150] sm:$0xff]  }
 0x4bf   : > { %9414 = vmatprep.subr.bf16.mxu0 %v10288_v15  ;;  %v10345_v15 = vld [vmem:[%s13134_s7 + $0x198] sm:$0xff]  }
 0x4c0   : > { %9393 = vmatpush3.bf16.msra.mxu1 %v10287_v13  ;;  %v10348_v13 = vld [vmem:[%s13134_s7 + $0x1d0] sm:$0xff]  }
 0x4c1   : > { %9394 = vmatprep.subr.bf16.mxu1 %v10290_v53  ;;  %v10347_v53 = vld [vmem:[%s13134_s7 + $0x110] sm:$0xff]  }
 0x4c2   : > { %9415 = vmatpush3.bf16.msra.mxu0 %v10289_v55  ;;  %v10350_v55 = vld [vmem:[%s13134_s7 + $0x148] sm:$0xff]  }
 0x4c3   : > { %9416 = vmatprep.subr.bf16.mxu0 %v10292_v2  ;;  %v12619_v2 = vld [vmem:[#allocation4 + $0x8] sm:$0xff] }
 0x4c4   : > { %9395 = vmatpush3.bf16.msra.mxu1 %v10291_v32  ;;  %v10349_v32 = vld [vmem:[%s13134_s7 + $0x190] sm:$0xff]  }
 0x4c5   : > { %9424 = vmatprep.subr.bf16.mxu1 %v10294_v41  ;;  %v10352_v41 = vld [vmem:[%s13134_s7 + $0x1c8] sm:$0xff]  }
 0x4c6   : > { %9417 = vmatpush3.bf16.msra.mxu0 %v10293_v42  ;;  %v10351_v42 = vld [vmem:[%s13134_s7 + $0x108] sm:$0xff]  }
 0x4c7   : > { %5848 = vmatmul.mubr.bf16.vlgmr.msra.gmra.mxu1 %v5332_v44  ;;  %9446 = vmatprep.subr.bf16.mxu0 %v10296_v20  ;;  %v12632_v20 = vrot.slane %v12619_v2, %v10744_v29  ;;  %v10353_v44 = vld [vmem:[%s13134_s7 + $0x188] sm:$0xff]  }
 0x4c8   : > { %9425 = vmatpush3.bf16.msra.mxu1 %v10295_v11  ;;  %6319 = vmatprep.mubr.bf16.mxu1 %v12320_v19  ;;  %v10309_v19 = vld [vmem:[%s13134_s7 + $0xa0] sm:$0xff]  }
 0x4c9   : > { %5888 = vmatmul.mubr.bf16.vlgmr.msra.gmra.mxu0 %v5338_v45  ;;  %9426 = vmatprep.subr.bf16.mxu1 %v10298_v28  ;;  %v10354_v11 = vld [vmem:[%s13134_s7 + $0x140] sm:$0xff]   ;;  %v6593_v45 = vcombine.high %v12632_v20, %v12632_v20 }
 0x4ca   : > { %9447 = vmatpush3.bf16.msra.mxu0 %v10297_v46  ;;  %6359 = vmatprep.mubr.bf16.mxu0 %v12334_v61  ;;  %v10313_v61 = vld [vmem:[%s13134_s7 + $0x98] sm:$0xff]   ;;  %v10356_v28 = vld [vmem:[%s13134_s7 + $0x1c0] sm:$0xff]  }
 0x4cb   : > { %9448 = vmatprep.subr.bf16.mxu0 %v10300_v63  ;;  %v10355_v46 = vld [vmem:[%s13134_s7 + $0x100] sm:$0xff]   ;;  %v10358_v63 = vld [vmem:[%s13134_s7 + $0x478] sm:$0xff]  }
 0x4cc   : > { %9427 = vmatpush3.bf16.msra.mxu1 %v10299_v21  ;;  %v10357_v21 = vld [vmem:[%s13134_s7 + $0x180] sm:$0xff]  }
 0x4cd   : > { %9428 = vmatprep.subr.bf16.mxu1 %v10302_v18  ;;  %v10360_v18 = vld [vmem:[%s13134_s7 + $0x4f8] sm:$0xff]  }
 0x4ce   : > { %9449 = vmatpush3.bf16.msra.mxu0 %v10301_v33  ;;  %v10359_v33 = vld [vmem:[%s13134_s7 + $0x438] sm:$0xff]  }
 0x4cf   : > { %9450 = vmatprep.subr.bf16.mxu0 %v10304_v50  ;;  %v12661_v50 = vrot.slane %v6593_v45, %v10744_v29  ;;  %v10410_v45 = vld [vmem:[%s13134_s7 + $0x598] sm:$0xff]  }
 0x4d0   : > { %9429 = vmatpush3.bf16.msra.mxu1 %v10303_v51  ;;  %v10362_v51 = vld [vmem:[%s13134_s7 + $0x470] sm:$0xff]  }
 0x4d1   : > { %9430 = vmatprep.subr.bf16.mxu1 %v10306_v10  ;;  %v10361_v10 = vld [vmem:[%s13134_s7 + $0x4b8] sm:$0xff]  }
 0x4d2   : > { %9451 = vmatpush3.bf16.msra.mxu0 %v10305_v9  ;;  %v10364_v9 = vld [vmem:[%s13134_s7 + $0x4f0] sm:$0xff]  }
 0x4d3   : > { %9452 = vmatprep.subr.bf16.mxu0 %v10308_v6  ;;  %v12676_v6 = vcombine.high %v12661_v50, %v12661_v50 }
 0x4d4   : > { %9431 = vmatpush3.bf16.msra.mxu1 %v10307_v59  ;;  %v10363_v59 = vld [vmem:[%s13134_s7 + $0x430] sm:$0xff]  }
 0x4d5   : > { %9432 = vmatprep.subr.bf16.mxu1 %v10310_v14  ;;  %v10365_v14 = vld [vmem:[%s13134_s7 + $0x4b0] sm:$0xff]  }
 0x4d6   : > { %9453 = vmatpush3.bf16.msra.mxu0 %v10309_v19  ;;  %v10368_v19 = vld [vmem:[%s13134_s7 + $0x4e8] sm:$0xff]  }
 0x4d7   : > { %9454 = vmatprep.subr.bf16.mxu0 %v10312_v31  ;;  %v10370_v31 = vld [vmem:[%s13134_s7 + $0x460] sm:$0xff]  }
 0x4d8   : > { %9433 = vmatpush3.bf16.msra.mxu1 %v10311_v17  ;;  %v10369_v17 = vld [vmem:[%s13134_s7 + $0x4a8] sm:$0xff]  }
 0x4d9   : > { %9434 = vmatprep.subr.bf16.mxu1 %v10314_v8  ;;  %v10372_v8 = vld [vmem:[%s13134_s7 + $0x4e0] sm:$0xff]  }
 0x4da   : > { %9455 = vmatpush3.bf16.msra.mxu0 %v10313_v61  ;;  %v10371_v61 = vld [vmem:[%s13134_s7 + $0x420] sm:$0xff]  }
 0x4db   : > { %9456 = vmatprep.subr.bf16.mxu0 %v10316_v16  ;;  %v10374_v16 = vld [vmem:[%s13134_s7 + $0x458] sm:$0xff]  }
 0x4dc   : > { %9435 = vmatpush3.bf16.msra.mxu1 %v10315_v62  ;;  %v10373_v62 = vld [vmem:[%s13134_s7 + $0x4a0] sm:$0xff]  }
 0x4dd   : > { %9436 = vmatprep.subr.bf16.mxu1 %v10318_v52  ;;  %v10376_v52 = vld [vmem:[%s13134_s7 + $0x4d8] sm:$0xff]  }
 0x4de   : > { %9457 = vmatpush3.bf16.msra.mxu0 %v10317_v37  ;;  %v10375_v37 = vld [vmem:[%s13134_s7 + $0x418] sm:$0xff]  }
 0x4df   : > { %9458 = vmatprep.subr.bf16.mxu0 %v10320_v35  ;;  %v10378_v35 = vld [vmem:[%s13134_s7 + $0x450] sm:$0xff]  }
 0x4e0   : > { %9437 = vmatpush3.bf16.msra.mxu1 %v10319_v40  ;;  %v10377_v40 = vld [vmem:[%s13134_s7 + $0x498] sm:$0xff]  }
 0x4e1   : > { %9438 = vmatprep.subr.bf16.mxu1 %v10322_v1  ;;  %v10380_v1 = vld [vmem:[%s13134_s7 + $0x4d0] sm:$0xff]  }
 0x4e2   : > { %9459 = vmatpush3.bf16.msra.mxu0 %v10321_v48  ;;  %v10379_v48 = vld [vmem:[%s13134_s7 + $0x410] sm:$0xff]  }
 0x4e3   : > { %9460 = vmatprep.subr.bf16.mxu0 %v10324_v22  ;;  %v6578_v22 = vcombine.high %v12619_v2, %v12619_v2  ;;  %v10403_v2 = vld [vmem:[%s13134_s7 + $0x560] sm:$0xff]  }
 0x4e4   : > { %9439 = vmatpush3.bf16.msra.mxu1 %v10323_v47  ;;  %v10382_v47 = vld [vmem:[%s13134_s7 + $0x448] sm:$0xff]  }
 0x4e5   : > { %9468 = vmatprep.subr.bf16.mxu1 %v10326_v25  ;;  %v10381_v25 = vld [vmem:[%s13134_s7 + $0x490] sm:$0xff]  }
 0x4e6   : > { %9461 = vmatpush3.bf16.msra.mxu0 %v10325_v36  ;;  %v10384_v36 = vld [vmem:[%s13134_s7 + $0x4c8] sm:$0xff]  }
 0x4e7   : > { %6320 = vmatmul.mubr.bf16.vlgmr.msra.gmra.mxu1 %v12314_v60  ;;  %9490 = vmatprep.subr.bf16.mxu0 %v10328_v57  ;;  %v10333_v60 = vld [vmem:[%s13134_s7 + $0x1b0] sm:$0xff]   ;;  %v10383_v57 = vld [vmem:[%s13134_s7 + $0x408] sm:$0xff]  }
 0x4e8   : > { %9469 = vmatpush3.bf16.msra.mxu1 %v10327_v39  ;;  %6399 = vmatprep.mubr.bf16.mxu1 %v12337_v34  ;;  %v10336_v34 = vld [vmem:[%s13134_s7 + $0x1e8] sm:$0xff]   ;;  %v12746_v39 = vrot.slane %v6578_v22, %v10744_v29 }
 0x4e9   : > { %6360 = vmatmul.mubr.bf16.vlgmr.msra.gmra.mxu0 %v12326_v38  ;;  %9470 = vmatprep.subr.bf16.mxu1 %v10330_v3  ;;  %v10335_v38 = vld [vmem:[%s13134_s7 + $0x128] sm:$0xff]   ;;  %v10386_v3 = vld [vmem:[%s13134_s7 + $0x440] sm:$0xff]  }
 0x4ea   : > { %9491 = vmatpush3.bf16.msra.mxu0 %v10329_v27  ;;  %6439 = vmatprep.mubr.bf16.mxu0 %v12350_v58  ;;  %v10337_v58 = vld [vmem:[%s13134_s7 + $0x1a8] sm:$0xff]  }
 0x4eb   : > { %9492 = vmatprep.subr.bf16.mxu0 %v10332_v23  ;;  %v10385_v27 = vld [vmem:[%s13134_s7 + $0x488] sm:$0xff]   ;;  %v10388_v23 = vld [vmem:[%s13134_s7 + $0x4c0] sm:$0xff]  }
 0x4ec   : > { %9471 = vmatpush3.bf16.msra.mxu1 %v10331_v54  ;;  %v10387_v54 = vld [vmem:[%s13134_s7 + $0x400] sm:$0xff]   ;;  %v10434_v22 = vld [vmem:[%s13134_s7 + $0x6a8] sm:$0xff]  }
 0x4ed   : > { %9472 = vmatprep.subr.bf16.mxu1 %v10334_v56  ;;  %v6594_v56 = vcombine.high %v12746_v39, %v12746_v39 }
 0x4ee   : > { %9493 = vmatpush3.bf16.msra.mxu0 %v10333_v60  ;;  %v10390_v60 = vld [vmem:[%s13134_s7 + $0x578] sm:$0xff]  }
 0x4ef   : > { %9494 = vmatprep.subr.bf16.mxu0 %v10336_v34  ;;  %v10389_v34 = vld [vmem:[%s13134_s7 + $0x480] sm:$0xff]  }
 0x4f0   : > { %9473 = vmatpush3.bf16.msra.mxu1 %v10335_v38  ;;  %v12770_v38 = vrot.slane %v12632_v20, %v10744_v29  ;;  %v10407_v20 = vld [vmem:[%s13134_s7 + $0x558] sm:$0xff]  }
 0x4f1   : > { %9474 = vmatprep.subr.bf16.mxu1 %v10338_v4  ;;  %v10393_v4 = vld [vmem:[%s13134_s7 + $0x5f8] sm:$0xff]  }
 0x4f2   : > { %9495 = vmatpush3.bf16.msra.mxu0 %v10337_v58  ;;  %v10391_v58 = vld [vmem:[%s13134_s7 + $0x538] sm:$0xff]  }
 0x4f3   : > { %9496 = vmatprep.subr.bf16.mxu0 %v10340_v24  ;;  %v12779_v24 = vrot.slane %v6594_v56, %v10744_v29  ;;  %v10444_v56 = vld [vmem:[%s13134_s7 + $0x610] sm:$0xff]  }
 0x4f4   : > { %9475 = vmatpush3.bf16.msra.mxu1 %v10339_v30  ;;  %v10395_v30 = vld [vmem:[%s13134_s7 + $0x570] sm:$0xff]  }
 0x4f5   : > { %9476 = vmatprep.subr.bf16.mxu1 %v10342_v5  ;;  %v10394_v5 = vld [vmem:[%s13134_s7 + $0x5b8] sm:$0xff]  }
 0x4f6   : > { %9497 = vmatpush3.bf16.msra.mxu0 %v10341_v7  ;;  %v12790_v7 = vcombine.high %v12770_v38, %v12770_v38 }
 0x4f7   : > { %9498 = vmatprep.subr.bf16.mxu0 %v10344_v43  ;;  %v10397_v43 = vld [vmem:[%s13134_s7 + $0x5f0] sm:$0xff]  }
 0x4f8   : > { %9477 = vmatpush3.bf16.msra.mxu1 %v10343_v26  ;;  %v12798_v26 = vcombine.high %v12779_v24, %v12779_v24 }
 0x4f9   : > { %9478 = vmatprep.subr.bf16.mxu1 %v10346_v49  ;;  %v10396_v49 = vld [vmem:[%s13134_s7 + $0x530] sm:$0xff]  }
 0x4fa   : > { %9499 = vmatpush3.bf16.msra.mxu0 %v10345_v15  ;;  %v10399_v15 = vld [vmem:[%s13134_s7 + $0x568] sm:$0xff]  }
 0x4fb   : > { %9500 = vmatprep.subr.bf16.mxu0 %v10348_v13  ;;  %v10398_v13 = vld [vmem:[%s13134_s7 + $0x5b0] sm:$0xff]  }
 0x4fc   : > { %9479 = vmatpush3.bf16.msra.mxu1 %v10347_v53  ;;  %v10401_v53 = vld [vmem:[%s13134_s7 + $0x5e8] sm:$0xff]  }
 0x4fd   : > { %9480 = vmatprep.subr.bf16.mxu1 %v10350_v55  ;;  %v10400_v55 = vld [vmem:[%s13134_s7 + $0x528] sm:$0xff]  }
 0x4fe   : > { %9501 = vmatpush3.bf16.msra.mxu0 %v10349_v32  ;;  %v10402_v32 = vld [vmem:[%s13134_s7 + $0x5a8] sm:$0xff]  }
 0x4ff   : > { %9502 = vmatprep.subr.bf16.mxu0 %v10352_v41  ;;  %v10405_v41 = vld [vmem:[%s13134_s7 + $0x5e0] sm:$0xff]  }
 0x500   : > { %9481 = vmatpush3.bf16.msra.mxu1 %v10351_v42  ;;  %v10404_v42 = vld [vmem:[%s13134_s7 + $0x520] sm:$0xff]  }
 0x501   : > { %9482 = vmatprep.subr.bf16.mxu1 %v10354_v11  ;;  %v10406_v11 = vld [vmem:[%s13134_s7 + $0x5a0] sm:$0xff]  }
 0x502   : > { %9503 = vmatpush3.bf16.msra.mxu0 %v10353_v44  ;;  %v10409_v44 = vld [vmem:[%s13134_s7 + $0x5d8] sm:$0xff]  }
 0x503   : > { %9504 = vmatprep.subr.bf16.mxu0 %v10356_v28  ;;  %v10408_v28 = vld [vmem:[%s13134_s7 + $0x518] sm:$0xff]  }
 0x504   : > { %9483 = vmatpush3.bf16.msra.mxu1 %v10355_v46  ;;  %v10411_v46 = vld [vmem:[%s13134_s7 + $0x550] sm:$0xff]  }
 0x505   : > { %9512 = vmatprep.subr.bf16.mxu1 %v10358_v63  ;;  %v10413_v63 = vld [vmem:[%s13134_s7 + $0x5d0] sm:$0xff]  }
 0x506   : > { %9505 = vmatpush3.bf16.msra.mxu0 %v10357_v21  ;;  %v10412_v21 = vld [vmem:[%s13134_s7 + $0x510] sm:$0xff]  }
 0x507   : > { %6400 = vmatmul.mubr.bf16.vlgmr.msra.gmra.mxu1 %v12431_v0  ;;  %9534 = vmatprep.subr.bf16.mxu0 %v10360_v18  ;;  %v10366_v0 = vld [vmem:[%s13134_s7 + $0x468] sm:$0xff]  }
 0x508   : > { %9513 = vmatpush3.bf16.msra.mxu1 %v10359_v33  ;;  %7051 = vmatprep.mubr.bf16.mxu1 %v12661_v50  ;;  %v10415_v18 = vld [vmem:[%s13134_s7 + $0x548] sm:$0xff]   ;;  %v10414_v33 = vld [vmem:[%s13134_s7 + $0x590] sm:$0xff]  }
 0x509   : > { %6440 = vmatmul.mubr.bf16.vlgmr.msra.gmra.mxu0 %v12444_v12  ;;  %9514 = vmatprep.subr.bf16.mxu1 %v10362_v51  ;;  %v10367_v12 = vld [vmem:[%s13134_s7 + $0x428] sm:$0xff]  }
 0x50a   : > { %9535 = vmatpush3.bf16.msra.mxu0 %v10361_v10  ;;  %7091 = vmatprep.mubr.bf16.mxu0 %v12676_v6  ;;  %v10417_v51 = vld [vmem:[%s13134_s7 + $0x5c8] sm:$0xff]  }
 0x50b   : > { %9536 = vmatprep.subr.bf16.mxu0 %v10364_v9  ;;  %v10416_v10 = vld [vmem:[%s13134_s7 + $0x508] sm:$0xff]   ;;  %v10419_v9 = vld [vmem:[%s13134_s7 + $0x540] sm:$0xff]  }
 0x50c   : > { %9515 = vmatpush3.bf16.msra.mxu1 %v10363_v59  ;;  %v10418_v59 = vld [vmem:[%s13134_s7 + $0x588] sm:$0xff]  }
 0x50d   : > { %9516 = vmatprep.subr.bf16.mxu1 %v10366_v0  ;;  %v10421_v0 = vld [vmem:[%s13134_s7 + $0x5c0] sm:$0xff]  }
 0x50e   : > { %9537 = vmatpush3.bf16.msra.mxu0 %v10365_v14  ;;  %v10420_v14 = vld [vmem:[%s13134_s7 + $0x500] sm:$0xff]  }
 0x50f   : > { %9538 = vmatprep.subr.bf16.mxu0 %v10368_v19  ;;  %v10423_v19 = vld [vmem:[%s13134_s7 + $0x678] sm:$0xff]  }
 0x510   : > { %9517 = vmatpush3.bf16.msra.mxu1 %v10367_v12  ;;  %v10422_v12 = vld [vmem:[%s13134_s7 + $0x580] sm:$0xff]  }
 0x511   : > { %9518 = vmatprep.subr.bf16.mxu1 %v10370_v31  ;;  %v12885_v31 = vrot.slane %v12746_v39, %v10744_v29  ;;  %v10426_v29 = vld [vmem:[%s13134_s7 + $0x6b8] sm:$0xff]  }
 0x512   : > { %9539 = vmatpush3.bf16.msra.mxu0 %v10369_v17  ;;  %v10425_v17 = vld [vmem:[%s13134_s7 + $0x6f8] sm:$0xff]  }
 0x513   : > { %9540 = vmatprep.subr.bf16.mxu0 %v10372_v8  ;;  %v10424_v8 = vld [vmem:[%s13134_s7 + $0x638] sm:$0xff]  }
 0x514   : > { %9519 = vmatpush3.bf16.msra.mxu1 %v10371_v61  ;;  %v10427_v61 = vld [vmem:[%s13134_s7 + $0x670] sm:$0xff]   ;;  %v10441_v39 = vld [vmem:[%s13134_s7 + $0x6d8] sm:$0xff]  }
 0x515   : > { %9520 = vmatprep.subr.bf16.mxu1 %v10374_v16  ;;  %v7364_v16 = vshrl.u32 %v12661_v50, 16  ;;  %v10428_v50 = vld [vmem:[%s13134_s7 + $0x630] sm:$0xff]  }
 0x516   : > { %9541 = vmatpush3.bf16.msra.mxu0 %v10373_v62  ;;  %v12903_v62 = vcombine.high %v12885_v31, %v12885_v31 }
 0x517   : > { %9542 = vmatprep.subr.bf16.mxu0 %v10376_v52  ;;  %v10429_v52 = vld [vmem:[%s13134_s7 + $0x6f0] sm:$0xff]  }
 0x518   : > { %9521 = vmatpush3.bf16.msra.mxu1 %v10375_v37  ;;  %v7370_v37 = vshrl.u32 %v12676_v6, 16  ;;  %v10433_v6 = vld [vmem:[%s13134_s7 + $0x6e8] sm:$0xff]  }
 0x519   : > { %9522 = vmatprep.subr.bf16.mxu1 %v10378_v35  ;;  %v10431_v35 = vld [vmem:[%s13134_s7 + $0x668] sm:$0xff]  }
 0x51a   : > { %9543 = vmatpush3.bf16.msra.mxu0 %v10377_v40  ;;  %v10430_v40 = vld [vmem:[%s13134_s7 + $0x6b0] sm:$0xff]  }
 0x51b   : > { %9544 = vmatprep.subr.bf16.mxu0 %v10380_v1  ;;  %v10432_v1 = vld [vmem:[%s13134_s7 + $0x628] sm:$0xff]  }
 0x51c   : > { %9523 = vmatpush3.bf16.msra.mxu1 %v10379_v48  ;;  %v10435_v48 = vld [vmem:[%s13134_s7 + $0x660] sm:$0xff]  }
 0x51d   : > { %9524 = vmatprep.subr.bf16.mxu1 %v10382_v47  ;;  %v10437_v47 = vld [vmem:[%s13134_s7 + $0x6e0] sm:$0xff]  }
 0x51e   : > { %9545 = vmatpush3.bf16.msra.mxu0 %v10381_v25  ;;  %v10436_v25 = vld [vmem:[%s13134_s7 + $0x620] sm:$0xff]  }
 0x51f   : > { %9546 = vmatprep.subr.bf16.mxu0 %v10384_v36  ;;  %v10439_v36 = vld [vmem:[%s13134_s7 + $0x658] sm:$0xff]  }
 0x520   : > { %9525 = vmatpush3.bf16.msra.mxu1 %v10383_v57  ;;  %v10438_v57 = vld [vmem:[%s13134_s7 + $0x6a0] sm:$0xff]  }
 0x521   : > { %9526 = vmatprep.subr.bf16.mxu1 %v10386_v3  ;;  %v10440_v3 = vld [vmem:[%s13134_s7 + $0x618] sm:$0xff]  }
 0x522   : > { %9547 = vmatpush3.bf16.msra.mxu0 %v10385_v27  ;;  %v10443_v27 = vld [vmem:[%s13134_s7 + $0x650] sm:$0xff]  }
 0x523   : > { %9548 = vmatprep.subr.bf16.mxu0 %v10388_v23  ;;  %v10442_v23 = vld [vmem:[%s13134_s7 + $0x698] sm:$0xff]  }
 0x524   : > { %9527 = vmatpush3.bf16.msra.mxu1 %v10387_v54  ;;  %v10445_v54 = vld [vmem:[%s13134_s7 + $0x6d0] sm:$0xff]  }
 0x525   : > { %9556 = vmatprep.subr.bf16.mxu1 %v10390_v60  ;;  %v10447_v60 = vld [vmem:[%s13134_s7 + $0x648] sm:$0xff]  }
 0x526   : > { %9549 = vmatpush3.bf16.msra.mxu0 %v10389_v34  ;;  %v10446_v34 = vld [vmem:[%s13134_s7 + $0x690] sm:$0xff]  }
 0x527   : > { %7052 = vmatmul.mubr.bf16.vlgmr.msra.gmra.mxu1 %v12770_v38  ;;  %9578 = vmatprep.subr.bf16.mxu0 %v10393_v4  ;;  %v10449_v4 = vld [vmem:[%s13134_s7 + $0x6c8] sm:$0xff]  }
 0x528   : > { %9557 = vmatpush3.bf16.msra.mxu1 %v10391_v58  ;;  %7131 = vmatprep.mubr.bf16.mxu1 %v12779_v24  ;;  %v10448_v58 = vld [vmem:[%s13134_s7 + $0x608] sm:$0xff]  }
 0x529   : > { %7092 = vmatmul.mubr.bf16.vlgmr.msra.gmra.mxu0 %v12790_v7  ;;  %9558 = vmatprep.subr.bf16.mxu1 %v10395_v30  ;;  %v10451_v30 = vld [vmem:[%s13134_s7 + $0x640] sm:$0xff]  }
 0x52a   : > { %9579 = vmatpush3.bf16.msra.mxu0 %v10394_v5  ;;  %7171 = vmatprep.mubr.bf16.mxu0 %v12798_v26  ;;  %v10450_v5 = vld [vmem:[%s13134_s7 + $0x688] sm:$0xff]  }
 0x52b   : > { %9580 = vmatprep.subr.bf16.mxu0 %v10397_v43  ;;  %v10453_v43 = vld [vmem:[%s13134_s7 + $0x6c0] sm:$0xff]  }
 0x52c   : > { %9559 = vmatpush3.bf16.msra.mxu1 %v10396_v49  ;;  %v10452_v49 = vld [vmem:[%s13134_s7 + $0x600] sm:$0xff]  }
 0x52d   : > { %9560 = vmatprep.subr.bf16.mxu1 %v10399_v15  ;;  %v10455_v15 = vld [vmem:[%s13134_s7 + $0x778] sm:$0xff]  }
 0x52e   : > { %9581 = vmatpush3.bf16.msra.mxu0 %v10398_v13  ;;  %v10454_v13 = vld [vmem:[%s13134_s7 + $0x680] sm:$0xff]  }
 0x52f   : > { %9582 = vmatprep.subr.bf16.mxu0 %v10401_v53  ;;  %v10457_v53 = vld [vmem:[%s13134_s7 + $0x7f8] sm:$0xff]  }
 0x530   : > { %9561 = vmatpush3.bf16.msra.mxu1 %v10400_v55  ;;  %v10456_v55 = vld [vmem:[%s13134_s7 + $0x738] sm:$0xff]  }
 0x531   : > { %9562 = vmatprep.subr.bf16.mxu1 %v10403_v2  ;;  %v7361_v2 = vshrl.u32 %v12770_v38, 16  ;;  %v10461_v38 = vld [vmem:[%s13134_s7 + $0x7f0] sm:$0xff]  }
 0x532   : > { %9583 = vmatpush3.bf16.msra.mxu0 %v10402_v32  ;;  %v10459_v32 = vld [vmem:[%s13134_s7 + $0x770] sm:$0xff]  }
 0x533   : > { %9584 = vmatprep.subr.bf16.mxu0 %v10405_v41  ;;  %v7376_v41 = vshrl.u32 %v12779_v24, 16  ;;  %v10460_v24 = vld [vmem:[%s13134_s7 + $0x730] sm:$0xff]  }
 0x534   : > { %9563 = vmatpush3.bf16.msra.mxu1 %v10404_v42  ;;  %v10458_v42 = vld [vmem:[%s13134_s7 + $0x7b8] sm:$0xff]  }
 0x535   : > { %9564 = vmatprep.subr.bf16.mxu1 %v10407_v20 }
 0x536   : > { %9585 = vmatpush3.bf16.msra.mxu0 %v10406_v11  ;;  %v7367_v11 = vshrl.u32 %v12790_v7, 16  ;;  %v10463_v7 = vld [vmem:[%s13134_s7 + $0x768] sm:$0xff]  }
 0x537   : > { %9586 = vmatprep.subr.bf16.mxu0 %v10409_v44  ;;  %v7382_v44 = vshrl.u32 %v12798_v26, 16 }
 0x538   : > { %9565 = vmatpush3.bf16.msra.mxu1 %v10408_v28 }
 0x539   : > { %9566 = vmatprep.subr.bf16.mxu1 %v10411_v46 }
 0x53a   : > { %9587 = vmatpush3.bf16.msra.mxu0 %v10410_v45 }
 0x53b   : > { %9588 = vmatprep.subr.bf16.mxu0 %v10413_v63  ;;  %v10462_v63 = vld [vmem:[%s13134_s7 + $0x7b0] sm:$0xff]  }
 0x53c   : > { %9567 = vmatpush3.bf16.msra.mxu1 %v10412_v21 }
 0x53d   : > { %9568 = vmatprep.subr.bf16.mxu1 %v10415_v18  ;;  %v10465_v18 = vld [vmem:[%s13134_s7 + $0x7e8] sm:$0xff]  }
 0x53e   : > { %9589 = vmatpush3.bf16.msra.mxu0 %v10414_v33 }
 0x53f   : > { %9590 = vmatprep.subr.bf16.mxu0 %v10417_v51  ;;  %v10464_v51 = vld [vmem:[%s13134_s7 + $0x728] sm:$0xff]  }
 0x540   : > { %9569 = vmatpush3.bf16.msra.mxu1 %v10416_v10 }
 0x541   : > { %9570 = vmatprep.subr.bf16.mxu1 %v10419_v9 }
 0x542   : > { %9591 = vmatpush3.bf16.msra.mxu0 %v10418_v59  ;;  %v10467_v59 = vld [vmem:[%s13134_s7 + $0x760] sm:$0xff]  }
 0x543   : > { %9592 = vmatprep.subr.bf16.mxu0 %v10421_v0 }
 0x544   : > { %9571 = vmatpush3.bf16.msra.mxu1 %v10420_v14  ;;  %v10466_v14 = vld [vmem:[%s13134_s7 + $0x7a8] sm:$0xff]  }
 0x545   : > { %9600 = vmatprep.subr.bf16.mxu1 %v10423_v19 }
 0x546   : > { %9593 = vmatpush3.bf16.msra.mxu0 %v10422_v12  ;;  %v10469_v12 = vld [vmem:[%s13134_s7 + $0x7e0] sm:$0xff]  }
 0x547   : > { %7132 = vmatmul.mubr.bf16.vlgmr.msra.gmra.mxu1 %v12885_v31  ;;  %9622 = vmatprep.subr.bf16.mxu0 %v10425_v17  ;;  %v10468_v17 = vld [vmem:[%s13134_s7 + $0x720] sm:$0xff]  }
 0x548   : > { %9601 = vmatpush3.bf16.msra.mxu1 %v10424_v8  ;;  %7808 = vmatprep.mubr.bf16.mxu1 %v7364_v16  ;;  %v10471_v8 = vld [vmem:[%s13134_s7 + $0x758] sm:$0xff]  }
 0x549   : > { %7172 = vmatmul.mubr.bf16.vlgmr.msra.gmra.mxu0 %v12903_v62  ;;  %9602 = vmatprep.subr.bf16.mxu1 %v10427_v61  ;;  %v10470_v61 = vld [vmem:[%s13134_s7 + $0x7a0] sm:$0xff]   ;;  %v10473_v16 = vld [vmem:[%s13134_s7 + $0x7d8] sm:$0xff]  }
 0x54a   : > { %9623 = vmatpush3.bf16.msra.mxu0 %v10426_v29  ;;  %7848 = vmatprep.mubr.bf16.mxu0 %v7370_v37  ;;  %v10472_v29 = vld [vmem:[%s13134_s7 + $0x718] sm:$0xff]  }
 0x54b   : > { %9624 = vmatprep.subr.bf16.mxu0 %v10429_v52  ;;  %v10475_v52 = vld [vmem:[%s13134_s7 + $0x750] sm:$0xff]   ;;  %v10474_v37 = vld [vmem:[%s13134_s7 + $0x798] sm:$0xff]  }
 0x54c   : > { %9603 = vmatpush3.bf16.msra.mxu1 %v10428_v50  ;;  %v10477_v50 = vld [vmem:[%s13134_s7 + $0x7d0] sm:$0xff]  }
 0x54d   : > { %9604 = vmatprep.subr.bf16.mxu1 %v10431_v35  ;;  %v10476_v35 = vld [vmem:[%s13134_s7 + $0x710] sm:$0xff]  }
 0x54e   : > { %9625 = vmatpush3.bf16.msra.mxu0 %v10430_v40  ;;  %v10479_v40 = vld [vmem:[%s13134_s7 + $0x748] sm:$0xff]  }
 0x54f   : > { %9626 = vmatprep.subr.bf16.mxu0 %v10433_v6  ;;  %v10478_v6 = vld [vmem:[%s13134_s7 + $0x790] sm:$0xff]  }
 0x550   : > { %9605 = vmatpush3.bf16.msra.mxu1 %v10432_v1  ;;  %v10481_v1 = vld [vmem:[%s13134_s7 + $0x7c8] sm:$0xff]  }
 0x551   : > { %9606 = vmatprep.subr.bf16.mxu1 %v10435_v48  ;;  %v10480_v48 = vld [vmem:[%s13134_s7 + $0x708] sm:$0xff]  }
 0x552   : > { %9627 = vmatpush3.bf16.msra.mxu0 %v10434_v22  ;;  %v10483_v22 = vld [vmem:[%s13134_s7 + $0x740] sm:$0xff]  }
 0x553   : > { %9628 = vmatprep.subr.bf16.mxu0 %v10437_v47  ;;  %v10482_v47 = vld [vmem:[%s13134_s7 + $0x788] sm:$0xff]  }
 0x554   : > { %9607 = vmatpush3.bf16.msra.mxu1 %v10436_v25  ;;  %v10485_v25 = vld [vmem:[%s13134_s7 + $0x7c0] sm:$0xff]  }
 0x555   : > { %9608 = vmatprep.subr.bf16.mxu1 %v10439_v36  ;;  %v10484_v36 = vld [vmem:[%s13134_s7 + $0x700] sm:$0xff]  }
 0x556   : > { %9629 = vmatpush3.bf16.msra.mxu0 %v10438_v57  ;;  %v10486_v57 = vld [vmem:[%s13134_s7 + $0x780] sm:$0xff]  }
 0x557   : > { %9630 = vmatprep.subr.bf16.mxu0 %v10441_v39  ;;  %v7373_v39 = vshrl.u32 %v12885_v31, 16 }
 0x558   : > { %9609 = vmatpush3.bf16.msra.mxu1 %v10440_v3 }
 0x559   : > { %9610 = vmatprep.subr.bf16.mxu1 %v10443_v27  ;;  %v7379_v27 = vshrl.u32 %v12903_v62, 16 }
 0x55a   : > { %9631 = vmatpush3.bf16.msra.mxu0 %v10442_v23 }
 0x55b   : > { %9632 = vmatprep.subr.bf16.mxu0 %v10445_v54 }
 0x55c   : > { %9611 = vmatpush3.bf16.msra.mxu1 %v10444_v56 }
 0x55d   : > { %9612 = vmatprep.subr.bf16.mxu1 %v10447_v60 }
 0x55e   : > { %9633 = vmatpush3.bf16.msra.mxu0 %v10446_v34 }
 0x55f   : > { %9634 = vmatprep.subr.bf16.mxu0 %v10449_v4 }
 0x560   : > { %9613 = vmatpush3.bf16.msra.mxu1 %v10448_v58 }
 0x561   : > { %9614 = vmatprep.subr.bf16.mxu1 %v10451_v30 }
 0x562   : > { %9635 = vmatpush3.bf16.msra.mxu0 %v10450_v5 }
 0x563   : > { %9636 = vmatprep.subr.bf16.mxu0 %v10453_v43 }
 0x564   : > { %9615 = vmatpush3.bf16.msra.mxu1 %v10452_v49 }
 0x565   : > { %9644 = vmatprep.subr.bf16.mxu1 %v10455_v15 }
 0x566   : > { %9637 = vmatpush3.bf16.msra.mxu0 %v10454_v13 }
 0x567   : > { %7809 = vmatmul.mubr.bf16.vlgmr.msra.gmra.mxu1 %v7361_v2  ;;  %v9352_v20 = vpop.f32.mrf.mxu1  ;;  %9666 = vmatprep.subr.bf16.mxu0 %v10457_v53 }
 0x568   : > { %9645 = vmatpush3.bf16.msra.mxu1 %v10456_v55  ;;  %7888 = vmatprep.mubr.bf16.mxu1 %v7376_v41 }
 0x569   : > { %7849 = vmatmul.mubr.bf16.vlgmr.msra.gmra.mxu0 %v7367_v11  ;;  %v9353_v28 = vpop.f32.mrf.mxu1  ;;  %v9374_v46 = vpop.f32.mrf.mxu0  ;;  %9646 = vmatprep.subr.bf16.mxu1 %v10459_v32 }
 0x56a   : > { %v9354_v45 = vadd.f32 %v9353_v28, %v9352_v20  ;;  %9667 = vmatpush3.bf16.msra.mxu0 %v10458_v42  ;;  %7928 = vmatprep.mubr.bf16.mxu0 %v7382_v44 }
 0x56b   : > { %v9355_v26 = vpop.f32.mrf.mxu1  ;;  %v9375_v21 = vpop.f32.mrf.mxu0  ;;  %9668 = vmatprep.subr.bf16.mxu0 %v10461_v38 }
 0x56c   : > { %v9376_v33 = vadd.f32 %v9375_v21, %v9374_v46  ;;  %9647 = vmatpush3.bf16.msra.mxu1 %v10460_v24 }
 0x56d   : > { %v9356_v10 = vpop.f32.mrf.mxu1  ;;  %v9377_v9 = vpop.f32.mrf.mxu0  ;;  %9648 = vmatprep.subr.bf16.mxu1 %v10463_v7 }
 0x56e   : > { %v5810_v0 = vadd.f32 %v9376_v33, %v9354_v45  ;;  %9669 = vmatpush3.bf16.msra.mxu0 %v10462_v63 }
 0x56f   : > { %v9378_v19 = vpop.f32.mrf.mxu0  ;;  %9670 = vmatprep.subr.bf16.mxu0 %v10465_v18 }
 0x570   : > { %9649 = vmatpush3.bf16.msra.mxu1 %v10464_v51 }
 0x571   : > { %9650 = vmatprep.subr.bf16.mxu1 %v10467_v59 }
 0x572   : > { %9671 = vmatpush3.bf16.msra.mxu0 %v10466_v14 }
 0x573   : > { %9672 = vmatprep.subr.bf16.mxu0 %v10469_v12 }
 0x574   : > { %9651 = vmatpush3.bf16.msra.mxu1 %v10468_v17 }
 0x575   : > { %9652 = vmatprep.subr.bf16.mxu1 %v10471_v8 }
 0x576   : > { %9673 = vmatpush3.bf16.msra.mxu0 %v10470_v61 }
 0x577   : > { %9674 = vmatprep.subr.bf16.mxu0 %v10473_v16 }
 0x578   : > { %9653 = vmatpush3.bf16.msra.mxu1 %v10472_v29 }
 0x579   : > { %9654 = vmatprep.subr.bf16.mxu1 %v10475_v52 }
 0x57a   : > { %9675 = vmatpush3.bf16.msra.mxu0 %v10474_v37 }
 0x57b   : > { %9676 = vmatprep.subr.bf16.mxu0 %v10477_v50 }
 0x57c   : > { %9655 = vmatpush3.bf16.msra.mxu1 %v10476_v35 }
 0x57d   : > { %9656 = vmatprep.subr.bf16.mxu1 %v10479_v40 }
 0x57e   : > { %9677 = vmatpush3.bf16.msra.mxu0 %v10478_v6 }
 0x57f   : > { %9678 = vmatprep.subr.bf16.mxu0 %v10481_v1 }
 0x580   : > { %9657 = vmatpush3.bf16.msra.mxu1 %v10480_v48 }
 0x581   : > { %9658 = vmatprep.subr.bf16.mxu1 %v10483_v22 }
 0x582   : > { %9679 = vmatpush3.bf16.msra.mxu0 %v10482_v47 }
 0x583   : > { %9680 = vmatprep.subr.bf16.mxu0 %v10485_v25 }
 0x584   : > { %9659 = vmatpush3.bf16.msra.mxu1 %v10484_v36 }
 0x586   : > { %9681 = vmatpush3.bf16.msra.mxu0 %v10486_v57 }
 0x587   : > { %v9396_v3 = vpop.f32.mrf.mxu1  ;;  %7889 = vmatmul.mubr.bf16.vlgmr.msra.gmra.mxu1 %v7373_v39 }
 0x589   : > { %v9397_v23 = vpop.f32.mrf.mxu1  ;;  %v9418_v54 = vpop.f32.mrf.mxu0  ;;  %7929 = vmatmul.mubr.bf16.vlgmr.msra.gmra.mxu0 %v7379_v27 }
 0x58a   : > { %v9398_v56 = vadd.f32 %v9397_v23, %v9396_v3 }
 0x58b   : > { %v9399_v60 = vpop.f32.mrf.mxu1  ;;  %v9419_v34 = vpop.f32.mrf.mxu0 }
 0x58c   : > { %v5850_v4 = vadd.f32 %v9398_v56, %v5810_v0  ;;  %v9420_v58 = vadd.f32 %v9419_v34, %v9418_v54 }
 0x58d   : > { %v9400_v30 = vpop.f32.mrf.mxu1  ;;  %v9421_v5 = vpop.f32.mrf.mxu0 }
 0x58e   : > { %v5890_v43 = vadd.f32 %v9420_v58, %v5850_v4 }
 0x58f   : > { %v9422_v49 = vpop.f32.mrf.mxu0 }
 0x5a7   : > { %v9440_v15 = vpop.f32.mrf.mxu1 }
 0x5a9   : > { %v9441_v13 = vpop.f32.mrf.mxu1  ;;  %v9462_v31 = vpop.f32.mrf.mxu0 }
 0x5aa   : > { %v9442_v53 = vadd.f32 %v9441_v13, %v9440_v15 }
 0x5ab   : > { %v9443_v55 = vpop.f32.mrf.mxu1  ;;  %v9463_v2 = vpop.f32.mrf.mxu0 }
 0x5ac   : > { %v6322_v32 = vadd.f32 %v9442_v53, %v5890_v43  ;;  %v9464_v62 = vadd.f32 %v9463_v2, %v9462_v31 }
 0x5ad   : > { %v9444_v41 = vpop.f32.mrf.mxu1  ;;  %v9465_v42 = vpop.f32.mrf.mxu0 }
 0x5ae   : > { %v6362_v20 = vadd.f32 %v9464_v62, %v6322_v32  ;;  %v5010_v32 = vld [vmem:[%s13135_s8] sm:$0x1] }
 0x5af   : > { %v9466_v11 = vpop.f32.mrf.mxu0 }
 0x5c7   : > { %v9484_v38 = vpop.f32.mrf.mxu1 }
 0x5c9   : > { %v9485_v44 = vpop.f32.mrf.mxu1  ;;  %v9506_v24 = vpop.f32.mrf.mxu0 }
 0x5ca   : > { %v9486_v28 = vadd.f32 %v9485_v44, %v9484_v38 }
 0x5cb   : > { %v9487_v46 = vpop.f32.mrf.mxu1  ;;  %v9507_v7 = vpop.f32.mrf.mxu0 }
 0x5cc   : > { %v6402_v45 = vadd.f32 %v9486_v28, %v6362_v20  ;;  %v9508_v63 = vadd.f32 %v9507_v7, %v9506_v24 }
 0x5cd   : > { %v9488_v26 = vpop.f32.mrf.mxu1  ;;  %v9509_v21 = vpop.f32.mrf.mxu0 }
 0x5ce   : > { %v6442_v18 = vadd.f32 %v9508_v63, %v6402_v45 }
 0x5cf   : > { %v9510_v33 = vpop.f32.mrf.mxu0 }
 0x5e7   : > { %v9528_v51 = vpop.f32.mrf.mxu1 }
 0x5e9   : > { %v9529_v10 = vpop.f32.mrf.mxu1  ;;  %v9550_v9 = vpop.f32.mrf.mxu0 }
 0x5ea   : > { %v9530_v59 = vadd.f32 %v9529_v10, %v9528_v51 }
 0x5eb   : > { %v9531_v0 = vpop.f32.mrf.mxu1  ;;  %v9551_v14 = vpop.f32.mrf.mxu0 }
 0x5ec   : > { %v9552_v19 = vadd.f32 %v9551_v14, %v9550_v9 }
 0x5ed   : > { %v9532_v12 = vpop.f32.mrf.mxu1  ;;  %v9553_v17 = vpop.f32.mrf.mxu0 }
 0x5ee   : > { %v7094_v8 = vadd.f32 %v9552_v19, %v9530_v59 }
 0x5ef   : > { %v9554_v61 = vpop.f32.mrf.mxu0 }
 0x607   : > { %v9572_v16 = vpop.f32.mrf.mxu1 }
 0x609   : > { %v9573_v29 = vpop.f32.mrf.mxu1  ;;  %v9594_v52 = vpop.f32.mrf.mxu0 }
 0x60a   : > { %v9574_v37 = vadd.f32 %v9573_v29, %v9572_v16 }
 0x60b   : > { %v9575_v50 = vpop.f32.mrf.mxu1  ;;  %v9595_v35 = vpop.f32.mrf.mxu0 }
 0x60c   : > { %v7134_v40 = vadd.f32 %v9574_v37, %v7094_v8  ;;  %v9596_v6 = vadd.f32 %v9595_v35, %v9594_v52 }
 0x60d   : > { %v9576_v1 = vpop.f32.mrf.mxu1  ;;  %v9597_v48 = vpop.f32.mrf.mxu0 }
 0x60e   : > { %v7174_v22 = vadd.f32 %v9596_v6, %v7134_v40 }
 0x60f   : > { %v9598_v47 = vpop.f32.mrf.mxu0 }
 0x610   : > { %v7179_v25 = vadd.f32 %v7174_v22, %v6442_v18 }
 0x627   : > { %v9616_v36 = vpop.f32.mrf.mxu1 }
 0x629   : > { %v9617_v57 = vpop.f32.mrf.mxu1  ;;  %v9638_v39 = vpop.f32.mrf.mxu0 }
 0x62a   : > { %v9618_v4 = vadd.f32 %v9617_v57, %v9616_v36 }
 0x62b   : > { %v9619_v3 = vpop.f32.mrf.mxu1  ;;  %v9639_v27 = vpop.f32.mrf.mxu0 }
 0x62c   : > { %v9640_v60 = vadd.f32 %v9639_v27, %v9638_v39 }
 0x62d   : > { %v9620_v23 = vpop.f32.mrf.mxu1  ;;  %v9641_v54 = vpop.f32.mrf.mxu0 }
 0x62e   : > { %v7851_v5 = vadd.f32 %v9640_v60, %v9618_v4 }
 0x62f   : > { %v9642_v56 = vpop.f32.mrf.mxu0 }
 0x647   : > { %v9660_v34 = vpop.f32.mrf.mxu1 }
 0x649   : > { %v9661_v58 = vpop.f32.mrf.mxu1  ;;  %v9682_v30 = vpop.f32.mrf.mxu0 }
 0x64a   : > { %v9662_v43 = vadd.f32 %v9661_v58, %v9660_v34 }
 0x64b   : > { %v9663_v49 = vpop.f32.mrf.mxu1  ;;  %v9683_v15 = vpop.f32.mrf.mxu0 }
 0x64c   : > { %v7891_v13 = vadd.f32 %v9662_v43, %v7851_v5  ;;  %v9684_v31 = vadd.f32 %v9683_v15, %v9682_v30 }
 0x64d   : > { %v9664_v53 = vpop.f32.mrf.mxu1  ;;  %v9685_v55 = vpop.f32.mrf.mxu0 }
 0x64e   : > { %v7931_v2 = vadd.f32 %v9684_v31, %v7891_v13 }
 0x64f   : > { %v9686_v62 = vpop.f32.mrf.mxu0 }
 0x650   : > { %v7936_v41 = vadd.f32 %v7931_v2, %v7179_v25 }
 0x652   : > { %v7937_v42 = vadd.f32 %v7936_v41, %v5010_v32 }
 0x654   : > { %v7938_v20 = vmax.f32 %v7937_v42, 0.0 }
 0x656   : > { %7939 = vst [vmem:[%s339_s14] sm:$0x1] %v7938_v20 }
 0x657   : > { %10526 = shalt.err (!%p10523_p0)
}
 0x658   : > { %s10527_s28 = scalar_lea.hbm %s7951_s22, 16  ;;  %s10531_s14 = scalar_lea.hbm %s13136_s9, 32 }
 0x659   : > { %p10528_p1 = scmp.ne.s32.totalorder %s7951_s22, %s10527_s28  ;;  %p10532_p4 = scmp.lt.s32.totalorder %s7951_s22, %s13136_s9 }
 0x65a   : > { %p10533_p7 = scmp.lt.s32.totalorder %s10531_s14, %s10527_s28 }
 0x65b   : > { %p10529_p2 = pnand %p10528_p1, %p10676_p5 }
 0x65c   : > { %p10534_p8 = por %p10533_p7, %p10532_p4 }
 0x65d   : > { %p10530_p3 = pneg %p10529_p2 }
 0x65f   : > { %p10535_p6 = pnand %p10534_p8, %p10530_p3 }
 0x661   : > { %10538 = shalt.err (!%p10535_p6)
}
 0x662   : > { %9716 = dma.vmem_to_hbm [thread:$0]  (%p10676_p5), %s7954_s29, 16, %s7951_s22, %s7941_s21  }
 0x663 PF: > { %p9728_p9 = scmp.ge.s32.totalorder %s10577_s12, 2  ;;  %s7965_s23 = sand.u32 1, %s10565_s30  }
 0x664   : > { %p13199_p10 = scmp.ne.s32.totalorder %s13145_s20, 0  ;;  %s7966_s24 = scalar_lea.sflag [#allocation7], %s7965_s23 }
 0x666   : > { %p9723_p11 = pnand %p9728_p9, %p13199_p10 }
 0x668   : > { %p9724_p12 = pneg %p9723_p11 }
 0x66a   : > { %10560 = dma.done.wait (%p9724_p12), %s7966_s24, 16  }
 0x66b   : > { %10562 = vsyncadd (%p9724_p12), %s7966_s24, 4294967280  ;;  %p20_p13 = scmp.ge.s32.totalorder %s10663_s15, 4   ;;  %s13200_s30 = smov %s10569_s10 }
 0x66c   : > { %s13201_s10 = smov %s10573_s11  ;;  %s13202_s11 = smov %s10674_s18 }
 0x66d   : > { %s13203_s12 = smov %s10663_s15  ;;  %22 = sbr.rel (!%p20_p13) target bundleno = 4 (0x4), region = 110 }
 0x672   :  { %7970 = vsyncpa [#allocation6], 1 }
 0x673   :  { %7972 = vsyncpa [#allocation6 + $0x1], 1 }
 0x674   :  { %7973 = vsyncpa [#allocation7], 1 }
 0x675   :  { %7975 = vsyncpa [#allocation7 + $0x1], 1 }

</bundles_post_ra>
